<compile_context>
chip_gen: v5e
topology: v5e:2x2
jax: 0.10.0
libtpu: 0.0.40
codegen_flags: <defaults>
</compile_context>

<pallas_src>
import functools
import math

import jax
import jax.numpy as jnp
from jax import lax
from jax.experimental import pallas as pl
from jax.experimental.pallas import tpu as pltpu

CHAR_SMI_SET_LEN = 64
PT_FEATURE_SIZE = 33

_VMEM = pl.BlockSpec(memory_space=pltpu.MemorySpace.VMEM)
_SMEM = pl.BlockSpec(memory_space=pltpu.MemorySpace.SMEM)

_VMEM_LIMIT = 48 * 1024 * 1024  # fits v7x 64 MiB physical VMEM with headroom


def _const_map(nd):
    """Index map that pins a weight to block (0,...,0) for every grid step."""
    return lambda b: (0,) * nd


# ----------------------------------------------------------------------------
# Residual-block branch kernel (seq: 4 x BlockA, smi: 3 x BlockB)
# ----------------------------------------------------------------------------
def _run_block(x, wc1_ref, bc1_ref, wd_ref, s2_ref, t2_ref, a1, a2,
               hp_ref, shifts, maxpad, add, L):
    """One DilatedParllelResidualBlock (A or B), channels-last, per batch row.

    x      : (L, Cin) f32 activations
    wc1_ref: (Cin, n)  bf16   1x1 conv (br1 BN folded)
    bc1_ref: (1, n)    f32    1x1 conv bias (br1 BN folded)
    wd_ref : (S, n, nOut) bf16  per-shift dilated weights with the prefix-add
                                (add1..add4) and channel-concat structure folded in
    s2_ref, t2_ref: (1, nOut) f32  folded br2 BatchNorm affine
    a1, a2 : scalar PReLU alphas
    hp_ref : (L + 2*maxpad, n) f32 VMEM scratch (zero-padded h)
    """
    # 1x1 conv + folded BN + PReLU
    h = jnp.dot(x.astype(jnp.bfloat16), wc1_ref[...],
                preferred_element_type=jnp.float32)
    h = h + bc1_ref[...]
    h = jnp.where(h > 0, h, a1 * h)

    n = hp_ref.shape[1]
    # zero only the pad rows, then write h into the middle
    hp_ref[0:maxpad, :] = jnp.zeros((maxpad, n), jnp.float32)
    hp_ref[maxpad + L:maxpad + L + maxpad, :] = jnp.zeros((maxpad, n),
                                                          jnp.float32)
    hp_ref[maxpad:maxpad + L, :] = h

    # shift-accumulated dilated convolutions (one MXU matmul per tap shift)
    n_out = s2_ref.shape[-1]
    comb = jnp.zeros((L, n_out), jnp.float32)
    for si, s in enumerate(shifts):
        sl = hp_ref[maxpad + s:maxpad + s + L, :].astype(jnp.bfloat16)
        comb = comb + jnp.dot(sl, wd_ref[si],
                              preferred_element_type=jnp.float32)
    if add:
        comb = comb + x
    y = comb * s2_ref[...] + t2_ref[...]
    return jnp.where(y > 0, y, a2 * y)


def _branch_kernel(*refs, nb, block_cfg, L, onehot_vocab):
    """Whole branch for one batch element (grid=(B,)).

    refs = [x_ref, (wc1,bc1,wd,s2,t2) x nb, alphas(SMEM (nb,2)),
            o_ref (1,1,nOut), hp scratch x nb]
    """
    x_ref = refs[0]
    w_refs = refs[1:1 + 5 * nb]
    a_ref = refs[1 + 5 * nb]
    o_ref = refs[2 + 5 * nb]
    hp_refs = refs[3 + 5 * nb:]

    if onehot_vocab is not None:
        # SMILES: build one-hot in-register; embedding table is folded into
        # the first block's 1x1 conv weight.
        idx = x_ref[0]                                        # (L, 1) int32
        iota = lax.broadcasted_iota(jnp.int32, (L, onehot_vocab), 1)
        x = jnp.where(idx == iota, 1.0, 0.0)                  # (L, V) f32
    else:
        x = x_ref[0]                                          # (L, Cin) f32

    for i in range(nb):
        shifts, maxpad, add = block_cfg[i]
        wc1, bc1, wd, s2, t2 = w_refs[5 * i:5 * i + 5]
        x = _run_block(x, wc1, bc1, wd, s2, t2,
                       a_ref[i, 0], a_ref[i, 1], hp_refs[i],
                       shifts, maxpad, add, L)

    # AdaptiveMaxPool1d(1) epilogue
    o_ref[...] = jnp.max(x, axis=0).reshape(1, 1, -1)


def pallas_branch(x, blocks, alphas, *, onehot_vocab=None):
    """One pallas_call for a whole residual branch, gridded over batch."""
    B, L = x.shape[0], x.shape[1]
    nb = len(blocks)
    n_out = blocks[-1]['s2'].shape[-1]

    weight_arrays = []
    in_specs = [pl.BlockSpec((1,) + x.shape[1:], lambda b: (b, 0, 0))]
    for blk in blocks:
        for name in ('w_c1', 'b_c1', 'wd', 's2', 't2'):
            arr = blk[name]
            weight_arrays.append(arr)
            in_specs.append(pl.BlockSpec(arr.shape, _const_map(arr.ndim)))
    in_specs.append(_SMEM)  # PReLU alphas

    scratch = [pltpu.VMEM((L + 2 * blk['maxpad'], blk['w_c1'].shape[-1]),
                          jnp.float32) for blk in blocks]
    cfg = tuple((blk['shifts'], blk['maxpad'], blk['add']) for blk in blocks)
    kern = functools.partial(_branch_kernel, nb=nb, block_cfg=cfg, L=L,
                             onehot_vocab=onehot_vocab)

    return pl.pallas_call(
        kern,
        grid=(B,),
        out_shape=jax.ShapeDtypeStruct((B, 1, n_out), jnp.float32),
        in_specs=in_specs,
        out_specs=pl.BlockSpec((1, 1, n_out), lambda b: (b, 0, 0)),
        scratch_shapes=scratch,
        compiler_params=pltpu.CompilerParams(
            dimension_semantics=("parallel",),
            vmem_limit_bytes=_VMEM_LIMIT),
    )(x, *weight_arrays, alphas)


# ----------------------------------------------------------------------------
# Pocket branch: 3 x [valid Conv1d(k=3) + folded BN + PReLU] + global max pool
# ----------------------------------------------------------------------------
def _pkt_kernel(x_ref, w1, b1, w2, b2, w3, b3, a_ref, o_ref):
    """One batch element.  seq_embed Linear is folded into layer 1's taps;
    each layer's 3 taps are applied as shift-accumulated matmuls."""
    h = x_ref[0]                                              # (L0, C0) f32
    for li, (w, bias) in enumerate(((w1, b1), (w2, b2), (w3, b3))):
        L_out = h.shape[0] - 2
        hb = h.astype(jnp.bfloat16)
        y = jnp.dot(hb[0:L_out], w[0], preferred_element_type=jnp.float32)
        y = y + jnp.dot(hb[1:1 + L_out], w[1],
                        preferred_element_type=jnp.float32)
        y = y + jnp.dot(hb[2:2 + L_out], w[2],
                        preferred_element_type=jnp.float32)
        y = y + bias[...]
        a = a_ref[li]
        h = jnp.where(y > 0, y, a * y)
    o_ref[...] = jnp.max(h, axis=0).reshape(1, 1, -1)


def pallas_pkt(pf, pk):
    B, Lp, C = pf.shape
    arrays = [pk['w1'], pk['b1'], pk['w2'], pk['b2'], pk['w3'], pk['b3']]
    in_specs = [pl.BlockSpec((1, Lp, C), lambda b: (b, 0, 0))]
    in_specs += [pl.BlockSpec(a.shape, _const_map(a.ndim)) for a in arrays]
    in_specs.append(_SMEM)
    n_out = pk['b3'].shape[-1]
    return pl.pallas_call(
        _pkt_kernel,
        grid=(B,),
        out_shape=jax.ShapeDtypeStruct((B, 1, n_out), jnp.float32),
        in_specs=in_specs,
        out_specs=pl.BlockSpec((1, 1, n_out), lambda b: (b, 0, 0)),
        compiler_params=pltpu.CompilerParams(
            dimension_semantics=("parallel",),
            vmem_limit_bytes=_VMEM_LIMIT),
    )(pf, *arrays, pk['alphas'])


# ----------------------------------------------------------------------------
# Classifier: concat(seq, pkt, smi) -> Linear+PReLU x2 -> Linear(64,1)+PReLU
# ----------------------------------------------------------------------------
def _cls_kernel(s_ref, p_ref, m_ref, w1, b1, w2, b2, w3, b3, a_ref, o_ref):
    x = jnp.concatenate([s_ref[...], p_ref[...], m_ref[...]], axis=-1)
    h = jnp.dot(x.astype(jnp.bfloat16), w1[...],
                preferred_element_type=jnp.float32) + b1[...]
    h = jnp.where(h > 0, h, a_ref[0] * h)
    h = jnp.dot(h.astype(jnp.bfloat16), w2[...],
                preferred_element_type=jnp.float32) + b2[...]
    h = jnp.where(h > 0, h, a_ref[1] * h)
    # final 64 -> 1 layer as a lane reduction (no 1-wide MXU pass)
    h = jnp.sum(h * w3[...], axis=-1, keepdims=True) + b3[...]
    o_ref[...] = jnp.where(h > 0, h, a_ref[2] * h)


def pallas_classifier(seq_c, pkt_c, smi_c, cp):
    B = seq_c.shape[0]
    return pl.pallas_call(
        _cls_kernel,
        out_shape=jax.ShapeDtypeStruct((B, 1), jnp.float32),
        in_specs=[_VMEM] * 9 + [_SMEM],
        out_specs=_VMEM,
    )(seq_c, pkt_c, smi_c, cp['w1'], cp['b1'], cp['w2'], cp['b2'],
      cp['w3'], cp['b3'], cp['alphas'])


# ----------------------------------------------------------------------------
# Deterministic parameter construction (with inference-time folding)
# ----------------------------------------------------------------------------
def _bn_fold(key, c, eps=1e-5):
    k1, k2, k3, k4 = jax.random.split(key, 4)
    gamma = jax.random.uniform(k1, (c,), jnp.float32, 0.5, 1.5)
    beta = jax.random.normal(k2, (c,), jnp.float32) * 0.1
    mean = jax.random.normal(k3, (c,), jnp.float32) * 0.1
    var = jax.random.uniform(k4, (c,), jnp.float32, 0.5, 1.5)
    scale = gamma / jnp.sqrt(var + eps)
    shift = beta - mean * scale
    return scale, shift


def _prelu(key):
    return jax.random.uniform(key, (), jnp.float32, 0.05, 0.45)


def _linear_w(key, k_in, n_out):
    kw, kb = jax.random.split(key)
    w = jax.random.normal(kw, (k_in, n_out), jnp.float32) / math.sqrt(k_in)
    b = jax.random.normal(kb, (n_out,), jnp.float32) * 0.1
    return w, b


def _conv_w(key, cin, cout):
    # taps-first (3, Cin, Cout); output[l] = sum_k x[l + (k-1)*d] @ w[k]
    return jax.random.normal(key, (3, cin, cout), jnp.float32) / math.sqrt(3 * cin)


def _build_dilated_weight(conv_ws, dilations, widths, contributors, shifts,
                          n, n_out):
    """Fold all dilated branches, prefix-sum adds and the channel concat into
    a per-shift weight stack (len(shifts), n, n_out)."""
    shift_pos = {s: i for i, s in enumerate(shifts)}
    W = jnp.zeros((len(shifts), n, n_out), jnp.float32)
    col = 0
    for blk_i, contrib in enumerate(contributors):
        width = widths[blk_i]
        for ci in contrib:
            d = dilations[ci]
            w = conv_ws[ci]                       # (3, n, width)
            for k in range(3):
                si = shift_pos[(k - 1) * d]
                W = W.at[si, :, col:col + width].add(w[k])
        col += width
    return W


def _init_block(key, n_in, n_out, dilations, n, n1, contributors):
    nks = 5 + len(dilations)
    ks = jax.random.split(key, nks)
    w_c1, b_c1 = _linear_w(ks[0], n_in, n)
    s1, t1 = _bn_fold(ks[1], n)
    a1 = _prelu(ks[2])
    # fold br1 BatchNorm into the 1x1 conv
    w_c1 = w_c1 * s1[None, :]
    b_c1 = b_c1 * s1 + t1
    widths = [n1] + [n] * (len(dilations) - 1)
    conv_ws = [_conv_w(ks[3 + i], n, widths[i]) for i in range(len(dilations))]
    shifts = tuple(sorted({(k - 1) * d for d in dilations for k in range(3)}))
    wd = _build_dilated_weight(conv_ws, dilations, widths, contributors,
                               shifts, n, n_out)
    s2, t2 = _bn_fold(ks[3 + len(dilations)], n_out)
    a2 = _prelu(ks[4 + len(dilations)])
    return dict(w_c1=w_c1, b_c1=b_c1.reshape(1, n), wd=wd,
                s2=s2.reshape(1, n_out), t2=t2.reshape(1, n_out),
                a1=a1, a2=a2,
                shifts=shifts, maxpad=max(dilations), add=(n_in == n_out))


def init_block_a(key, n_in, n_out):
    n = n_out // 5
    n1 = n_out - 4 * n
    return _init_block(key, n_in, n_out, (1, 2, 4, 8, 16), n, n1,
                       [[0], [1], [1, 2], [1, 2, 3], [1, 2, 3, 4]])


def init_block_b(key, n_in, n_out):
    n = n_out // 4
    n1 = n_out - 3 * n
    return _init_block(key, n_in, n_out, (1, 2, 4, 8), n, n1,
                       [[0], [1], [1, 2], [1, 2, 3]])


def _finalize_blocks(blocks):
    alphas = jnp.stack([jnp.stack([b['a1'], b['a2']]) for b in blocks])
    out = []
    for b in blocks:
        out.append(dict(
            w_c1=b['w_c1'].astype(jnp.bfloat16),
            b_c1=b['b_c1'],
            wd=b['wd'].astype(jnp.bfloat16),
            s2=b['s2'], t2=b['t2'],
            shifts=b['shifts'], maxpad=b['maxpad'], add=b['add']))
    return out, alphas


def init_params(key):
    ks = jax.random.split(key, 20)
    params = {}
    smi_embed = jax.random.normal(
        ks[0], (CHAR_SMI_SET_LEN, 128), jnp.float32) * 0.1
    w_se, b_se = _linear_w(ks[1], PT_FEATURE_SIZE, 128)   # shared seq_embed

    # conv_seq: 4 DilatedParllelResidualBlockA blocks
    seq_blocks = []
    ic = 128
    for i, oc in enumerate([32, 64, 64, 128]):
        seq_blocks.append(init_block_a(ks[2 + i], ic, oc))
        ic = oc
    # fold the seq_embed Linear into block 1's 1x1 conv (exact)
    b0 = seq_blocks[0]
    b0['b_c1'] = b0['b_c1'] + (b_se @ b0['w_c1']).reshape(1, -1)
    b0['w_c1'] = w_se @ b0['w_c1']                        # (33, n)

    # conv_pkt: 3 x [Conv1d(k=3, valid) + BN + PReLU]; BN folded into conv,
    # seq_embed folded into layer 1; taps kept per-shift as (3, Cin, Cout).
    pkt = {}
    alphas = []
    ic = 128
    for i, oc in enumerate([32, 64, 128]):
        kk = jax.random.split(ks[6 + i], 4)
        w = _conv_w(kk[0], ic, oc)                        # (3, ic, oc)
        b = jax.random.normal(kk[1], (oc,), jnp.float32) * 0.1
        s, t = _bn_fold(kk[2], oc)
        w = w * s[None, None, :]
        b = b * s + t
        if i == 0:
            b = b + jnp.einsum('c,kco->o', b_se, w)
            w = jnp.einsum('fc,kco->kfo', w_se, w)        # (3, 33, oc)
        pkt[f'w{i + 1}'] = w.astype(jnp.bfloat16)
        pkt[f'b{i + 1}'] = b.reshape(1, oc)
        alphas.append(_prelu(kk[3]))
        ic = oc
    pkt['alphas'] = jnp.stack(alphas)
    params['conv_pkt'] = pkt

    # conv_smi: 3 DilatedParllelResidualBlockB blocks; the embedding table is
    # folded into block 1's 1x1 conv (kernel builds the one-hot from ints).
    smi_blocks = []
    ic = 128
    for i, oc in enumerate([32, 64, 128]):
        smi_blocks.append(init_block_b(ks[9 + i], ic, oc))
        ic = oc
    s0 = smi_blocks[0]
    s0['w_c1'] = smi_embed @ s0['w_c1']                   # (64, n)

    params['conv_seq'], params['seq_alphas'] = _finalize_blocks(seq_blocks)
    params['conv_smi'], params['smi_alphas'] = _finalize_blocks(smi_blocks)

    # classifier: Linear(384,128)+PReLU, Linear(128,64)+PReLU, Linear(64,1)+PReLU
    w1, b1 = _linear_w(ks[12], 384, 128)
    w2, b2 = _linear_w(ks[14], 128, 64)
    w3, b3 = _linear_w(ks[16], 64, 1)
    params['cls'] = dict(
        w1=w1.astype(jnp.bfloat16), b1=b1.reshape(1, 128),
        w2=w2.astype(jnp.bfloat16), b2=b2.reshape(1, 64),
        w3=w3.reshape(1, 64), b3=b3.reshape(1, 1),
        alphas=jnp.stack([_prelu(ks[13]), _prelu(ks[15]), _prelu(ks[17])]))
    return params


# ----------------------------------------------------------------------------
# Forward pass (4 pallas_call launches total)
# ----------------------------------------------------------------------------
def forward(params, af, rf, pf, bav):
    B = rf.shape[0]

    # protein sequence branch (seq_embed folded into block 1)
    seq_conv = pallas_branch(rf, params['conv_seq'],
                             params['seq_alphas']).reshape(B, -1)

    # pocket branch (seq_embed folded into layer 1)
    pkt_conv = pallas_pkt(pf, params['conv_pkt']).reshape(B, -1)

    # SMILES branch: int indices go straight into the kernel (one-hot built
    # in-register; embedding folded into block 1's 1x1 conv)
    af3 = af.astype(jnp.int32)[:, :, None]                 # (B, Lsmi, 1)
    smi_conv = pallas_branch(af3, params['conv_smi'], params['smi_alphas'],
                             onehot_vocab=CHAR_SMI_SET_LEN).reshape(B, -1)

    # cat_dropout / classifier dropouts are identity (eval mode)
    bap = pallas_classifier(seq_conv, pkt_conv, smi_conv, params['cls'])
    return bap.reshape(-1), bav.reshape(-1)


# ----------------------------------------------------------------------------
if __name__ == "__main__":
    key = jax.random.PRNGKey(0)
    k_par, k_af, k_rf, k_pf, k_bv = jax.random.split(key, 5)

    params = init_params(k_par)

    B = 2
    seq_len = 16   # protein sequence length
    pkt_len = 16   # pocket length (valid convs: 16 -> 14 -> 12 -> 10)
    smi_len = 12   # SMILES length

    af = jax.random.randint(k_af, (B, smi_len), 0, CHAR_SMI_SET_LEN, jnp.int32)
    rf = jax.random.normal(k_rf, (B, seq_len, PT_FEATURE_SIZE), jnp.float32)
    pf = jax.random.normal(k_pf, (B, pkt_len, PT_FEATURE_SIZE), jnp.float32)
    bav = jax.random.normal(k_bv, (B,), jnp.float32)

    fwd = jax.jit(lambda af, rf, pf, bav: forward(params, af, rf, pf, bav))
    ba_pred, ba_true = fwd(af, rf, pf, bav)
    jax.block_until_ready((ba_pred, ba_true))

    assert ba_pred.shape == (B,) and ba_true.shape == (B,)
    assert bool(jnp.all(jnp.isfinite(ba_pred)))
    print("KERNEL_OK")
</pallas_src>

<mosaic_0001>
module attributes {stable_mosaic.version = 11 : i64} {
  func.func @_branch_kernel(%arg0: i32, %arg1: memref<1x12x1xi32, #tpu.memory_space<vmem>>, %arg2: memref<64x8xbf16, #tpu.memory_space<vmem>>, %arg3: memref<1x8xf32, #tpu.memory_space<vmem>>, %arg4: memref<9x8x32xbf16, #tpu.memory_space<vmem>>, %arg5: memref<1x32xf32, #tpu.memory_space<vmem>>, %arg6: memref<1x32xf32, #tpu.memory_space<vmem>>, %arg7: memref<32x16xbf16, #tpu.memory_space<vmem>>, %arg8: memref<1x16xf32, #tpu.memory_space<vmem>>, %arg9: memref<9x16x64xbf16, #tpu.memory_space<vmem>>, %arg10: memref<1x64xf32, #tpu.memory_space<vmem>>, %arg11: memref<1x64xf32, #tpu.memory_space<vmem>>, %arg12: memref<64x32xbf16, #tpu.memory_space<vmem>>, %arg13: memref<1x32xf32, #tpu.memory_space<vmem>>, %arg14: memref<9x32x128xbf16, #tpu.memory_space<vmem>>, %arg15: memref<1x128xf32, #tpu.memory_space<vmem>>, %arg16: memref<1x128xf32, #tpu.memory_space<vmem>>, %arg17: memref<3x2xf32, #tpu.memory_space<smem>>, %arg18: memref<1x1x128xf32, #tpu.memory_space<vmem>>, %arg19: memref<28x8xf32, #tpu.memory_space<vmem>>, %arg20: memref<28x16xf32, #tpu.memory_space<vmem>>, %arg21: memref<28x32xf32, #tpu.memory_space<vmem>>) attributes {dimension_semantics = [#tpu.dimension_semantics<parallel>], iteration_bounds = array<i64: 2>, scalar_prefetch = 0 : i64, scratch_operands = 3 : i64, tpu.core_type = #tpu.core_type<tc>, window_params = [{transform_indices = @transform_0, window_bounds = array<i64: 1, 12, 1>}, {pipeline_mode = #tpu.pipeline_mode<synchronous>, transform_indices = @transform_1, window_bounds = array<i64: 64, 8>}, {pipeline_mode = #tpu.pipeline_mode<synchronous>, transform_indices = @transform_2, window_bounds = array<i64: 1, 8>}, {pipeline_mode = #tpu.pipeline_mode<synchronous>, transform_indices = @transform_3, window_bounds = array<i64: 9, 8, 32>}, {pipeline_mode = #tpu.pipeline_mode<synchronous>, transform_indices = @transform_4, window_bounds = array<i64: 1, 32>}, {pipeline_mode = #tpu.pipeline_mode<synchronous>, transform_indices = @transform_5, window_bounds = array<i64: 1, 32>}, {pipeline_mode = #tpu.pipeline_mode<synchronous>, transform_indices = @transform_6, window_bounds = array<i64: 32, 16>}, {pipeline_mode = #tpu.pipeline_mode<synchronous>, transform_indices = @transform_7, window_bounds = array<i64: 1, 16>}, {pipeline_mode = #tpu.pipeline_mode<synchronous>, transform_indices = @transform_8, window_bounds = array<i64: 9, 16, 64>}, {pipeline_mode = #tpu.pipeline_mode<synchronous>, transform_indices = @transform_9, window_bounds = array<i64: 1, 64>}, {pipeline_mode = #tpu.pipeline_mode<synchronous>, transform_indices = @transform_10, window_bounds = array<i64: 1, 64>}, {pipeline_mode = #tpu.pipeline_mode<synchronous>, transform_indices = @transform_11, window_bounds = array<i64: 64, 32>}, {pipeline_mode = #tpu.pipeline_mode<synchronous>, transform_indices = @transform_12, window_bounds = array<i64: 1, 32>}, {pipeline_mode = #tpu.pipeline_mode<synchronous>, transform_indices = @transform_13, window_bounds = array<i64: 9, 32, 128>}, {pipeline_mode = #tpu.pipeline_mode<synchronous>, transform_indices = @transform_14, window_bounds = array<i64: 1, 128>}, {pipeline_mode = #tpu.pipeline_mode<synchronous>, transform_indices = @transform_15, window_bounds = array<i64: 1, 128>}, {transform_indices = @transform_16, window_bounds = array<i64: 3, 2>}, {transform_indices = @transform_17, window_bounds = array<i64: 1, 1, 128>}]} {
    %c0 = arith.constant 0 : index
    %c0_0 = arith.constant 0 : index
    %c0_1 = arith.constant 0 : index
    %0 = vector.load %arg1[%c0, %c0_0, %c0_1] : memref<1x12x1xi32, #tpu.memory_space<vmem>>, vector<1x12x1xi32>
    %1 = vector.shape_cast %0 : vector<1x12x1xi32> to vector<12x1xi32>
    %2 = tpu.iota {dimensions = array<i32: 1>} : vector<12x64xi32>
    %3 = vector.broadcast %1 : vector<12x1xi32> to vector<12x64xi32>
    %4 = arith.cmpi eq, %3, %2 : vector<12x64xi32>
    %cst = arith.constant 1.000000e+00 : f32
    %cst_2 = arith.constant 0.000000e+00 : f32
    %5 = vector.broadcast %cst : f32 to vector<12x64xf32>
    %6 = vector.broadcast %cst_2 : f32 to vector<12x64xf32>
    %7 = arith.select %4, %5, %6 : vector<12x64xi1>, vector<12x64xf32>
    %c0_3 = arith.constant 0 : index
    %c0_4 = arith.constant 0 : index
    %8 = memref.load %arg17[%c0_3, %c0_4] : memref<3x2xf32, #tpu.memory_space<smem>>
    %c0_5 = arith.constant 0 : index
    %c1 = arith.constant 1 : index
    %9 = memref.load %arg17[%c0_5, %c1] : memref<3x2xf32, #tpu.memory_space<smem>>
    %10 = arith.truncf %7 : vector<12x64xf32> to vector<12x64xbf16>
    %c0_6 = arith.constant 0 : index
    %c0_7 = arith.constant 0 : index
    %11 = vector.load %arg2[%c0_6, %c0_7] : memref<64x8xbf16, #tpu.memory_space<vmem>>, vector<64x8xbf16>
    %cst_8 = arith.constant dense<0.000000e+00> : vector<12x8xf32>
    %12 = tpu.matmul %10, %11, %cst_8 {dimension_numbers = #tpu.dot_dimension_numbers<[1], [0], [0], [1], [0, 0, 1, 1], [], []>} : vector<12x64xbf16>, vector<64x8xbf16>, vector<12x8xf32> -> vector<12x8xf32>
    %c0_9 = arith.constant 0 : index
    %c0_10 = arith.constant 0 : index
    %13 = vector.load %arg3[%c0_9, %c0_10] : memref<1x8xf32, #tpu.memory_space<vmem>>, vector<1x8xf32>
    %14 = vector.broadcast %13 : vector<1x8xf32> to vector<12x8xf32>
    %15 = arith.addf %12, %14 : vector<12x8xf32>
    %cst_11 = arith.constant 0.000000e+00 : f32
    %16 = vector.broadcast %cst_11 : f32 to vector<12x8xf32>
    %17 = arith.cmpf ogt, %15, %16 : vector<12x8xf32>
    %18 = vector.broadcast %8 : f32 to vector<12x8xf32>
    %19 = arith.mulf %18, %15 : vector<12x8xf32>
    %20 = arith.select %17, %15, %19 : vector<12x8xi1>, vector<12x8xf32>
    %cst_12 = arith.constant 0.000000e+00 : f32
    %21 = vector.broadcast %cst_12 : f32 to vector<8x8xf32>
    %c0_13 = arith.constant 0 : index
    %c0_14 = arith.constant 0 : index
    %22 = vector.load %arg19[%c0_13, %c0_14] : memref<28x8xf32, #tpu.memory_space<vmem>>, vector<8x8xf32>
    tpu.vector_store %arg19[%c0_13, %c0_14], %21 {strides = array<i32>} : memref<28x8xf32, #tpu.memory_space<vmem>>, vector<8x8xf32>,
    %cst_15 = arith.constant 0.000000e+00 : f32
    %23 = vector.broadcast %cst_15 : f32 to vector<8x8xf32>
    %c20 = arith.constant 20 : index
    %c0_16 = arith.constant 0 : index
    %24 = vector.load %arg19[%c20, %c0_16] : memref<28x8xf32, #tpu.memory_space<vmem>>, vector<8x8xf32>
    tpu.vector_store %arg19[%c20, %c0_16], %23 {strides = array<i32>} : memref<28x8xf32, #tpu.memory_space<vmem>>, vector<8x8xf32>,
    %c8 = arith.constant 8 : index
    %c0_17 = arith.constant 0 : index
    %25 = vector.load %arg19[%c8, %c0_17] : memref<28x8xf32, #tpu.memory_space<vmem>>, vector<12x8xf32>
    tpu.vector_store %arg19[%c8, %c0_17], %20 {strides = array<i32>} : memref<28x8xf32, #tpu.memory_space<vmem>>, vector<12x8xf32>,
    %cst_18 = arith.constant 0.000000e+00 : f32
    %26 = vector.broadcast %cst_18 : f32 to vector<12x32xf32>
    %c0_19 = arith.constant 0 : index
    %c0_20 = arith.constant 0 : index
    %27 = vector.load %arg19[%c0_19, %c0_20] : memref<28x8xf32, #tpu.memory_space<vmem>>, vector<12x8xf32>
    %28 = arith.truncf %27 : vector<12x8xf32> to vector<12x8xbf16>
    %c0_21 = arith.constant 0 : index
    %c0_22 = arith.constant 0 : index
    %c0_23 = arith.constant 0 : index
    %29 = vector.load %arg4[%c0_21, %c0_22, %c0_23] : memref<9x8x32xbf16, #tpu.memory_space<vmem>>, vector<1x8x32xbf16>
    %30 = vector.shape_cast %29 : vector<1x8x32xbf16> to vector<8x32xbf16>
    %cst_24 = arith.constant dense<0.000000e+00> : vector<12x32xf32>
    %31 = tpu.matmul %28, %30, %cst_24 {dimension_numbers = #tpu.dot_dimension_numbers<[1], [0], [0], [1], [0, 0, 1, 1], [], []>} : vector<12x8xbf16>, vector<8x32xbf16>, vector<12x32xf32> -> vector<12x32xf32>
    %32 = arith.addf %26, %31 : vector<12x32xf32>
    %c4 = arith.constant 4 : index
    %c0_25 = arith.constant 0 : index
    %33 = vector.load %arg19[%c4, %c0_25] : memref<28x8xf32, #tpu.memory_space<vmem>>, vector<12x8xf32>
    %34 = arith.truncf %33 : vector<12x8xf32> to vector<12x8xbf16>
    %c1_26 = arith.constant 1 : index
    %c0_27 = arith.constant 0 : index
    %c0_28 = arith.constant 0 : index
    %35 = vector.load %arg4[%c1_26, %c0_27, %c0_28] : memref<9x8x32xbf16, #tpu.memory_space<vmem>>, vector<1x8x32xbf16>
    %36 = vector.shape_cast %35 : vector<1x8x32xbf16> to vector<8x32xbf16>
    %cst_29 = arith.constant dense<0.000000e+00> : vector<12x32xf32>
    %37 = tpu.matmul %34, %36, %cst_29 {dimension_numbers = #tpu.dot_dimension_numbers<[1], [0], [0], [1], [0, 0, 1, 1], [], []>} : vector<12x8xbf16>, vector<8x32xbf16>, vector<12x32xf32> -> vector<12x32xf32>
    %38 = arith.addf %32, %37 : vector<12x32xf32>
    %c6 = arith.constant 6 : index
    %c0_30 = arith.constant 0 : index
    %39 = vector.load %arg19[%c6, %c0_30] : memref<28x8xf32, #tpu.memory_space<vmem>>, vector<12x8xf32>
    %40 = arith.truncf %39 : vector<12x8xf32> to vector<12x8xbf16>
    %c2 = arith.constant 2 : index
    %c0_31 = arith.constant 0 : index
    %c0_32 = arith.constant 0 : index
    %41 = vector.load %arg4[%c2, %c0_31, %c0_32] : memref<9x8x32xbf16, #tpu.memory_space<vmem>>, vector<1x8x32xbf16>
    %42 = vector.shape_cast %41 : vector<1x8x32xbf16> to vector<8x32xbf16>
    %cst_33 = arith.constant dense<0.000000e+00> : vector<12x32xf32>
    %43 = tpu.matmul %40, %42, %cst_33 {dimension_numbers = #tpu.dot_dimension_numbers<[1], [0], [0], [1], [0, 0, 1, 1], [], []>} : vector<12x8xbf16>, vector<8x32xbf16>, vector<12x32xf32> -> vector<12x32xf32>
    %44 = arith.addf %38, %43 : vector<12x32xf32>
    %c7 = arith.constant 7 : index
    %c0_34 = arith.constant 0 : index
    %45 = vector.load %arg19[%c7, %c0_34] : memref<28x8xf32, #tpu.memory_space<vmem>>, vector<12x8xf32>
    %46 = arith.truncf %45 : vector<12x8xf32> to vector<12x8xbf16>
    %c3 = arith.constant 3 : index
    %c0_35 = arith.constant 0 : index
    %c0_36 = arith.constant 0 : index
    %47 = vector.load %arg4[%c3, %c0_35, %c0_36] : memref<9x8x32xbf16, #tpu.memory_space<vmem>>, vector<1x8x32xbf16>
    %48 = vector.shape_cast %47 : vector<1x8x32xbf16> to vector<8x32xbf16>
    %cst_37 = arith.constant dense<0.000000e+00> : vector<12x32xf32>
    %49 = tpu.matmul %46, %48, %cst_37 {dimension_numbers = #tpu.dot_dimension_numbers<[1], [0], [0], [1], [0, 0, 1, 1], [], []>} : vector<12x8xbf16>, vector<8x32xbf16>, vector<12x32xf32> -> vector<12x32xf32>
    %50 = arith.addf %44, %49 : vector<12x32xf32>
    %c8_38 = arith.constant 8 : index
    %c0_39 = arith.constant 0 : index
    %51 = vector.load %arg19[%c8_38, %c0_39] : memref<28x8xf32, #tpu.memory_space<vmem>>, vector<12x8xf32>
    %52 = arith.truncf %51 : vector<12x8xf32> to vector<12x8xbf16>
    %c4_40 = arith.constant 4 : index
    %c0_41 = arith.constant 0 : index
    %c0_42 = arith.constant 0 : index
    %53 = vector.load %arg4[%c4_40, %c0_41, %c0_42] : memref<9x8x32xbf16, #tpu.memory_space<vmem>>, vector<1x8x32xbf16>
    %54 = vector.shape_cast %53 : vector<1x8x32xbf16> to vector<8x32xbf16>
    %cst_43 = arith.constant dense<0.000000e+00> : vector<12x32xf32>
    %55 = tpu.matmul %52, %54, %cst_43 {dimension_numbers = #tpu.dot_dimension_numbers<[1], [0], [0], [1], [0, 0, 1, 1], [], []>} : vector<12x8xbf16>, vector<8x32xbf16>, vector<12x32xf32> -> vector<12x32xf32>
    %56 = arith.addf %50, %55 : vector<12x32xf32>
    %c9 = arith.constant 9 : index
    %c0_44 = arith.constant 0 : index
    %57 = vector.load %arg19[%c9, %c0_44] : memref<28x8xf32, #tpu.memory_space<vmem>>, vector<12x8xf32>
    %58 = arith.truncf %57 : vector<12x8xf32> to vector<12x8xbf16>
    %c5 = arith.constant 5 : index
    %c0_45 = arith.constant 0 : index
    %c0_46 = arith.constant 0 : index
    %59 = vector.load %arg4[%c5, %c0_45, %c0_46] : memref<9x8x32xbf16, #tpu.memory_space<vmem>>, vector<1x8x32xbf16>
    %60 = vector.shape_cast %59 : vector<1x8x32xbf16> to vector<8x32xbf16>
    %cst_47 = arith.constant dense<0.000000e+00> : vector<12x32xf32>
    %61 = tpu.matmul %58, %60, %cst_47 {dimension_numbers = #tpu.dot_dimension_numbers<[1], [0], [0], [1], [0, 0, 1, 1], [], []>} : vector<12x8xbf16>, vector<8x32xbf16>, vector<12x32xf32> -> vector<12x32xf32>
    %62 = arith.addf %56, %61 : vector<12x32xf32>
    %c10 = arith.constant 10 : index
    %c0_48 = arith.constant 0 : index
    %63 = vector.load %arg19[%c10, %c0_48] : memref<28x8xf32, #tpu.memory_space<vmem>>, vector<12x8xf32>
    %64 = arith.truncf %63 : vector<12x8xf32> to vector<12x8xbf16>
    %c6_49 = arith.constant 6 : index
    %c0_50 = arith.constant 0 : index
    %c0_51 = arith.constant 0 : index
    %65 = vector.load %arg4[%c6_49, %c0_50, %c0_51] : memref<9x8x32xbf16, #tpu.memory_space<vmem>>, vector<1x8x32xbf16>
    %66 = vector.shape_cast %65 : vector<1x8x32xbf16> to vector<8x32xbf16>
    %cst_52 = arith.constant dense<0.000000e+00> : vector<12x32xf32>
    %67 = tpu.matmul %64, %66, %cst_52 {dimension_numbers = #tpu.dot_dimension_numbers<[1], [0], [0], [1], [0, 0, 1, 1], [], []>} : vector<12x8xbf16>, vector<8x32xbf16>, vector<12x32xf32> -> vector<12x32xf32>
    %68 = arith.addf %62, %67 : vector<12x32xf32>
    %c12 = arith.constant 12 : index
    %c0_53 = arith.constant 0 : index
    %69 = vector.load %arg19[%c12, %c0_53] : memref<28x8xf32, #tpu.memory_space<vmem>>, vector<12x8xf32>
    %70 = arith.truncf %69 : vector<12x8xf32> to vector<12x8xbf16>
    %c7_54 = arith.constant 7 : index
    %c0_55 = arith.constant 0 : index
    %c0_56 = arith.constant 0 : index
    %71 = vector.load %arg4[%c7_54, %c0_55, %c0_56] : memref<9x8x32xbf16, #tpu.memory_space<vmem>>, vector<1x8x32xbf16>
    %72 = vector.shape_cast %71 : vector<1x8x32xbf16> to vector<8x32xbf16>
    %cst_57 = arith.constant dense<0.000000e+00> : vector<12x32xf32>
    %73 = tpu.matmul %70, %72, %cst_57 {dimension_numbers = #tpu.dot_dimension_numbers<[1], [0], [0], [1], [0, 0, 1, 1], [], []>} : vector<12x8xbf16>, vector<8x32xbf16>, vector<12x32xf32> -> vector<12x32xf32>
    %74 = arith.addf %68, %73 : vector<12x32xf32>
    %c16 = arith.constant 16 : index
    %c0_58 = arith.constant 0 : index
    %75 = vector.load %arg19[%c16, %c0_58] : memref<28x8xf32, #tpu.memory_space<vmem>>, vector<12x8xf32>
    %76 = arith.truncf %75 : vector<12x8xf32> to vector<12x8xbf16>
    %c8_59 = arith.constant 8 : index
    %c0_60 = arith.constant 0 : index
    %c0_61 = arith.constant 0 : index
    %77 = vector.load %arg4[%c8_59, %c0_60, %c0_61] : memref<9x8x32xbf16, #tpu.memory_space<vmem>>, vector<1x8x32xbf16>
    %78 = vector.shape_cast %77 : vector<1x8x32xbf16> to vector<8x32xbf16>
    %cst_62 = arith.constant dense<0.000000e+00> : vector<12x32xf32>
    %79 = tpu.matmul %76, %78, %cst_62 {dimension_numbers = #tpu.dot_dimension_numbers<[1], [0], [0], [1], [0, 0, 1, 1], [], []>} : vector<12x8xbf16>, vector<8x32xbf16>, vector<12x32xf32> -> vector<12x32xf32>
    %80 = arith.addf %74, %79 : vector<12x32xf32>
    %c0_63 = arith.constant 0 : index
    %c0_64 = arith.constant 0 : index
    %81 = vector.load %arg5[%c0_63, %c0_64] : memref<1x32xf32, #tpu.memory_space<vmem>>, vector<1x32xf32>
    %82 = vector.broadcast %81 : vector<1x32xf32> to vector<12x32xf32>
    %83 = arith.mulf %80, %82 : vector<12x32xf32>
    %c0_65 = arith.constant 0 : index
    %c0_66 = arith.constant 0 : index
    %84 = vector.load %arg6[%c0_65, %c0_66] : memref<1x32xf32, #tpu.memory_space<vmem>>, vector<1x32xf32>
    %85 = vector.broadcast %84 : vector<1x32xf32> to vector<12x32xf32>
    %86 = arith.addf %83, %85 : vector<12x32xf32>
    %cst_67 = arith.constant 0.000000e+00 : f32
    %87 = vector.broadcast %cst_67 : f32 to vector<12x32xf32>
    %88 = arith.cmpf ogt, %86, %87 : vector<12x32xf32>
    %89 = vector.broadcast %9 : f32 to vector<12x32xf32>
    %90 = arith.mulf %89, %86 : vector<12x32xf32>
    %91 = arith.select %88, %86, %90 : vector<12x32xi1>, vector<12x32xf32>
    %c1_68 = arith.constant 1 : index
    %c0_69 = arith.constant 0 : index
    %92 = memref.load %arg17[%c1_68, %c0_69] : memref<3x2xf32, #tpu.memory_space<smem>>
    %c1_70 = arith.constant 1 : index
    %c1_71 = arith.constant 1 : index
    %93 = memref.load %arg17[%c1_70, %c1_71] : memref<3x2xf32, #tpu.memory_space<smem>>
    %94 = arith.truncf %91 : vector<12x32xf32> to vector<12x32xbf16>
    %c0_72 = arith.constant 0 : index
    %c0_73 = arith.constant 0 : index
    %95 = vector.load %arg7[%c0_72, %c0_73] : memref<32x16xbf16, #tpu.memory_space<vmem>>, vector<32x16xbf16>
    %cst_74 = arith.constant dense<0.000000e+00> : vector<12x16xf32>
    %96 = tpu.matmul %94, %95, %cst_74 {dimension_numbers = #tpu.dot_dimension_numbers<[1], [0], [0], [1], [0, 0, 1, 1], [], []>} : vector<12x32xbf16>, vector<32x16xbf16>, vector<12x16xf32> -> vector<12x16xf32>
    %c0_75 = arith.constant 0 : index
    %c0_76 = arith.constant 0 : index
    %97 = vector.load %arg8[%c0_75, %c0_76] : memref<1x16xf32, #tpu.memory_space<vmem>>, vector<1x16xf32>
    %98 = vector.broadcast %97 : vector<1x16xf32> to vector<12x16xf32>
    %99 = arith.addf %96, %98 : vector<12x16xf32>
    %cst_77 = arith.constant 0.000000e+00 : f32
    %100 = vector.broadcast %cst_77 : f32 to vector<12x16xf32>
    %101 = arith.cmpf ogt, %99, %100 : vector<12x16xf32>
    %102 = vector.broadcast %92 : f32 to vector<12x16xf32>
    %103 = arith.mulf %102, %99 : vector<12x16xf32>
    %104 = arith.select %101, %99, %103 : vector<12x16xi1>, vector<12x16xf32>
    %cst_78 = arith.constant 0.000000e+00 : f32
    %105 = vector.broadcast %cst_78 : f32 to vector<8x16xf32>
    %c0_79 = arith.constant 0 : index
    %c0_80 = arith.constant 0 : index
    %106 = vector.load %arg20[%c0_79, %c0_80] : memref<28x16xf32, #tpu.memory_space<vmem>>, vector<8x16xf32>
    tpu.vector_store %arg20[%c0_79, %c0_80], %105 {strides = array<i32>} : memref<28x16xf32, #tpu.memory_space<vmem>>, vector<8x16xf32>,
    %cst_81 = arith.constant 0.000000e+00 : f32
    %107 = vector.broadcast %cst_81 : f32 to vector<8x16xf32>
    %c20_82 = arith.constant 20 : index
    %c0_83 = arith.constant 0 : index
    %108 = vector.load %arg20[%c20_82, %c0_83] : memref<28x16xf32, #tpu.memory_space<vmem>>, vector<8x16xf32>
    tpu.vector_store %arg20[%c20_82, %c0_83], %107 {strides = array<i32>} : memref<28x16xf32, #tpu.memory_space<vmem>>, vector<8x16xf32>,
    %c8_84 = arith.constant 8 : index
    %c0_85 = arith.constant 0 : index
    %109 = vector.load %arg20[%c8_84, %c0_85] : memref<28x16xf32, #tpu.memory_space<vmem>>, vector<12x16xf32>
    tpu.vector_store %arg20[%c8_84, %c0_85], %104 {strides = array<i32>} : memref<28x16xf32, #tpu.memory_space<vmem>>, vector<12x16xf32>,
    %cst_86 = arith.constant 0.000000e+00 : f32
    %110 = vector.broadcast %cst_86 : f32 to vector<12x64xf32>
    %c0_87 = arith.constant 0 : index
    %c0_88 = arith.constant 0 : index
    %111 = vector.load %arg20[%c0_87, %c0_88] : memref<28x16xf32, #tpu.memory_space<vmem>>, vector<12x16xf32>
    %112 = arith.truncf %111 : vector<12x16xf32> to vector<12x16xbf16>
    %c0_89 = arith.constant 0 : index
    %c0_90 = arith.constant 0 : index
    %c0_91 = arith.constant 0 : index
    %113 = vector.load %arg9[%c0_89, %c0_90, %c0_91] : memref<9x16x64xbf16, #tpu.memory_space<vmem>>, vector<1x16x64xbf16>
    %114 = vector.shape_cast %113 : vector<1x16x64xbf16> to vector<16x64xbf16>
    %cst_92 = arith.constant dense<0.000000e+00> : vector<12x64xf32>
    %115 = tpu.matmul %112, %114, %cst_92 {dimension_numbers = #tpu.dot_dimension_numbers<[1], [0], [0], [1], [0, 0, 1, 1], [], []>} : vector<12x16xbf16>, vector<16x64xbf16>, vector<12x64xf32> -> vector<12x64xf32>
    %116 = arith.addf %110, %115 : vector<12x64xf32>
    %c4_93 = arith.constant 4 : index
    %c0_94 = arith.constant 0 : index
    %117 = vector.load %arg20[%c4_93, %c0_94] : memref<28x16xf32, #tpu.memory_space<vmem>>, vector<12x16xf32>
    %118 = arith.truncf %117 : vector<12x16xf32> to vector<12x16xbf16>
    %c1_95 = arith.constant 1 : index
    %c0_96 = arith.constant 0 : index
    %c0_97 = arith.constant 0 : index
    %119 = vector.load %arg9[%c1_95, %c0_96, %c0_97] : memref<9x16x64xbf16, #tpu.memory_space<vmem>>, vector<1x16x64xbf16>
    %120 = vector.shape_cast %119 : vector<1x16x64xbf16> to vector<16x64xbf16>
    %cst_98 = arith.constant dense<0.000000e+00> : vector<12x64xf32>
    %121 = tpu.matmul %118, %120, %cst_98 {dimension_numbers = #tpu.dot_dimension_numbers<[1], [0], [0], [1], [0, 0, 1, 1], [], []>} : vector<12x16xbf16>, vector<16x64xbf16>, vector<12x64xf32> -> vector<12x64xf32>
    %122 = arith.addf %116, %121 : vector<12x64xf32>
    %c6_99 = arith.constant 6 : index
    %c0_100 = arith.constant 0 : index
    %123 = vector.load %arg20[%c6_99, %c0_100] : memref<28x16xf32, #tpu.memory_space<vmem>>, vector<12x16xf32>
    %124 = arith.truncf %123 : vector<12x16xf32> to vector<12x16xbf16>
    %c2_101 = arith.constant 2 : index
    %c0_102 = arith.constant 0 : index
    %c0_103 = arith.constant 0 : index
    %125 = vector.load %arg9[%c2_101, %c0_102, %c0_103] : memref<9x16x64xbf16, #tpu.memory_space<vmem>>, vector<1x16x64xbf16>
    %126 = vector.shape_cast %125 : vector<1x16x64xbf16> to vector<16x64xbf16>
    %cst_104 = arith.constant dense<0.000000e+00> : vector<12x64xf32>
    %127 = tpu.matmul %124, %126, %cst_104 {dimension_numbers = #tpu.dot_dimension_numbers<[1], [0], [0], [1], [0, 0, 1, 1], [], []>} : vector<12x16xbf16>, vector<16x64xbf16>, vector<12x64xf32> -> vector<12x64xf32>
    %128 = arith.addf %122, %127 : vector<12x64xf32>
    %c7_105 = arith.constant 7 : index
    %c0_106 = arith.constant 0 : index
    %129 = vector.load %arg20[%c7_105, %c0_106] : memref<28x16xf32, #tpu.memory_space<vmem>>, vector<12x16xf32>
    %130 = arith.truncf %129 : vector<12x16xf32> to vector<12x16xbf16>
    %c3_107 = arith.constant 3 : index
    %c0_108 = arith.constant 0 : index
    %c0_109 = arith.constant 0 : index
    %131 = vector.load %arg9[%c3_107, %c0_108, %c0_109] : memref<9x16x64xbf16, #tpu.memory_space<vmem>>, vector<1x16x64xbf16>
    %132 = vector.shape_cast %131 : vector<1x16x64xbf16> to vector<16x64xbf16>
    %cst_110 = arith.constant dense<0.000000e+00> : vector<12x64xf32>
    %133 = tpu.matmul %130, %132, %cst_110 {dimension_numbers = #tpu.dot_dimension_numbers<[1], [0], [0], [1], [0, 0, 1, 1], [], []>} : vector<12x16xbf16>, vector<16x64xbf16>, vector<12x64xf32> -> vector<12x64xf32>
    %134 = arith.addf %128, %133 : vector<12x64xf32>
    %c8_111 = arith.constant 8 : index
    %c0_112 = arith.constant 0 : index
    %135 = vector.load %arg20[%c8_111, %c0_112] : memref<28x16xf32, #tpu.memory_space<vmem>>, vector<12x16xf32>
    %136 = arith.truncf %135 : vector<12x16xf32> to vector<12x16xbf16>
    %c4_113 = arith.constant 4 : index
    %c0_114 = arith.constant 0 : index
    %c0_115 = arith.constant 0 : index
    %137 = vector.load %arg9[%c4_113, %c0_114, %c0_115] : memref<9x16x64xbf16, #tpu.memory_space<vmem>>, vector<1x16x64xbf16>
    %138 = vector.shape_cast %137 : vector<1x16x64xbf16> to vector<16x64xbf16>
    %cst_116 = arith.constant dense<0.000000e+00> : vector<12x64xf32>
    %139 = tpu.matmul %136, %138, %cst_116 {dimension_numbers = #tpu.dot_dimension_numbers<[1], [0], [0], [1], [0, 0, 1, 1], [], []>} : vector<12x16xbf16>, vector<16x64xbf16>, vector<12x64xf32> -> vector<12x64xf32>
    %140 = arith.addf %134, %139 : vector<12x64xf32>
    %c9_117 = arith.constant 9 : index
    %c0_118 = arith.constant 0 : index
    %141 = vector.load %arg20[%c9_117, %c0_118] : memref<28x16xf32, #tpu.memory_space<vmem>>, vector<12x16xf32>
    %142 = arith.truncf %141 : vector<12x16xf32> to vector<12x16xbf16>
    %c5_119 = arith.constant 5 : index
    %c0_120 = arith.constant 0 : index
    %c0_121 = arith.constant 0 : index
    %143 = vector.load %arg9[%c5_119, %c0_120, %c0_121] : memref<9x16x64xbf16, #tpu.memory_space<vmem>>, vector<1x16x64xbf16>
    %144 = vector.shape_cast %143 : vector<1x16x64xbf16> to vector<16x64xbf16>
    %cst_122 = arith.constant dense<0.000000e+00> : vector<12x64xf32>
    %145 = tpu.matmul %142, %144, %cst_122 {dimension_numbers = #tpu.dot_dimension_numbers<[1], [0], [0], [1], [0, 0, 1, 1], [], []>} : vector<12x16xbf16>, vector<16x64xbf16>, vector<12x64xf32> -> vector<12x64xf32>
    %146 = arith.addf %140, %145 : vector<12x64xf32>
    %c10_123 = arith.constant 10 : index
    %c0_124 = arith.constant 0 : index
    %147 = vector.load %arg20[%c10_123, %c0_124] : memref<28x16xf32, #tpu.memory_space<vmem>>, vector<12x16xf32>
    %148 = arith.truncf %147 : vector<12x16xf32> to vector<12x16xbf16>
    %c6_125 = arith.constant 6 : index
    %c0_126 = arith.constant 0 : index
    %c0_127 = arith.constant 0 : index
    %149 = vector.load %arg9[%c6_125, %c0_126, %c0_127] : memref<9x16x64xbf16, #tpu.memory_space<vmem>>, vector<1x16x64xbf16>
    %150 = vector.shape_cast %149 : vector<1x16x64xbf16> to vector<16x64xbf16>
    %cst_128 = arith.constant dense<0.000000e+00> : vector<12x64xf32>
    %151 = tpu.matmul %148, %150, %cst_128 {dimension_numbers = #tpu.dot_dimension_numbers<[1], [0], [0], [1], [0, 0, 1, 1], [], []>} : vector<12x16xbf16>, vector<16x64xbf16>, vector<12x64xf32> -> vector<12x64xf32>
    %152 = arith.addf %146, %151 : vector<12x64xf32>
    %c12_129 = arith.constant 12 : index
    %c0_130 = arith.constant 0 : index
    %153 = vector.load %arg20[%c12_129, %c0_130] : memref<28x16xf32, #tpu.memory_space<vmem>>, vector<12x16xf32>
    %154 = arith.truncf %153 : vector<12x16xf32> to vector<12x16xbf16>
    %c7_131 = arith.constant 7 : index
    %c0_132 = arith.constant 0 : index
    %c0_133 = arith.constant 0 : index
    %155 = vector.load %arg9[%c7_131, %c0_132, %c0_133] : memref<9x16x64xbf16, #tpu.memory_space<vmem>>, vector<1x16x64xbf16>
    %156 = vector.shape_cast %155 : vector<1x16x64xbf16> to vector<16x64xbf16>
    %cst_134 = arith.constant dense<0.000000e+00> : vector<12x64xf32>
    %157 = tpu.matmul %154, %156, %cst_134 {dimension_numbers = #tpu.dot_dimension_numbers<[1], [0], [0], [1], [0, 0, 1, 1], [], []>} : vector<12x16xbf16>, vector<16x64xbf16>, vector<12x64xf32> -> vector<12x64xf32>
    %158 = arith.addf %152, %157 : vector<12x64xf32>
    %c16_135 = arith.constant 16 : index
    %c0_136 = arith.constant 0 : index
    %159 = vector.load %arg20[%c16_135, %c0_136] : memref<28x16xf32, #tpu.memory_space<vmem>>, vector<12x16xf32>
    %160 = arith.truncf %159 : vector<12x16xf32> to vector<12x16xbf16>
    %c8_137 = arith.constant 8 : index
    %c0_138 = arith.constant 0 : index
    %c0_139 = arith.constant 0 : index
    %161 = vector.load %arg9[%c8_137, %c0_138, %c0_139] : memref<9x16x64xbf16, #tpu.memory_space<vmem>>, vector<1x16x64xbf16>
    %162 = vector.shape_cast %161 : vector<1x16x64xbf16> to vector<16x64xbf16>
    %cst_140 = arith.constant dense<0.000000e+00> : vector<12x64xf32>
    %163 = tpu.matmul %160, %162, %cst_140 {dimension_numbers = #tpu.dot_dimension_numbers<[1], [0], [0], [1], [0, 0, 1, 1], [], []>} : vector<12x16xbf16>, vector<16x64xbf16>, vector<12x64xf32> -> vector<12x64xf32>
    %164 = arith.addf %158, %163 : vector<12x64xf32>
    %c0_141 = arith.constant 0 : index
    %c0_142 = arith.constant 0 : index
    %165 = vector.load %arg10[%c0_141, %c0_142] : memref<1x64xf32, #tpu.memory_space<vmem>>, vector<1x64xf32>
    %166 = vector.broadcast %165 : vector<1x64xf32> to vector<12x64xf32>
    %167 = arith.mulf %164, %166 : vector<12x64xf32>
    %c0_143 = arith.constant 0 : index
    %c0_144 = arith.constant 0 : index
    %168 = vector.load %arg11[%c0_143, %c0_144] : memref<1x64xf32, #tpu.memory_space<vmem>>, vector<1x64xf32>
    %169 = vector.broadcast %168 : vector<1x64xf32> to vector<12x64xf32>
    %170 = arith.addf %167, %169 : vector<12x64xf32>
    %cst_145 = arith.constant 0.000000e+00 : f32
    %171 = vector.broadcast %cst_145 : f32 to vector<12x64xf32>
    %172 = arith.cmpf ogt, %170, %171 : vector<12x64xf32>
    %173 = vector.broadcast %93 : f32 to vector<12x64xf32>
    %174 = arith.mulf %173, %170 : vector<12x64xf32>
    %175 = arith.select %172, %170, %174 : vector<12x64xi1>, vector<12x64xf32>
    %c2_146 = arith.constant 2 : index
    %c0_147 = arith.constant 0 : index
    %176 = memref.load %arg17[%c2_146, %c0_147] : memref<3x2xf32, #tpu.memory_space<smem>>
    %c2_148 = arith.constant 2 : index
    %c1_149 = arith.constant 1 : index
    %177 = memref.load %arg17[%c2_148, %c1_149] : memref<3x2xf32, #tpu.memory_space<smem>>
    %178 = arith.truncf %175 : vector<12x64xf32> to vector<12x64xbf16>
    %c0_150 = arith.constant 0 : index
    %c0_151 = arith.constant 0 : index
    %179 = vector.load %arg12[%c0_150, %c0_151] : memref<64x32xbf16, #tpu.memory_space<vmem>>, vector<64x32xbf16>
    %cst_152 = arith.constant dense<0.000000e+00> : vector<12x32xf32>
    %180 = tpu.matmul %178, %179, %cst_152 {dimension_numbers = #tpu.dot_dimension_numbers<[1], [0], [0], [1], [0, 0, 1, 1], [], []>} : vector<12x64xbf16>, vector<64x32xbf16>, vector<12x32xf32> -> vector<12x32xf32>
    %c0_153 = arith.constant 0 : index
    %c0_154 = arith.constant 0 : index
    %181 = vector.load %arg13[%c0_153, %c0_154] : memref<1x32xf32, #tpu.memory_space<vmem>>, vector<1x32xf32>
    %182 = vector.broadcast %181 : vector<1x32xf32> to vector<12x32xf32>
    %183 = arith.addf %180, %182 : vector<12x32xf32>
    %cst_155 = arith.constant 0.000000e+00 : f32
    %184 = vector.broadcast %cst_155 : f32 to vector<12x32xf32>
    %185 = arith.cmpf ogt, %183, %184 : vector<12x32xf32>
    %186 = vector.broadcast %176 : f32 to vector<12x32xf32>
    %187 = arith.mulf %186, %183 : vector<12x32xf32>
    %188 = arith.select %185, %183, %187 : vector<12x32xi1>, vector<12x32xf32>
    %cst_156 = arith.constant 0.000000e+00 : f32
    %189 = vector.broadcast %cst_156 : f32 to vector<8x32xf32>
    %c0_157 = arith.constant 0 : index
    %c0_158 = arith.constant 0 : index
    %190 = vector.load %arg21[%c0_157, %c0_158] : memref<28x32xf32, #tpu.memory_space<vmem>>, vector<8x32xf32>
    tpu.vector_store %arg21[%c0_157, %c0_158], %189 {strides = array<i32>} : memref<28x32xf32, #tpu.memory_space<vmem>>, vector<8x32xf32>,
    %cst_159 = arith.constant 0.000000e+00 : f32
    %191 = vector.broadcast %cst_159 : f32 to vector<8x32xf32>
    %c20_160 = arith.constant 20 : index
    %c0_161 = arith.constant 0 : index
    %192 = vector.load %arg21[%c20_160, %c0_161] : memref<28x32xf32, #tpu.memory_space<vmem>>, vector<8x32xf32>
    tpu.vector_store %arg21[%c20_160, %c0_161], %191 {strides = array<i32>} : memref<28x32xf32, #tpu.memory_space<vmem>>, vector<8x32xf32>,
    %c8_162 = arith.constant 8 : index
    %c0_163 = arith.constant 0 : index
    %193 = vector.load %arg21[%c8_162, %c0_163] : memref<28x32xf32, #tpu.memory_space<vmem>>, vector<12x32xf32>
    tpu.vector_store %arg21[%c8_162, %c0_163], %188 {strides = array<i32>} : memref<28x32xf32, #tpu.memory_space<vmem>>, vector<12x32xf32>,
    %cst_164 = arith.constant 0.000000e+00 : f32
    %194 = vector.broadcast %cst_164 : f32 to vector<12x128xf32>
    %c0_165 = arith.constant 0 : index
    %c0_166 = arith.constant 0 : index
    %195 = vector.load %arg21[%c0_165, %c0_166] : memref<28x32xf32, #tpu.memory_space<vmem>>, vector<12x32xf32>
    %196 = arith.truncf %195 : vector<12x32xf32> to vector<12x32xbf16>
    %c0_167 = arith.constant 0 : index
    %c0_168 = arith.constant 0 : index
    %c0_169 = arith.constant 0 : index
    %197 = vector.load %arg14[%c0_167, %c0_168, %c0_169] : memref<9x32x128xbf16, #tpu.memory_space<vmem>>, vector<1x32x128xbf16>
    %198 = vector.shape_cast %197 : vector<1x32x128xbf16> to vector<32x128xbf16>
    %cst_170 = arith.constant dense<0.000000e+00> : vector<12x128xf32>
    %199 = tpu.matmul %196, %198, %cst_170 {dimension_numbers = #tpu.dot_dimension_numbers<[1], [0], [0], [1], [0, 0, 1, 1], [], []>} : vector<12x32xbf16>, vector<32x128xbf16>, vector<12x128xf32> -> vector<12x128xf32>
    %200 = arith.addf %194, %199 : vector<12x128xf32>
    %c4_171 = arith.constant 4 : index
    %c0_172 = arith.constant 0 : index
    %201 = vector.load %arg21[%c4_171, %c0_172] : memref<28x32xf32, #tpu.memory_space<vmem>>, vector<12x32xf32>
    %202 = arith.truncf %201 : vector<12x32xf32> to vector<12x32xbf16>
    %c1_173 = arith.constant 1 : index
    %c0_174 = arith.constant 0 : index
    %c0_175 = arith.constant 0 : index
    %203 = vector.load %arg14[%c1_173, %c0_174, %c0_175] : memref<9x32x128xbf16, #tpu.memory_space<vmem>>, vector<1x32x128xbf16>
    %204 = vector.shape_cast %203 : vector<1x32x128xbf16> to vector<32x128xbf16>
    %cst_176 = arith.constant dense<0.000000e+00> : vector<12x128xf32>
    %205 = tpu.matmul %202, %204, %cst_176 {dimension_numbers = #tpu.dot_dimension_numbers<[1], [0], [0], [1], [0, 0, 1, 1], [], []>} : vector<12x32xbf16>, vector<32x128xbf16>, vector<12x128xf32> -> vector<12x128xf32>
    %206 = arith.addf %200, %205 : vector<12x128xf32>
    %c6_177 = arith.constant 6 : index
    %c0_178 = arith.constant 0 : index
    %207 = vector.load %arg21[%c6_177, %c0_178] : memref<28x32xf32, #tpu.memory_space<vmem>>, vector<12x32xf32>
    %208 = arith.truncf %207 : vector<12x32xf32> to vector<12x32xbf16>
    %c2_179 = arith.constant 2 : index
    %c0_180 = arith.constant 0 : index
    %c0_181 = arith.constant 0 : index
    %209 = vector.load %arg14[%c2_179, %c0_180, %c0_181] : memref<9x32x128xbf16, #tpu.memory_space<vmem>>, vector<1x32x128xbf16>
    %210 = vector.shape_cast %209 : vector<1x32x128xbf16> to vector<32x128xbf16>
    %cst_182 = arith.constant dense<0.000000e+00> : vector<12x128xf32>
    %211 = tpu.matmul %208, %210, %cst_182 {dimension_numbers = #tpu.dot_dimension_numbers<[1], [0], [0], [1], [0, 0, 1, 1], [], []>} : vector<12x32xbf16>, vector<32x128xbf16>, vector<12x128xf32> -> vector<12x128xf32>
    %212 = arith.addf %206, %211 : vector<12x128xf32>
    %c7_183 = arith.constant 7 : index
    %c0_184 = arith.constant 0 : index
    %213 = vector.load %arg21[%c7_183, %c0_184] : memref<28x32xf32, #tpu.memory_space<vmem>>, vector<12x32xf32>
    %214 = arith.truncf %213 : vector<12x32xf32> to vector<12x32xbf16>
    %c3_185 = arith.constant 3 : index
    %c0_186 = arith.constant 0 : index
    %c0_187 = arith.constant 0 : index
    %215 = vector.load %arg14[%c3_185, %c0_186, %c0_187] : memref<9x32x128xbf16, #tpu.memory_space<vmem>>, vector<1x32x128xbf16>
    %216 = vector.shape_cast %215 : vector<1x32x128xbf16> to vector<32x128xbf16>
    %cst_188 = arith.constant dense<0.000000e+00> : vector<12x128xf32>
    %217 = tpu.matmul %214, %216, %cst_188 {dimension_numbers = #tpu.dot_dimension_numbers<[1], [0], [0], [1], [0, 0, 1, 1], [], []>} : vector<12x32xbf16>, vector<32x128xbf16>, vector<12x128xf32> -> vector<12x128xf32>
    %218 = arith.addf %212, %217 : vector<12x128xf32>
    %c8_189 = arith.constant 8 : index
    %c0_190 = arith.constant 0 : index
    %219 = vector.load %arg21[%c8_189, %c0_190] : memref<28x32xf32, #tpu.memory_space<vmem>>, vector<12x32xf32>
    %220 = arith.truncf %219 : vector<12x32xf32> to vector<12x32xbf16>
    %c4_191 = arith.constant 4 : index
    %c0_192 = arith.constant 0 : index
    %c0_193 = arith.constant 0 : index
    %221 = vector.load %arg14[%c4_191, %c0_192, %c0_193] : memref<9x32x128xbf16, #tpu.memory_space<vmem>>, vector<1x32x128xbf16>
    %222 = vector.shape_cast %221 : vector<1x32x128xbf16> to vector<32x128xbf16>
    %cst_194 = arith.constant dense<0.000000e+00> : vector<12x128xf32>
    %223 = tpu.matmul %220, %222, %cst_194 {dimension_numbers = #tpu.dot_dimension_numbers<[1], [0], [0], [1], [0, 0, 1, 1], [], []>} : vector<12x32xbf16>, vector<32x128xbf16>, vector<12x128xf32> -> vector<12x128xf32>
    %224 = arith.addf %218, %223 : vector<12x128xf32>
    %c9_195 = arith.constant 9 : index
    %c0_196 = arith.constant 0 : index
    %225 = vector.load %arg21[%c9_195, %c0_196] : memref<28x32xf32, #tpu.memory_space<vmem>>, vector<12x32xf32>
    %226 = arith.truncf %225 : vector<12x32xf32> to vector<12x32xbf16>
    %c5_197 = arith.constant 5 : index
    %c0_198 = arith.constant 0 : index
    %c0_199 = arith.constant 0 : index
    %227 = vector.load %arg14[%c5_197, %c0_198, %c0_199] : memref<9x32x128xbf16, #tpu.memory_space<vmem>>, vector<1x32x128xbf16>
    %228 = vector.shape_cast %227 : vector<1x32x128xbf16> to vector<32x128xbf16>
    %cst_200 = arith.constant dense<0.000000e+00> : vector<12x128xf32>
    %229 = tpu.matmul %226, %228, %cst_200 {dimension_numbers = #tpu.dot_dimension_numbers<[1], [0], [0], [1], [0, 0, 1, 1], [], []>} : vector<12x32xbf16>, vector<32x128xbf16>, vector<12x128xf32> -> vector<12x128xf32>
    %230 = arith.addf %224, %229 : vector<12x128xf32>
    %c10_201 = arith.constant 10 : index
    %c0_202 = arith.constant 0 : index
    %231 = vector.load %arg21[%c10_201, %c0_202] : memref<28x32xf32, #tpu.memory_space<vmem>>, vector<12x32xf32>
    %232 = arith.truncf %231 : vector<12x32xf32> to vector<12x32xbf16>
    %c6_203 = arith.constant 6 : index
    %c0_204 = arith.constant 0 : index
    %c0_205 = arith.constant 0 : index
    %233 = vector.load %arg14[%c6_203, %c0_204, %c0_205] : memref<9x32x128xbf16, #tpu.memory_space<vmem>>, vector<1x32x128xbf16>
    %234 = vector.shape_cast %233 : vector<1x32x128xbf16> to vector<32x128xbf16>
    %cst_206 = arith.constant dense<0.000000e+00> : vector<12x128xf32>
    %235 = tpu.matmul %232, %234, %cst_206 {dimension_numbers = #tpu.dot_dimension_numbers<[1], [0], [0], [1], [0, 0, 1, 1], [], []>} : vector<12x32xbf16>, vector<32x128xbf16>, vector<12x128xf32> -> vector<12x128xf32>
    %236 = arith.addf %230, %235 : vector<12x128xf32>
    %c12_207 = arith.constant 12 : index
    %c0_208 = arith.constant 0 : index
    %237 = vector.load %arg21[%c12_207, %c0_208] : memref<28x32xf32, #tpu.memory_space<vmem>>, vector<12x32xf32>
    %238 = arith.truncf %237 : vector<12x32xf32> to vector<12x32xbf16>
    %c7_209 = arith.constant 7 : index
    %c0_210 = arith.constant 0 : index
    %c0_211 = arith.constant 0 : index
    %239 = vector.load %arg14[%c7_209, %c0_210, %c0_211] : memref<9x32x128xbf16, #tpu.memory_space<vmem>>, vector<1x32x128xbf16>
    %240 = vector.shape_cast %239 : vector<1x32x128xbf16> to vector<32x128xbf16>
    %cst_212 = arith.constant dense<0.000000e+00> : vector<12x128xf32>
    %241 = tpu.matmul %238, %240, %cst_212 {dimension_numbers = #tpu.dot_dimension_numbers<[1], [0], [0], [1], [0, 0, 1, 1], [], []>} : vector<12x32xbf16>, vector<32x128xbf16>, vector<12x128xf32> -> vector<12x128xf32>
    %242 = arith.addf %236, %241 : vector<12x128xf32>
    %c16_213 = arith.constant 16 : index
    %c0_214 = arith.constant 0 : index
    %243 = vector.load %arg21[%c16_213, %c0_214] : memref<28x32xf32, #tpu.memory_space<vmem>>, vector<12x32xf32>
    %244 = arith.truncf %243 : vector<12x32xf32> to vector<12x32xbf16>
    %c8_215 = arith.constant 8 : index
    %c0_216 = arith.constant 0 : index
    %c0_217 = arith.constant 0 : index
    %245 = vector.load %arg14[%c8_215, %c0_216, %c0_217] : memref<9x32x128xbf16, #tpu.memory_space<vmem>>, vector<1x32x128xbf16>
    %246 = vector.shape_cast %245 : vector<1x32x128xbf16> to vector<32x128xbf16>
    %cst_218 = arith.constant dense<0.000000e+00> : vector<12x128xf32>
    %247 = tpu.matmul %244, %246, %cst_218 {dimension_numbers = #tpu.dot_dimension_numbers<[1], [0], [0], [1], [0, 0, 1, 1], [], []>} : vector<12x32xbf16>, vector<32x128xbf16>, vector<12x128xf32> -> vector<12x128xf32>
    %248 = arith.addf %242, %247 : vector<12x128xf32>
    %c0_219 = arith.constant 0 : index
    %c0_220 = arith.constant 0 : index
    %249 = vector.load %arg15[%c0_219, %c0_220] : memref<1x128xf32, #tpu.memory_space<vmem>>, vector<1x128xf32>
    %250 = vector.broadcast %249 : vector<1x128xf32> to vector<12x128xf32>
    %251 = arith.mulf %248, %250 : vector<12x128xf32>
    %c0_221 = arith.constant 0 : index
    %c0_222 = arith.constant 0 : index
    %252 = vector.load %arg16[%c0_221, %c0_222] : memref<1x128xf32, #tpu.memory_space<vmem>>, vector<1x128xf32>
    %253 = vector.broadcast %252 : vector<1x128xf32> to vector<12x128xf32>
    %254 = arith.addf %251, %253 : vector<12x128xf32>
    %cst_223 = arith.constant 0.000000e+00 : f32
    %255 = vector.broadcast %cst_223 : f32 to vector<12x128xf32>
    %256 = arith.cmpf ogt, %254, %255 : vector<12x128xf32>
    %257 = vector.broadcast %177 : f32 to vector<12x128xf32>
    %258 = arith.mulf %257, %254 : vector<12x128xf32>
    %259 = arith.select %256, %254, %258 : vector<12x128xi1>, vector<12x128xf32>
    %cst_224 = arith.constant dense<0xFF800000> : vector<128xf32>
    %260 = vector.multi_reduction <maximumf>, %259, %cst_224 [0] : vector<12x128xf32> to vector<128xf32>
    %261 = vector.shape_cast %260 : vector<128xf32> to vector<1x1x128xf32>
    %c0_225 = arith.constant 0 : index
    %c0_226 = arith.constant 0 : index
    %c0_227 = arith.constant 0 : index
    %262 = vector.load %arg18[%c0_225, %c0_226, %c0_227] : memref<1x1x128xf32, #tpu.memory_space<vmem>>, vector<1x1x128xf32>
    tpu.vector_store %arg18[%c0_225, %c0_226, %c0_227], %261 {strides = array<i32>} : memref<1x1x128xf32, #tpu.memory_space<vmem>>, vector<1x1x128xf32>,
    return
  }
  func.func @transform_0(%arg0: i32) -> (i32, i32, i32) {
    %c0_i32 = arith.constant 0 : i32
    %c0_i32_0 = arith.constant 0 : i32
    %c0_i32_1 = arith.constant 0 : i32
    return %arg0, %c0_i32, %c0_i32_0 : i32, i32, i32
  }
  func.func @transform_1(%arg0: i32) -> (i32, i32) {
    %c0_i32 = arith.constant 0 : i32
    %c0_i32_0 = arith.constant 0 : i32
    %c0_i32_1 = arith.constant 0 : i32
    return %c0_i32, %c0_i32_0 : i32, i32
  }
  func.func @transform_2(%arg0: i32) -> (i32, i32) {
    %c0_i32 = arith.constant 0 : i32
    %c0_i32_0 = arith.constant 0 : i32
    %c0_i32_1 = arith.constant 0 : i32
    return %c0_i32, %c0_i32_0 : i32, i32
  }
  func.func @transform_3(%arg0: i32) -> (i32, i32, i32) {
    %c0_i32 = arith.constant 0 : i32
    %c0_i32_0 = arith.constant 0 : i32
    %c0_i32_1 = arith.constant 0 : i32
    %c0_i32_2 = arith.constant 0 : i32
    return %c0_i32, %c0_i32_0, %c0_i32_1 : i32, i32, i32
  }
  func.func @transform_4(%arg0: i32) -> (i32, i32) {
    %c0_i32 = arith.constant 0 : i32
    %c0_i32_0 = arith.constant 0 : i32
    %c0_i32_1 = arith.constant 0 : i32
    return %c0_i32, %c0_i32_0 : i32, i32
  }
  func.func @transform_5(%arg0: i32) -> (i32, i32) {
    %c0_i32 = arith.constant 0 : i32
    %c0_i32_0 = arith.constant 0 : i32
    %c0_i32_1 = arith.constant 0 : i32
    return %c0_i32, %c0_i32_0 : i32, i32
  }
  func.func @transform_6(%arg0: i32) -> (i32, i32) {
    %c0_i32 = arith.constant 0 : i32
    %c0_i32_0 = arith.constant 0 : i32
    %c0_i32_1 = arith.constant 0 : i32
    return %c0_i32, %c0_i32_0 : i32, i32
  }
  func.func @transform_7(%arg0: i32) -> (i32, i32) {
    %c0_i32 = arith.constant 0 : i32
    %c0_i32_0 = arith.constant 0 : i32
    %c0_i32_1 = arith.constant 0 : i32
    return %c0_i32, %c0_i32_0 : i32, i32
  }
  func.func @transform_8(%arg0: i32) -> (i32, i32, i32) {
    %c0_i32 = arith.constant 0 : i32
    %c0_i32_0 = arith.constant 0 : i32
    %c0_i32_1 = arith.constant 0 : i32
    %c0_i32_2 = arith.constant 0 : i32
    return %c0_i32, %c0_i32_0, %c0_i32_1 : i32, i32, i32
  }
  func.func @transform_9(%arg0: i32) -> (i32, i32) {
    %c0_i32 = arith.constant 0 : i32
    %c0_i32_0 = arith.constant 0 : i32
    %c0_i32_1 = arith.constant 0 : i32
    return %c0_i32, %c0_i32_0 : i32, i32
  }
  func.func @transform_10(%arg0: i32) -> (i32, i32) {
    %c0_i32 = arith.constant 0 : i32
    %c0_i32_0 = arith.constant 0 : i32
    %c0_i32_1 = arith.constant 0 : i32
    return %c0_i32, %c0_i32_0 : i32, i32
  }
  func.func @transform_11(%arg0: i32) -> (i32, i32) {
    %c0_i32 = arith.constant 0 : i32
    %c0_i32_0 = arith.constant 0 : i32
    %c0_i32_1 = arith.constant 0 : i32
    return %c0_i32, %c0_i32_0 : i32, i32
  }
  func.func @transform_12(%arg0: i32) -> (i32, i32) {
    %c0_i32 = arith.constant 0 : i32
    %c0_i32_0 = arith.constant 0 : i32
    %c0_i32_1 = arith.constant 0 : i32
    return %c0_i32, %c0_i32_0 : i32, i32
  }
  func.func @transform_13(%arg0: i32) -> (i32, i32, i32) {
    %c0_i32 = arith.constant 0 : i32
    %c0_i32_0 = arith.constant 0 : i32
    %c0_i32_1 = arith.constant 0 : i32
    %c0_i32_2 = arith.constant 0 : i32
    return %c0_i32, %c0_i32_0, %c0_i32_1 : i32, i32, i32
  }
  func.func @transform_14(%arg0: i32) -> (i32, i32) {
    %c0_i32 = arith.constant 0 : i32
    %c0_i32_0 = arith.constant 0 : i32
    %c0_i32_1 = arith.constant 0 : i32
    return %c0_i32, %c0_i32_0 : i32, i32
  }
  func.func @transform_15(%arg0: i32) -> (i32, i32) {
    %c0_i32 = arith.constant 0 : i32
    %c0_i32_0 = arith.constant 0 : i32
    %c0_i32_1 = arith.constant 0 : i32
    return %c0_i32, %c0_i32_0 : i32, i32
  }
  func.func @transform_16(%arg0: i32) -> (i32, i32) {
    %c0_i32 = arith.constant 0 : i32
    %c0_i32_0 = arith.constant 0 : i32
    %c0_i32_1 = arith.constant 0 : i32
    return %c0_i32, %c0_i32_0 : i32, i32
  }
  func.func @transform_17(%arg0: i32) -> (i32, i32, i32) {
    %c0_i32 = arith.constant 0 : i32
    %c0_i32_0 = arith.constant 0 : i32
    %c0_i32_1 = arith.constant 0 : i32
    return %arg0, %c0_i32, %c0_i32_0 : i32, i32, i32
  }
}

module attributes {stable_mosaic.version = 11 : i64} {
  func.func @_pkt_kernel(%arg0: i32, %arg1: memref<1x16x33xf32, #tpu.memory_space<vmem>>, %arg2: memref<3x33x32xbf16, #tpu.memory_space<vmem>>, %arg3: memref<1x32xf32, #tpu.memory_space<vmem>>, %arg4: memref<3x32x64xbf16, #tpu.memory_space<vmem>>, %arg5: memref<1x64xf32, #tpu.memory_space<vmem>>, %arg6: memref<3x64x128xbf16, #tpu.memory_space<vmem>>, %arg7: memref<1x128xf32, #tpu.memory_space<vmem>>, %arg8: memref<3xf32, #tpu.memory_space<smem>>, %arg9: memref<1x1x128xf32, #tpu.memory_space<vmem>>) attributes {dimension_semantics = [#tpu.dimension_semantics<parallel>], iteration_bounds = array<i64: 2>, scalar_prefetch = 0 : i64, scratch_operands = 0 : i64, tpu.core_type = #tpu.core_type<tc>, window_params = [{transform_indices = @transform_0, window_bounds = array<i64: 1, 16, 33>}, {pipeline_mode = #tpu.pipeline_mode<synchronous>, transform_indices = @transform_1, window_bounds = array<i64: 3, 33, 32>}, {pipeline_mode = #tpu.pipeline_mode<synchronous>, transform_indices = @transform_2, window_bounds = array<i64: 1, 32>}, {pipeline_mode = #tpu.pipeline_mode<synchronous>, transform_indices = @transform_3, window_bounds = array<i64: 3, 32, 64>}, {pipeline_mode = #tpu.pipeline_mode<synchronous>, transform_indices = @transform_4, window_bounds = array<i64: 1, 64>}, {pipeline_mode = #tpu.pipeline_mode<synchronous>, transform_indices = @transform_5, window_bounds = array<i64: 3, 64, 128>}, {pipeline_mode = #tpu.pipeline_mode<synchronous>, transform_indices = @transform_6, window_bounds = array<i64: 1, 128>}, {transform_indices = @transform_7, window_bounds = array<i64: 3>}, {transform_indices = @transform_8, window_bounds = array<i64: 1, 1, 128>}]} {
    %c0 = arith.constant 0 : index
    %c0_0 = arith.constant 0 : index
    %c0_1 = arith.constant 0 : index
    %0 = vector.load %arg1[%c0, %c0_0, %c0_1] : memref<1x16x33xf32, #tpu.memory_space<vmem>>, vector<1x16x33xf32>
    %1 = vector.shape_cast %0 : vector<1x16x33xf32> to vector<16x33xf32>
    %2 = arith.truncf %1 : vector<16x33xf32> to vector<16x33xbf16>
    %3 = vector.extract_strided_slice %2 {offsets = [0, 0], sizes = [14, 33], strides = [1, 1]} : vector<16x33xbf16> to vector<14x33xbf16>
    %c0_2 = arith.constant 0 : index
    %c0_3 = arith.constant 0 : index
    %c0_4 = arith.constant 0 : index
    %4 = vector.load %arg2[%c0_2, %c0_3, %c0_4] : memref<3x33x32xbf16, #tpu.memory_space<vmem>>, vector<1x33x32xbf16>
    %5 = vector.shape_cast %4 : vector<1x33x32xbf16> to vector<33x32xbf16>
    %cst = arith.constant dense<0.000000e+00> : vector<14x32xf32>
    %6 = tpu.matmul %3, %5, %cst {dimension_numbers = #tpu.dot_dimension_numbers<[1], [0], [0], [1], [0, 0, 1, 1], [], []>} : vector<14x33xbf16>, vector<33x32xbf16>, vector<14x32xf32> -> vector<14x32xf32>
    %7 = vector.extract_strided_slice %2 {offsets = [1, 0], sizes = [14, 33], strides = [1, 1]} : vector<16x33xbf16> to vector<14x33xbf16>
    %c1 = arith.constant 1 : index
    %c0_5 = arith.constant 0 : index
    %c0_6 = arith.constant 0 : index
    %8 = vector.load %arg2[%c1, %c0_5, %c0_6] : memref<3x33x32xbf16, #tpu.memory_space<vmem>>, vector<1x33x32xbf16>
    %9 = vector.shape_cast %8 : vector<1x33x32xbf16> to vector<33x32xbf16>
    %cst_7 = arith.constant dense<0.000000e+00> : vector<14x32xf32>
    %10 = tpu.matmul %7, %9, %cst_7 {dimension_numbers = #tpu.dot_dimension_numbers<[1], [0], [0], [1], [0, 0, 1, 1], [], []>} : vector<14x33xbf16>, vector<33x32xbf16>, vector<14x32xf32> -> vector<14x32xf32>
    %11 = arith.addf %6, %10 : vector<14x32xf32>
    %12 = vector.extract_strided_slice %2 {offsets = [2, 0], sizes = [14, 33], strides = [1, 1]} : vector<16x33xbf16> to vector<14x33xbf16>
    %c2 = arith.constant 2 : index
    %c0_8 = arith.constant 0 : index
    %c0_9 = arith.constant 0 : index
    %13 = vector.load %arg2[%c2, %c0_8, %c0_9] : memref<3x33x32xbf16, #tpu.memory_space<vmem>>, vector<1x33x32xbf16>
    %14 = vector.shape_cast %13 : vector<1x33x32xbf16> to vector<33x32xbf16>
    %cst_10 = arith.constant dense<0.000000e+00> : vector<14x32xf32>
    %15 = tpu.matmul %12, %14, %cst_10 {dimension_numbers = #tpu.dot_dimension_numbers<[1], [0], [0], [1], [0, 0, 1, 1], [], []>} : vector<14x33xbf16>, vector<33x32xbf16>, vector<14x32xf32> -> vector<14x32xf32>
    %16 = arith.addf %11, %15 : vector<14x32xf32>
    %c0_11 = arith.constant 0 : index
    %c0_12 = arith.constant 0 : index
    %17 = vector.load %arg3[%c0_11, %c0_12] : memref<1x32xf32, #tpu.memory_space<vmem>>, vector<1x32xf32>
    %18 = vector.broadcast %17 : vector<1x32xf32> to vector<14x32xf32>
    %19 = arith.addf %16, %18 : vector<14x32xf32>
    %c0_13 = arith.constant 0 : index
    %20 = memref.load %arg8[%c0_13] : memref<3xf32, #tpu.memory_space<smem>>
    %cst_14 = arith.constant 0.000000e+00 : f32
    %21 = vector.broadcast %cst_14 : f32 to vector<14x32xf32>
    %22 = arith.cmpf ogt, %19, %21 : vector<14x32xf32>
    %23 = vector.broadcast %20 : f32 to vector<14x32xf32>
    %24 = arith.mulf %23, %19 : vector<14x32xf32>
    %25 = arith.select %22, %19, %24 : vector<14x32xi1>, vector<14x32xf32>
    %26 = arith.truncf %25 : vector<14x32xf32> to vector<14x32xbf16>
    %27 = vector.extract_strided_slice %26 {offsets = [0, 0], sizes = [12, 32], strides = [1, 1]} : vector<14x32xbf16> to vector<12x32xbf16>
    %c0_15 = arith.constant 0 : index
    %c0_16 = arith.constant 0 : index
    %c0_17 = arith.constant 0 : index
    %28 = vector.load %arg4[%c0_15, %c0_16, %c0_17] : memref<3x32x64xbf16, #tpu.memory_space<vmem>>, vector<1x32x64xbf16>
    %29 = vector.shape_cast %28 : vector<1x32x64xbf16> to vector<32x64xbf16>
    %cst_18 = arith.constant dense<0.000000e+00> : vector<12x64xf32>
    %30 = tpu.matmul %27, %29, %cst_18 {dimension_numbers = #tpu.dot_dimension_numbers<[1], [0], [0], [1], [0, 0, 1, 1], [], []>} : vector<12x32xbf16>, vector<32x64xbf16>, vector<12x64xf32> -> vector<12x64xf32>
    %31 = vector.extract_strided_slice %26 {offsets = [1, 0], sizes = [12, 32], strides = [1, 1]} : vector<14x32xbf16> to vector<12x32xbf16>
    %c1_19 = arith.constant 1 : index
    %c0_20 = arith.constant 0 : index
    %c0_21 = arith.constant 0 : index
    %32 = vector.load %arg4[%c1_19, %c0_20, %c0_21] : memref<3x32x64xbf16, #tpu.memory_space<vmem>>, vector<1x32x64xbf16>
    %33 = vector.shape_cast %32 : vector<1x32x64xbf16> to vector<32x64xbf16>
    %cst_22 = arith.constant dense<0.000000e+00> : vector<12x64xf32>
    %34 = tpu.matmul %31, %33, %cst_22 {dimension_numbers = #tpu.dot_dimension_numbers<[1], [0], [0], [1], [0, 0, 1, 1], [], []>} : vector<12x32xbf16>, vector<32x64xbf16>, vector<12x64xf32> -> vector<12x64xf32>
    %35 = arith.addf %30, %34 : vector<12x64xf32>
    %36 = vector.extract_strided_slice %26 {offsets = [2, 0], sizes = [12, 32], strides = [1, 1]} : vector<14x32xbf16> to vector<12x32xbf16>
    %c2_23 = arith.constant 2 : index
    %c0_24 = arith.constant 0 : index
    %c0_25 = arith.constant 0 : index
    %37 = vector.load %arg4[%c2_23, %c0_24, %c0_25] : memref<3x32x64xbf16, #tpu.memory_space<vmem>>, vector<1x32x64xbf16>
    %38 = vector.shape_cast %37 : vector<1x32x64xbf16> to vector<32x64xbf16>
    %cst_26 = arith.constant dense<0.000000e+00> : vector<12x64xf32>
    %39 = tpu.matmul %36, %38, %cst_26 {dimension_numbers = #tpu.dot_dimension_numbers<[1], [0], [0], [1], [0, 0, 1, 1], [], []>} : vector<12x32xbf16>, vector<32x64xbf16>, vector<12x64xf32> -> vector<12x64xf32>
    %40 = arith.addf %35, %39 : vector<12x64xf32>
    %c0_27 = arith.constant 0 : index
    %c0_28 = arith.constant 0 : index
    %41 = vector.load %arg5[%c0_27, %c0_28] : memref<1x64xf32, #tpu.memory_space<vmem>>, vector<1x64xf32>
    %42 = vector.broadcast %41 : vector<1x64xf32> to vector<12x64xf32>
    %43 = arith.addf %40, %42 : vector<12x64xf32>
    %c1_29 = arith.constant 1 : index
    %44 = memref.load %arg8[%c1_29] : memref<3xf32, #tpu.memory_space<smem>>
    %cst_30 = arith.constant 0.000000e+00 : f32
    %45 = vector.broadcast %cst_30 : f32 to vector<12x64xf32>
    %46 = arith.cmpf ogt, %43, %45 : vector<12x64xf32>
    %47 = vector.broadcast %44 : f32 to vector<12x64xf32>
    %48 = arith.mulf %47, %43 : vector<12x64xf32>
    %49 = arith.select %46, %43, %48 : vector<12x64xi1>, vector<12x64xf32>
    %50 = arith.truncf %49 : vector<12x64xf32> to vector<12x64xbf16>
    %51 = vector.extract_strided_slice %50 {offsets = [0, 0], sizes = [10, 64], strides = [1, 1]} : vector<12x64xbf16> to vector<10x64xbf16>
    %c0_31 = arith.constant 0 : index
    %c0_32 = arith.constant 0 : index
    %c0_33 = arith.constant 0 : index
    %52 = vector.load %arg6[%c0_31, %c0_32, %c0_33] : memref<3x64x128xbf16, #tpu.memory_space<vmem>>, vector<1x64x128xbf16>
    %53 = vector.shape_cast %52 : vector<1x64x128xbf16> to vector<64x128xbf16>
    %cst_34 = arith.constant dense<0.000000e+00> : vector<10x128xf32>
    %54 = tpu.matmul %51, %53, %cst_34 {dimension_numbers = #tpu.dot_dimension_numbers<[1], [0], [0], [1], [0, 0, 1, 1], [], []>} : vector<10x64xbf16>, vector<64x128xbf16>, vector<10x128xf32> -> vector<10x128xf32>
    %55 = vector.extract_strided_slice %50 {offsets = [1, 0], sizes = [10, 64], strides = [1, 1]} : vector<12x64xbf16> to vector<10x64xbf16>
    %c1_35 = arith.constant 1 : index
    %c0_36 = arith.constant 0 : index
    %c0_37 = arith.constant 0 : index
    %56 = vector.load %arg6[%c1_35, %c0_36, %c0_37] : memref<3x64x128xbf16, #tpu.memory_space<vmem>>, vector<1x64x128xbf16>
    %57 = vector.shape_cast %56 : vector<1x64x128xbf16> to vector<64x128xbf16>
    %cst_38 = arith.constant dense<0.000000e+00> : vector<10x128xf32>
    %58 = tpu.matmul %55, %57, %cst_38 {dimension_numbers = #tpu.dot_dimension_numbers<[1], [0], [0], [1], [0, 0, 1, 1], [], []>} : vector<10x64xbf16>, vector<64x128xbf16>, vector<10x128xf32> -> vector<10x128xf32>
    %59 = arith.addf %54, %58 : vector<10x128xf32>
    %60 = vector.extract_strided_slice %50 {offsets = [2, 0], sizes = [10, 64], strides = [1, 1]} : vector<12x64xbf16> to vector<10x64xbf16>
    %c2_39 = arith.constant 2 : index
    %c0_40 = arith.constant 0 : index
    %c0_41 = arith.constant 0 : index
    %61 = vector.load %arg6[%c2_39, %c0_40, %c0_41] : memref<3x64x128xbf16, #tpu.memory_space<vmem>>, vector<1x64x128xbf16>
    %62 = vector.shape_cast %61 : vector<1x64x128xbf16> to vector<64x128xbf16>
    %cst_42 = arith.constant dense<0.000000e+00> : vector<10x128xf32>
    %63 = tpu.matmul %60, %62, %cst_42 {dimension_numbers = #tpu.dot_dimension_numbers<[1], [0], [0], [1], [0, 0, 1, 1], [], []>} : vector<10x64xbf16>, vector<64x128xbf16>, vector<10x128xf32> -> vector<10x128xf32>
    %64 = arith.addf %59, %63 : vector<10x128xf32>
    %c0_43 = arith.constant 0 : index
    %c0_44 = arith.constant 0 : index
    %65 = vector.load %arg7[%c0_43, %c0_44] : memref<1x128xf32, #tpu.memory_space<vmem>>, vector<1x128xf32>
    %66 = vector.broadcast %65 : vector<1x128xf32> to vector<10x128xf32>
    %67 = arith.addf %64, %66 : vector<10x128xf32>
    %c2_45 = arith.constant 2 : index
    %68 = memref.load %arg8[%c2_45] : memref<3xf32, #tpu.memory_space<smem>>
    %cst_46 = arith.constant 0.000000e+00 : f32
    %69 = vector.broadcast %cst_46 : f32 to vector<10x128xf32>
    %70 = arith.cmpf ogt, %67, %69 : vector<10x128xf32>
    %71 = vector.broadcast %68 : f32 to vector<10x128xf32>
    %72 = arith.mulf %71, %67 : vector<10x128xf32>
    %73 = arith.select %70, %67, %72 : vector<10x128xi1>, vector<10x128xf32>
    %cst_47 = arith.constant dense<0xFF800000> : vector<128xf32>
    %74 = vector.multi_reduction <maximumf>, %73, %cst_47 [0] : vector<10x128xf32> to vector<128xf32>
    %75 = vector.shape_cast %74 : vector<128xf32> to vector<1x1x128xf32>
    %c0_48 = arith.constant 0 : index
    %c0_49 = arith.constant 0 : index
    %c0_50 = arith.constant 0 : index
    %76 = vector.load %arg9[%c0_48, %c0_49, %c0_50] : memref<1x1x128xf32, #tpu.memory_space<vmem>>, vector<1x1x128xf32>
    tpu.vector_store %arg9[%c0_48, %c0_49, %c0_50], %75 {strides = array<i32>} : memref<1x1x128xf32, #tpu.memory_space<vmem>>, vector<1x1x128xf32>,
    return
  }
  func.func @transform_0(%arg0: i32) -> (i32, i32, i32) {
    %c0_i32 = arith.constant 0 : i32
    %c0_i32_0 = arith.constant 0 : i32
    %c0_i32_1 = arith.constant 0 : i32
    return %arg0, %c0_i32, %c0_i32_0 : i32, i32, i32
  }
  func.func @transform_1(%arg0: i32) -> (i32, i32, i32) {
    %c0_i32 = arith.constant 0 : i32
    %c0_i32_0 = arith.constant 0 : i32
    %c0_i32_1 = arith.constant 0 : i32
    %c0_i32_2 = arith.constant 0 : i32
    return %c0_i32, %c0_i32_0, %c0_i32_1 : i32, i32, i32
  }
  func.func @transform_2(%arg0: i32) -> (i32, i32) {
    %c0_i32 = arith.constant 0 : i32
    %c0_i32_0 = arith.constant 0 : i32
    %c0_i32_1 = arith.constant 0 : i32
    return %c0_i32, %c0_i32_0 : i32, i32
  }
  func.func @transform_3(%arg0: i32) -> (i32, i32, i32) {
    %c0_i32 = arith.constant 0 : i32
    %c0_i32_0 = arith.constant 0 : i32
    %c0_i32_1 = arith.constant 0 : i32
    %c0_i32_2 = arith.constant 0 : i32
    return %c0_i32, %c0_i32_0, %c0_i32_1 : i32, i32, i32
  }
  func.func @transform_4(%arg0: i32) -> (i32, i32) {
    %c0_i32 = arith.constant 0 : i32
    %c0_i32_0 = arith.constant 0 : i32
    %c0_i32_1 = arith.constant 0 : i32
    return %c0_i32, %c0_i32_0 : i32, i32
  }
  func.func @transform_5(%arg0: i32) -> (i32, i32, i32) {
    %c0_i32 = arith.constant 0 : i32
    %c0_i32_0 = arith.constant 0 : i32
    %c0_i32_1 = arith.constant 0 : i32
    %c0_i32_2 = arith.constant 0 : i32
    return %c0_i32, %c0_i32_0, %c0_i32_1 : i32, i32, i32
  }
  func.func @transform_6(%arg0: i32) -> (i32, i32) {
    %c0_i32 = arith.constant 0 : i32
    %c0_i32_0 = arith.constant 0 : i32
    %c0_i32_1 = arith.constant 0 : i32
    return %c0_i32, %c0_i32_0 : i32, i32
  }
  func.func @transform_7(%arg0: i32) -> i32 {
    %c0_i32 = arith.constant 0 : i32
    %c0_i32_0 = arith.constant 0 : i32
    return %c0_i32 : i32
  }
  func.func @transform_8(%arg0: i32) -> (i32, i32, i32) {
    %c0_i32 = arith.constant 0 : i32
    %c0_i32_0 = arith.constant 0 : i32
    %c0_i32_1 = arith.constant 0 : i32
    return %arg0, %c0_i32, %c0_i32_0 : i32, i32, i32
  }
}

module attributes {stable_mosaic.version = 11 : i64} {
  func.func @_branch_kernel(%arg0: i32, %arg1: memref<1x16x33xf32, #tpu.memory_space<vmem>>, %arg2: memref<33x6xbf16, #tpu.memory_space<vmem>>, %arg3: memref<1x6xf32, #tpu.memory_space<vmem>>, %arg4: memref<11x6x32xbf16, #tpu.memory_space<vmem>>, %arg5: memref<1x32xf32, #tpu.memory_space<vmem>>, %arg6: memref<1x32xf32, #tpu.memory_space<vmem>>, %arg7: memref<32x12xbf16, #tpu.memory_space<vmem>>, %arg8: memref<1x12xf32, #tpu.memory_space<vmem>>, %arg9: memref<11x12x64xbf16, #tpu.memory_space<vmem>>, %arg10: memref<1x64xf32, #tpu.memory_space<vmem>>, %arg11: memref<1x64xf32, #tpu.memory_space<vmem>>, %arg12: memref<64x12xbf16, #tpu.memory_space<vmem>>, %arg13: memref<1x12xf32, #tpu.memory_space<vmem>>, %arg14: memref<11x12x64xbf16, #tpu.memory_space<vmem>>, %arg15: memref<1x64xf32, #tpu.memory_space<vmem>>, %arg16: memref<1x64xf32, #tpu.memory_space<vmem>>, %arg17: memref<64x25xbf16, #tpu.memory_space<vmem>>, %arg18: memref<1x25xf32, #tpu.memory_space<vmem>>, %arg19: memref<11x25x128xbf16, #tpu.memory_space<vmem>>, %arg20: memref<1x128xf32, #tpu.memory_space<vmem>>, %arg21: memref<1x128xf32, #tpu.memory_space<vmem>>, %arg22: memref<4x2xf32, #tpu.memory_space<smem>>, %arg23: memref<1x1x128xf32, #tpu.memory_space<vmem>>, %arg24: memref<48x6xf32, #tpu.memory_space<vmem>>, %arg25: memref<48x12xf32, #tpu.memory_space<vmem>>, %arg26: memref<48x12xf32, #tpu.memory_space<vmem>>, %arg27: memref<48x25xf32, #tpu.memory_space<vmem>>) attributes {dimension_semantics = [#tpu.dimension_semantics<parallel>], iteration_bounds = array<i64: 2>, scalar_prefetch = 0 : i64, scratch_operands = 4 : i64, tpu.core_type = #tpu.core_type<tc>, window_params = [{transform_indices = @transform_0, window_bounds = array<i64: 1, 16, 33>}, {pipeline_mode = #tpu.pipeline_mode<synchronous>, transform_indices = @transform_1, window_bounds = array<i64: 33, 6>}, {pipeline_mode = #tpu.pipeline_mode<synchronous>, transform_indices = @transform_2, window_bounds = array<i64: 1, 6>}, {pipeline_mode = #tpu.pipeline_mode<synchronous>, transform_indices = @transform_3, window_bounds = array<i64: 11, 6, 32>}, {pipeline_mode = #tpu.pipeline_mode<synchronous>, transform_indices = @transform_4, window_bounds = array<i64: 1, 32>}, {pipeline_mode = #tpu.pipeline_mode<synchronous>, transform_indices = @transform_5, window_bounds = array<i64: 1, 32>}, {pipeline_mode = #tpu.pipeline_mode<synchronous>, transform_indices = @transform_6, window_bounds = array<i64: 32, 12>}, {pipeline_mode = #tpu.pipeline_mode<synchronous>, transform_indices = @transform_7, window_bounds = array<i64: 1, 12>}, {pipeline_mode = #tpu.pipeline_mode<synchronous>, transform_indices = @transform_8, window_bounds = array<i64: 11, 12, 64>}, {pipeline_mode = #tpu.pipeline_mode<synchronous>, transform_indices = @transform_9, window_bounds = array<i64: 1, 64>}, {pipeline_mode = #tpu.pipeline_mode<synchronous>, transform_indices = @transform_10, window_bounds = array<i64: 1, 64>}, {pipeline_mode = #tpu.pipeline_mode<synchronous>, transform_indices = @transform_11, window_bounds = array<i64: 64, 12>}, {pipeline_mode = #tpu.pipeline_mode<synchronous>, transform_indices = @transform_12, window_bounds = array<i64: 1, 12>}, {pipeline_mode = #tpu.pipeline_mode<synchronous>, transform_indices = @transform_13, window_bounds = array<i64: 11, 12, 64>}, {pipeline_mode = #tpu.pipeline_mode<synchronous>, transform_indices = @transform_14, window_bounds = array<i64: 1, 64>}, {pipeline_mode = #tpu.pipeline_mode<synchronous>, transform_indices = @transform_15, window_bounds = array<i64: 1, 64>}, {pipeline_mode = #tpu.pipeline_mode<synchronous>, transform_indices = @transform_16, window_bounds = array<i64: 64, 25>}, {pipeline_mode = #tpu.pipeline_mode<synchronous>, transform_indices = @transform_17, window_bounds = array<i64: 1, 25>}, {pipeline_mode = #tpu.pipeline_mode<synchronous>, transform_indices = @transform_18, window_bounds = array<i64: 11, 25, 128>}, {pipeline_mode = #tpu.pipeline_mode<synchronous>, transform_indices = @transform_19, window_bounds = array<i64: 1, 128>}, {pipeline_mode = #tpu.pipeline_mode<synchronous>, transform_indices = @transform_20, window_bounds = array<i64: 1, 128>}, {transform_indices = @transform_21, window_bounds = array<i64: 4, 2>}, {transform_indices = @transform_22, window_bounds = array<i64: 1, 1, 128>}]} {
    %c0 = arith.constant 0 : index
    %c0_0 = arith.constant 0 : index
    %c0_1 = arith.constant 0 : index
    %0 = vector.load %arg1[%c0, %c0_0, %c0_1] : memref<1x16x33xf32, #tpu.memory_space<vmem>>, vector<1x16x33xf32>
    %1 = vector.shape_cast %0 : vector<1x16x33xf32> to vector<16x33xf32>
    %c0_2 = arith.constant 0 : index
    %c0_3 = arith.constant 0 : index
    %2 = memref.load %arg22[%c0_2, %c0_3] : memref<4x2xf32, #tpu.memory_space<smem>>
    %c0_4 = arith.constant 0 : index
    %c1 = arith.constant 1 : index
    %3 = memref.load %arg22[%c0_4, %c1] : memref<4x2xf32, #tpu.memory_space<smem>>
    %4 = arith.truncf %1 : vector<16x33xf32> to vector<16x33xbf16>
    %c0_5 = arith.constant 0 : index
    %c0_6 = arith.constant 0 : index
    %5 = vector.load %arg2[%c0_5, %c0_6] : memref<33x6xbf16, #tpu.memory_space<vmem>>, vector<33x6xbf16>
    %cst = arith.constant dense<0.000000e+00> : vector<16x6xf32>
    %6 = tpu.matmul %4, %5, %cst {dimension_numbers = #tpu.dot_dimension_numbers<[1], [0], [0], [1], [0, 0, 1, 1], [], []>} : vector<16x33xbf16>, vector<33x6xbf16>, vector<16x6xf32> -> vector<16x6xf32>
    %c0_7 = arith.constant 0 : index
    %c0_8 = arith.constant 0 : index
    %7 = vector.load %arg3[%c0_7, %c0_8] : memref<1x6xf32, #tpu.memory_space<vmem>>, vector<1x6xf32>
    %8 = vector.broadcast %7 : vector<1x6xf32> to vector<16x6xf32>
    %9 = arith.addf %6, %8 : vector<16x6xf32>
    %cst_9 = arith.constant 0.000000e+00 : f32
    %10 = vector.broadcast %cst_9 : f32 to vector<16x6xf32>
    %11 = arith.cmpf ogt, %9, %10 : vector<16x6xf32>
    %12 = vector.broadcast %2 : f32 to vector<16x6xf32>
    %13 = arith.mulf %12, %9 : vector<16x6xf32>
    %14 = arith.select %11, %9, %13 : vector<16x6xi1>, vector<16x6xf32>
    %cst_10 = arith.constant 0.000000e+00 : f32
    %15 = vector.broadcast %cst_10 : f32 to vector<16x6xf32>
    %c0_11 = arith.constant 0 : index
    %c0_12 = arith.constant 0 : index
    %16 = vector.load %arg24[%c0_11, %c0_12] : memref<48x6xf32, #tpu.memory_space<vmem>>, vector<16x6xf32>
    tpu.vector_store %arg24[%c0_11, %c0_12], %15 {strides = array<i32>} : memref<48x6xf32, #tpu.memory_space<vmem>>, vector<16x6xf32>,
    %cst_13 = arith.constant 0.000000e+00 : f32
    %17 = vector.broadcast %cst_13 : f32 to vector<16x6xf32>
    %c32 = arith.constant 32 : index
    %c0_14 = arith.constant 0 : index
    %18 = vector.load %arg24[%c32, %c0_14] : memref<48x6xf32, #tpu.memory_space<vmem>>, vector<16x6xf32>
    tpu.vector_store %arg24[%c32, %c0_14], %17 {strides = array<i32>} : memref<48x6xf32, #tpu.memory_space<vmem>>, vector<16x6xf32>,
    %c16 = arith.constant 16 : index
    %c0_15 = arith.constant 0 : index
    %19 = vector.load %arg24[%c16, %c0_15] : memref<48x6xf32, #tpu.memory_space<vmem>>, vector<16x6xf32>
    tpu.vector_store %arg24[%c16, %c0_15], %14 {strides = array<i32>} : memref<48x6xf32, #tpu.memory_space<vmem>>, vector<16x6xf32>,
    %cst_16 = arith.constant 0.000000e+00 : f32
    %20 = vector.broadcast %cst_16 : f32 to vector<16x32xf32>
    %c0_17 = arith.constant 0 : index
    %c0_18 = arith.constant 0 : index
    %21 = vector.load %arg24[%c0_17, %c0_18] : memref<48x6xf32, #tpu.memory_space<vmem>>, vector<16x6xf32>
    %22 = arith.truncf %21 : vector<16x6xf32> to vector<16x6xbf16>
    %c0_19 = arith.constant 0 : index
    %c0_20 = arith.constant 0 : index
    %c0_21 = arith.constant 0 : index
    %23 = vector.load %arg4[%c0_19, %c0_20, %c0_21] : memref<11x6x32xbf16, #tpu.memory_space<vmem>>, vector<1x6x32xbf16>
    %24 = vector.shape_cast %23 : vector<1x6x32xbf16> to vector<6x32xbf16>
    %cst_22 = arith.constant dense<0.000000e+00> : vector<16x32xf32>
    %25 = tpu.matmul %22, %24, %cst_22 {dimension_numbers = #tpu.dot_dimension_numbers<[1], [0], [0], [1], [0, 0, 1, 1], [], []>} : vector<16x6xbf16>, vector<6x32xbf16>, vector<16x32xf32> -> vector<16x32xf32>
    %26 = arith.addf %20, %25 : vector<16x32xf32>
    %c8 = arith.constant 8 : index
    %c0_23 = arith.constant 0 : index
    %27 = vector.load %arg24[%c8, %c0_23] : memref<48x6xf32, #tpu.memory_space<vmem>>, vector<16x6xf32>
    %28 = arith.truncf %27 : vector<16x6xf32> to vector<16x6xbf16>
    %c1_24 = arith.constant 1 : index
    %c0_25 = arith.constant 0 : index
    %c0_26 = arith.constant 0 : index
    %29 = vector.load %arg4[%c1_24, %c0_25, %c0_26] : memref<11x6x32xbf16, #tpu.memory_space<vmem>>, vector<1x6x32xbf16>
    %30 = vector.shape_cast %29 : vector<1x6x32xbf16> to vector<6x32xbf16>
    %cst_27 = arith.constant dense<0.000000e+00> : vector<16x32xf32>
    %31 = tpu.matmul %28, %30, %cst_27 {dimension_numbers = #tpu.dot_dimension_numbers<[1], [0], [0], [1], [0, 0, 1, 1], [], []>} : vector<16x6xbf16>, vector<6x32xbf16>, vector<16x32xf32> -> vector<16x32xf32>
    %32 = arith.addf %26, %31 : vector<16x32xf32>
    %c12 = arith.constant 12 : index
    %c0_28 = arith.constant 0 : index
    %33 = vector.load %arg24[%c12, %c0_28] : memref<48x6xf32, #tpu.memory_space<vmem>>, vector<16x6xf32>
    %34 = arith.truncf %33 : vector<16x6xf32> to vector<16x6xbf16>
    %c2 = arith.constant 2 : index
    %c0_29 = arith.constant 0 : index
    %c0_30 = arith.constant 0 : index
    %35 = vector.load %arg4[%c2, %c0_29, %c0_30] : memref<11x6x32xbf16, #tpu.memory_space<vmem>>, vector<1x6x32xbf16>
    %36 = vector.shape_cast %35 : vector<1x6x32xbf16> to vector<6x32xbf16>
    %cst_31 = arith.constant dense<0.000000e+00> : vector<16x32xf32>
    %37 = tpu.matmul %34, %36, %cst_31 {dimension_numbers = #tpu.dot_dimension_numbers<[1], [0], [0], [1], [0, 0, 1, 1], [], []>} : vector<16x6xbf16>, vector<6x32xbf16>, vector<16x32xf32> -> vector<16x32xf32>
    %38 = arith.addf %32, %37 : vector<16x32xf32>
    %c14 = arith.constant 14 : index
    %c0_32 = arith.constant 0 : index
    %39 = vector.load %arg24[%c14, %c0_32] : memref<48x6xf32, #tpu.memory_space<vmem>>, vector<16x6xf32>
    %40 = arith.truncf %39 : vector<16x6xf32> to vector<16x6xbf16>
    %c3 = arith.constant 3 : index
    %c0_33 = arith.constant 0 : index
    %c0_34 = arith.constant 0 : index
    %41 = vector.load %arg4[%c3, %c0_33, %c0_34] : memref<11x6x32xbf16, #tpu.memory_space<vmem>>, vector<1x6x32xbf16>
    %42 = vector.shape_cast %41 : vector<1x6x32xbf16> to vector<6x32xbf16>
    %cst_35 = arith.constant dense<0.000000e+00> : vector<16x32xf32>
    %43 = tpu.matmul %40, %42, %cst_35 {dimension_numbers = #tpu.dot_dimension_numbers<[1], [0], [0], [1], [0, 0, 1, 1], [], []>} : vector<16x6xbf16>, vector<6x32xbf16>, vector<16x32xf32> -> vector<16x32xf32>
    %44 = arith.addf %38, %43 : vector<16x32xf32>
    %c15 = arith.constant 15 : index
    %c0_36 = arith.constant 0 : index
    %45 = vector.load %arg24[%c15, %c0_36] : memref<48x6xf32, #tpu.memory_space<vmem>>, vector<16x6xf32>
    %46 = arith.truncf %45 : vector<16x6xf32> to vector<16x6xbf16>
    %c4 = arith.constant 4 : index
    %c0_37 = arith.constant 0 : index
    %c0_38 = arith.constant 0 : index
    %47 = vector.load %arg4[%c4, %c0_37, %c0_38] : memref<11x6x32xbf16, #tpu.memory_space<vmem>>, vector<1x6x32xbf16>
    %48 = vector.shape_cast %47 : vector<1x6x32xbf16> to vector<6x32xbf16>
    %cst_39 = arith.constant dense<0.000000e+00> : vector<16x32xf32>
    %49 = tpu.matmul %46, %48, %cst_39 {dimension_numbers = #tpu.dot_dimension_numbers<[1], [0], [0], [1], [0, 0, 1, 1], [], []>} : vector<16x6xbf16>, vector<6x32xbf16>, vector<16x32xf32> -> vector<16x32xf32>
    %50 = arith.addf %44, %49 : vector<16x32xf32>
    %c16_40 = arith.constant 16 : index
    %c0_41 = arith.constant 0 : index
    %51 = vector.load %arg24[%c16_40, %c0_41] : memref<48x6xf32, #tpu.memory_space<vmem>>, vector<16x6xf32>
    %52 = arith.truncf %51 : vector<16x6xf32> to vector<16x6xbf16>
    %c5 = arith.constant 5 : index
    %c0_42 = arith.constant 0 : index
    %c0_43 = arith.constant 0 : index
    %53 = vector.load %arg4[%c5, %c0_42, %c0_43] : memref<11x6x32xbf16, #tpu.memory_space<vmem>>, vector<1x6x32xbf16>
    %54 = vector.shape_cast %53 : vector<1x6x32xbf16> to vector<6x32xbf16>
    %cst_44 = arith.constant dense<0.000000e+00> : vector<16x32xf32>
    %55 = tpu.matmul %52, %54, %cst_44 {dimension_numbers = #tpu.dot_dimension_numbers<[1], [0], [0], [1], [0, 0, 1, 1], [], []>} : vector<16x6xbf16>, vector<6x32xbf16>, vector<16x32xf32> -> vector<16x32xf32>
    %56 = arith.addf %50, %55 : vector<16x32xf32>
    %c17 = arith.constant 17 : index
    %c0_45 = arith.constant 0 : index
    %57 = vector.load %arg24[%c17, %c0_45] : memref<48x6xf32, #tpu.memory_space<vmem>>, vector<16x6xf32>
    %58 = arith.truncf %57 : vector<16x6xf32> to vector<16x6xbf16>
    %c6 = arith.constant 6 : index
    %c0_46 = arith.constant 0 : index
    %c0_47 = arith.constant 0 : index
    %59 = vector.load %arg4[%c6, %c0_46, %c0_47] : memref<11x6x32xbf16, #tpu.memory_space<vmem>>, vector<1x6x32xbf16>
    %60 = vector.shape_cast %59 : vector<1x6x32xbf16> to vector<6x32xbf16>
    %cst_48 = arith.constant dense<0.000000e+00> : vector<16x32xf32>
    %61 = tpu.matmul %58, %60, %cst_48 {dimension_numbers = #tpu.dot_dimension_numbers<[1], [0], [0], [1], [0, 0, 1, 1], [], []>} : vector<16x6xbf16>, vector<6x32xbf16>, vector<16x32xf32> -> vector<16x32xf32>
    %62 = arith.addf %56, %61 : vector<16x32xf32>
    %c18 = arith.constant 18 : index
    %c0_49 = arith.constant 0 : index
    %63 = vector.load %arg24[%c18, %c0_49] : memref<48x6xf32, #tpu.memory_space<vmem>>, vector<16x6xf32>
    %64 = arith.truncf %63 : vector<16x6xf32> to vector<16x6xbf16>
    %c7 = arith.constant 7 : index
    %c0_50 = arith.constant 0 : index
    %c0_51 = arith.constant 0 : index
    %65 = vector.load %arg4[%c7, %c0_50, %c0_51] : memref<11x6x32xbf16, #tpu.memory_space<vmem>>, vector<1x6x32xbf16>
    %66 = vector.shape_cast %65 : vector<1x6x32xbf16> to vector<6x32xbf16>
    %cst_52 = arith.constant dense<0.000000e+00> : vector<16x32xf32>
    %67 = tpu.matmul %64, %66, %cst_52 {dimension_numbers = #tpu.dot_dimension_numbers<[1], [0], [0], [1], [0, 0, 1, 1], [], []>} : vector<16x6xbf16>, vector<6x32xbf16>, vector<16x32xf32> -> vector<16x32xf32>
    %68 = arith.addf %62, %67 : vector<16x32xf32>
    %c20 = arith.constant 20 : index
    %c0_53 = arith.constant 0 : index
    %69 = vector.load %arg24[%c20, %c0_53] : memref<48x6xf32, #tpu.memory_space<vmem>>, vector<16x6xf32>
    %70 = arith.truncf %69 : vector<16x6xf32> to vector<16x6xbf16>
    %c8_54 = arith.constant 8 : index
    %c0_55 = arith.constant 0 : index
    %c0_56 = arith.constant 0 : index
    %71 = vector.load %arg4[%c8_54, %c0_55, %c0_56] : memref<11x6x32xbf16, #tpu.memory_space<vmem>>, vector<1x6x32xbf16>
    %72 = vector.shape_cast %71 : vector<1x6x32xbf16> to vector<6x32xbf16>
    %cst_57 = arith.constant dense<0.000000e+00> : vector<16x32xf32>
    %73 = tpu.matmul %70, %72, %cst_57 {dimension_numbers = #tpu.dot_dimension_numbers<[1], [0], [0], [1], [0, 0, 1, 1], [], []>} : vector<16x6xbf16>, vector<6x32xbf16>, vector<16x32xf32> -> vector<16x32xf32>
    %74 = arith.addf %68, %73 : vector<16x32xf32>
    %c24 = arith.constant 24 : index
    %c0_58 = arith.constant 0 : index
    %75 = vector.load %arg24[%c24, %c0_58] : memref<48x6xf32, #tpu.memory_space<vmem>>, vector<16x6xf32>
    %76 = arith.truncf %75 : vector<16x6xf32> to vector<16x6xbf16>
    %c9 = arith.constant 9 : index
    %c0_59 = arith.constant 0 : index
    %c0_60 = arith.constant 0 : index
    %77 = vector.load %arg4[%c9, %c0_59, %c0_60] : memref<11x6x32xbf16, #tpu.memory_space<vmem>>, vector<1x6x32xbf16>
    %78 = vector.shape_cast %77 : vector<1x6x32xbf16> to vector<6x32xbf16>
    %cst_61 = arith.constant dense<0.000000e+00> : vector<16x32xf32>
    %79 = tpu.matmul %76, %78, %cst_61 {dimension_numbers = #tpu.dot_dimension_numbers<[1], [0], [0], [1], [0, 0, 1, 1], [], []>} : vector<16x6xbf16>, vector<6x32xbf16>, vector<16x32xf32> -> vector<16x32xf32>
    %80 = arith.addf %74, %79 : vector<16x32xf32>
    %c32_62 = arith.constant 32 : index
    %c0_63 = arith.constant 0 : index
    %81 = vector.load %arg24[%c32_62, %c0_63] : memref<48x6xf32, #tpu.memory_space<vmem>>, vector<16x6xf32>
    %82 = arith.truncf %81 : vector<16x6xf32> to vector<16x6xbf16>
    %c10 = arith.constant 10 : index
    %c0_64 = arith.constant 0 : index
    %c0_65 = arith.constant 0 : index
    %83 = vector.load %arg4[%c10, %c0_64, %c0_65] : memref<11x6x32xbf16, #tpu.memory_space<vmem>>, vector<1x6x32xbf16>
    %84 = vector.shape_cast %83 : vector<1x6x32xbf16> to vector<6x32xbf16>
    %cst_66 = arith.constant dense<0.000000e+00> : vector<16x32xf32>
    %85 = tpu.matmul %82, %84, %cst_66 {dimension_numbers = #tpu.dot_dimension_numbers<[1], [0], [0], [1], [0, 0, 1, 1], [], []>} : vector<16x6xbf16>, vector<6x32xbf16>, vector<16x32xf32> -> vector<16x32xf32>
    %86 = arith.addf %80, %85 : vector<16x32xf32>
    %c0_67 = arith.constant 0 : index
    %c0_68 = arith.constant 0 : index
    %87 = vector.load %arg5[%c0_67, %c0_68] : memref<1x32xf32, #tpu.memory_space<vmem>>, vector<1x32xf32>
    %88 = vector.broadcast %87 : vector<1x32xf32> to vector<16x32xf32>
    %89 = arith.mulf %86, %88 : vector<16x32xf32>
    %c0_69 = arith.constant 0 : index
    %c0_70 = arith.constant 0 : index
    %90 = vector.load %arg6[%c0_69, %c0_70] : memref<1x32xf32, #tpu.memory_space<vmem>>, vector<1x32xf32>
    %91 = vector.broadcast %90 : vector<1x32xf32> to vector<16x32xf32>
    %92 = arith.addf %89, %91 : vector<16x32xf32>
    %cst_71 = arith.constant 0.000000e+00 : f32
    %93 = vector.broadcast %cst_71 : f32 to vector<16x32xf32>
    %94 = arith.cmpf ogt, %92, %93 : vector<16x32xf32>
    %95 = vector.broadcast %3 : f32 to vector<16x32xf32>
    %96 = arith.mulf %95, %92 : vector<16x32xf32>
    %97 = arith.select %94, %92, %96 : vector<16x32xi1>, vector<16x32xf32>
    %c1_72 = arith.constant 1 : index
    %c0_73 = arith.constant 0 : index
    %98 = memref.load %arg22[%c1_72, %c0_73] : memref<4x2xf32, #tpu.memory_space<smem>>
    %c1_74 = arith.constant 1 : index
    %c1_75 = arith.constant 1 : index
    %99 = memref.load %arg22[%c1_74, %c1_75] : memref<4x2xf32, #tpu.memory_space<smem>>
    %100 = arith.truncf %97 : vector<16x32xf32> to vector<16x32xbf16>
    %c0_76 = arith.constant 0 : index
    %c0_77 = arith.constant 0 : index
    %101 = vector.load %arg7[%c0_76, %c0_77] : memref<32x12xbf16, #tpu.memory_space<vmem>>, vector<32x12xbf16>
    %cst_78 = arith.constant dense<0.000000e+00> : vector<16x12xf32>
    %102 = tpu.matmul %100, %101, %cst_78 {dimension_numbers = #tpu.dot_dimension_numbers<[1], [0], [0], [1], [0, 0, 1, 1], [], []>} : vector<16x32xbf16>, vector<32x12xbf16>, vector<16x12xf32> -> vector<16x12xf32>
    %c0_79 = arith.constant 0 : index
    %c0_80 = arith.constant 0 : index
    %103 = vector.load %arg8[%c0_79, %c0_80] : memref<1x12xf32, #tpu.memory_space<vmem>>, vector<1x12xf32>
    %104 = vector.broadcast %103 : vector<1x12xf32> to vector<16x12xf32>
    %105 = arith.addf %102, %104 : vector<16x12xf32>
    %cst_81 = arith.constant 0.000000e+00 : f32
    %106 = vector.broadcast %cst_81 : f32 to vector<16x12xf32>
    %107 = arith.cmpf ogt, %105, %106 : vector<16x12xf32>
    %108 = vector.broadcast %98 : f32 to vector<16x12xf32>
    %109 = arith.mulf %108, %105 : vector<16x12xf32>
    %110 = arith.select %107, %105, %109 : vector<16x12xi1>, vector<16x12xf32>
    %cst_82 = arith.constant 0.000000e+00 : f32
    %111 = vector.broadcast %cst_82 : f32 to vector<16x12xf32>
    %c0_83 = arith.constant 0 : index
    %c0_84 = arith.constant 0 : index
    %112 = vector.load %arg25[%c0_83, %c0_84] : memref<48x12xf32, #tpu.memory_space<vmem>>, vector<16x12xf32>
    tpu.vector_store %arg25[%c0_83, %c0_84], %111 {strides = array<i32>} : memref<48x12xf32, #tpu.memory_space<vmem>>, vector<16x12xf32>,
    %cst_85 = arith.constant 0.000000e+00 : f32
    %113 = vector.broadcast %cst_85 : f32 to vector<16x12xf32>
    %c32_86 = arith.constant 32 : index
    %c0_87 = arith.constant 0 : index
    %114 = vector.load %arg25[%c32_86, %c0_87] : memref<48x12xf32, #tpu.memory_space<vmem>>, vector<16x12xf32>
    tpu.vector_store %arg25[%c32_86, %c0_87], %113 {strides = array<i32>} : memref<48x12xf32, #tpu.memory_space<vmem>>, vector<16x12xf32>,
    %c16_88 = arith.constant 16 : index
    %c0_89 = arith.constant 0 : index
    %115 = vector.load %arg25[%c16_88, %c0_89] : memref<48x12xf32, #tpu.memory_space<vmem>>, vector<16x12xf32>
    tpu.vector_store %arg25[%c16_88, %c0_89], %110 {strides = array<i32>} : memref<48x12xf32, #tpu.memory_space<vmem>>, vector<16x12xf32>,
    %cst_90 = arith.constant 0.000000e+00 : f32
    %116 = vector.broadcast %cst_90 : f32 to vector<16x64xf32>
    %c0_91 = arith.constant 0 : index
    %c0_92 = arith.constant 0 : index
    %117 = vector.load %arg25[%c0_91, %c0_92] : memref<48x12xf32, #tpu.memory_space<vmem>>, vector<16x12xf32>
    %118 = arith.truncf %117 : vector<16x12xf32> to vector<16x12xbf16>
    %c0_93 = arith.constant 0 : index
    %c0_94 = arith.constant 0 : index
    %c0_95 = arith.constant 0 : index
    %119 = vector.load %arg9[%c0_93, %c0_94, %c0_95] : memref<11x12x64xbf16, #tpu.memory_space<vmem>>, vector<1x12x64xbf16>
    %120 = vector.shape_cast %119 : vector<1x12x64xbf16> to vector<12x64xbf16>
    %cst_96 = arith.constant dense<0.000000e+00> : vector<16x64xf32>
    %121 = tpu.matmul %118, %120, %cst_96 {dimension_numbers = #tpu.dot_dimension_numbers<[1], [0], [0], [1], [0, 0, 1, 1], [], []>} : vector<16x12xbf16>, vector<12x64xbf16>, vector<16x64xf32> -> vector<16x64xf32>
    %122 = arith.addf %116, %121 : vector<16x64xf32>
    %c8_97 = arith.constant 8 : index
    %c0_98 = arith.constant 0 : index
    %123 = vector.load %arg25[%c8_97, %c0_98] : memref<48x12xf32, #tpu.memory_space<vmem>>, vector<16x12xf32>
    %124 = arith.truncf %123 : vector<16x12xf32> to vector<16x12xbf16>
    %c1_99 = arith.constant 1 : index
    %c0_100 = arith.constant 0 : index
    %c0_101 = arith.constant 0 : index
    %125 = vector.load %arg9[%c1_99, %c0_100, %c0_101] : memref<11x12x64xbf16, #tpu.memory_space<vmem>>, vector<1x12x64xbf16>
    %126 = vector.shape_cast %125 : vector<1x12x64xbf16> to vector<12x64xbf16>
    %cst_102 = arith.constant dense<0.000000e+00> : vector<16x64xf32>
    %127 = tpu.matmul %124, %126, %cst_102 {dimension_numbers = #tpu.dot_dimension_numbers<[1], [0], [0], [1], [0, 0, 1, 1], [], []>} : vector<16x12xbf16>, vector<12x64xbf16>, vector<16x64xf32> -> vector<16x64xf32>
    %128 = arith.addf %122, %127 : vector<16x64xf32>
    %c12_103 = arith.constant 12 : index
    %c0_104 = arith.constant 0 : index
    %129 = vector.load %arg25[%c12_103, %c0_104] : memref<48x12xf32, #tpu.memory_space<vmem>>, vector<16x12xf32>
    %130 = arith.truncf %129 : vector<16x12xf32> to vector<16x12xbf16>
    %c2_105 = arith.constant 2 : index
    %c0_106 = arith.constant 0 : index
    %c0_107 = arith.constant 0 : index
    %131 = vector.load %arg9[%c2_105, %c0_106, %c0_107] : memref<11x12x64xbf16, #tpu.memory_space<vmem>>, vector<1x12x64xbf16>
    %132 = vector.shape_cast %131 : vector<1x12x64xbf16> to vector<12x64xbf16>
    %cst_108 = arith.constant dense<0.000000e+00> : vector<16x64xf32>
    %133 = tpu.matmul %130, %132, %cst_108 {dimension_numbers = #tpu.dot_dimension_numbers<[1], [0], [0], [1], [0, 0, 1, 1], [], []>} : vector<16x12xbf16>, vector<12x64xbf16>, vector<16x64xf32> -> vector<16x64xf32>
    %134 = arith.addf %128, %133 : vector<16x64xf32>
    %c14_109 = arith.constant 14 : index
    %c0_110 = arith.constant 0 : index
    %135 = vector.load %arg25[%c14_109, %c0_110] : memref<48x12xf32, #tpu.memory_space<vmem>>, vector<16x12xf32>
    %136 = arith.truncf %135 : vector<16x12xf32> to vector<16x12xbf16>
    %c3_111 = arith.constant 3 : index
    %c0_112 = arith.constant 0 : index
    %c0_113 = arith.constant 0 : index
    %137 = vector.load %arg9[%c3_111, %c0_112, %c0_113] : memref<11x12x64xbf16, #tpu.memory_space<vmem>>, vector<1x12x64xbf16>
    %138 = vector.shape_cast %137 : vector<1x12x64xbf16> to vector<12x64xbf16>
    %cst_114 = arith.constant dense<0.000000e+00> : vector<16x64xf32>
    %139 = tpu.matmul %136, %138, %cst_114 {dimension_numbers = #tpu.dot_dimension_numbers<[1], [0], [0], [1], [0, 0, 1, 1], [], []>} : vector<16x12xbf16>, vector<12x64xbf16>, vector<16x64xf32> -> vector<16x64xf32>
    %140 = arith.addf %134, %139 : vector<16x64xf32>
    %c15_115 = arith.constant 15 : index
    %c0_116 = arith.constant 0 : index
    %141 = vector.load %arg25[%c15_115, %c0_116] : memref<48x12xf32, #tpu.memory_space<vmem>>, vector<16x12xf32>
    %142 = arith.truncf %141 : vector<16x12xf32> to vector<16x12xbf16>
    %c4_117 = arith.constant 4 : index
    %c0_118 = arith.constant 0 : index
    %c0_119 = arith.constant 0 : index
    %143 = vector.load %arg9[%c4_117, %c0_118, %c0_119] : memref<11x12x64xbf16, #tpu.memory_space<vmem>>, vector<1x12x64xbf16>
    %144 = vector.shape_cast %143 : vector<1x12x64xbf16> to vector<12x64xbf16>
    %cst_120 = arith.constant dense<0.000000e+00> : vector<16x64xf32>
    %145 = tpu.matmul %142, %144, %cst_120 {dimension_numbers = #tpu.dot_dimension_numbers<[1], [0], [0], [1], [0, 0, 1, 1], [], []>} : vector<16x12xbf16>, vector<12x64xbf16>, vector<16x64xf32> -> vector<16x64xf32>
    %146 = arith.addf %140, %145 : vector<16x64xf32>
    %c16_121 = arith.constant 16 : index
    %c0_122 = arith.constant 0 : index
    %147 = vector.load %arg25[%c16_121, %c0_122] : memref<48x12xf32, #tpu.memory_space<vmem>>, vector<16x12xf32>
    %148 = arith.truncf %147 : vector<16x12xf32> to vector<16x12xbf16>
    %c5_123 = arith.constant 5 : index
    %c0_124 = arith.constant 0 : index
    %c0_125 = arith.constant 0 : index
    %149 = vector.load %arg9[%c5_123, %c0_124, %c0_125] : memref<11x12x64xbf16, #tpu.memory_space<vmem>>, vector<1x12x64xbf16>
    %150 = vector.shape_cast %149 : vector<1x12x64xbf16> to vector<12x64xbf16>
    %cst_126 = arith.constant dense<0.000000e+00> : vector<16x64xf32>
    %151 = tpu.matmul %148, %150, %cst_126 {dimension_numbers = #tpu.dot_dimension_numbers<[1], [0], [0], [1], [0, 0, 1, 1], [], []>} : vector<16x12xbf16>, vector<12x64xbf16>, vector<16x64xf32> -> vector<16x64xf32>
    %152 = arith.addf %146, %151 : vector<16x64xf32>
    %c17_127 = arith.constant 17 : index
    %c0_128 = arith.constant 0 : index
    %153 = vector.load %arg25[%c17_127, %c0_128] : memref<48x12xf32, #tpu.memory_space<vmem>>, vector<16x12xf32>
    %154 = arith.truncf %153 : vector<16x12xf32> to vector<16x12xbf16>
    %c6_129 = arith.constant 6 : index
    %c0_130 = arith.constant 0 : index
    %c0_131 = arith.constant 0 : index
    %155 = vector.load %arg9[%c6_129, %c0_130, %c0_131] : memref<11x12x64xbf16, #tpu.memory_space<vmem>>, vector<1x12x64xbf16>
    %156 = vector.shape_cast %155 : vector<1x12x64xbf16> to vector<12x64xbf16>
    %cst_132 = arith.constant dense<0.000000e+00> : vector<16x64xf32>
    %157 = tpu.matmul %154, %156, %cst_132 {dimension_numbers = #tpu.dot_dimension_numbers<[1], [0], [0], [1], [0, 0, 1, 1], [], []>} : vector<16x12xbf16>, vector<12x64xbf16>, vector<16x64xf32> -> vector<16x64xf32>
    %158 = arith.addf %152, %157 : vector<16x64xf32>
    %c18_133 = arith.constant 18 : index
    %c0_134 = arith.constant 0 : index
    %159 = vector.load %arg25[%c18_133, %c0_134] : memref<48x12xf32, #tpu.memory_space<vmem>>, vector<16x12xf32>
    %160 = arith.truncf %159 : vector<16x12xf32> to vector<16x12xbf16>
    %c7_135 = arith.constant 7 : index
    %c0_136 = arith.constant 0 : index
    %c0_137 = arith.constant 0 : index
    %161 = vector.load %arg9[%c7_135, %c0_136, %c0_137] : memref<11x12x64xbf16, #tpu.memory_space<vmem>>, vector<1x12x64xbf16>
    %162 = vector.shape_cast %161 : vector<1x12x64xbf16> to vector<12x64xbf16>
    %cst_138 = arith.constant dense<0.000000e+00> : vector<16x64xf32>
    %163 = tpu.matmul %160, %162, %cst_138 {dimension_numbers = #tpu.dot_dimension_numbers<[1], [0], [0], [1], [0, 0, 1, 1], [], []>} : vector<16x12xbf16>, vector<12x64xbf16>, vector<16x64xf32> -> vector<16x64xf32>
    %164 = arith.addf %158, %163 : vector<16x64xf32>
    %c20_139 = arith.constant 20 : index
    %c0_140 = arith.constant 0 : index
    %165 = vector.load %arg25[%c20_139, %c0_140] : memref<48x12xf32, #tpu.memory_space<vmem>>, vector<16x12xf32>
    %166 = arith.truncf %165 : vector<16x12xf32> to vector<16x12xbf16>
    %c8_141 = arith.constant 8 : index
    %c0_142 = arith.constant 0 : index
    %c0_143 = arith.constant 0 : index
    %167 = vector.load %arg9[%c8_141, %c0_142, %c0_143] : memref<11x12x64xbf16, #tpu.memory_space<vmem>>, vector<1x12x64xbf16>
    %168 = vector.shape_cast %167 : vector<1x12x64xbf16> to vector<12x64xbf16>
    %cst_144 = arith.constant dense<0.000000e+00> : vector<16x64xf32>
    %169 = tpu.matmul %166, %168, %cst_144 {dimension_numbers = #tpu.dot_dimension_numbers<[1], [0], [0], [1], [0, 0, 1, 1], [], []>} : vector<16x12xbf16>, vector<12x64xbf16>, vector<16x64xf32> -> vector<16x64xf32>
    %170 = arith.addf %164, %169 : vector<16x64xf32>
    %c24_145 = arith.constant 24 : index
    %c0_146 = arith.constant 0 : index
    %171 = vector.load %arg25[%c24_145, %c0_146] : memref<48x12xf32, #tpu.memory_space<vmem>>, vector<16x12xf32>
    %172 = arith.truncf %171 : vector<16x12xf32> to vector<16x12xbf16>
    %c9_147 = arith.constant 9 : index
    %c0_148 = arith.constant 0 : index
    %c0_149 = arith.constant 0 : index
    %173 = vector.load %arg9[%c9_147, %c0_148, %c0_149] : memref<11x12x64xbf16, #tpu.memory_space<vmem>>, vector<1x12x64xbf16>
    %174 = vector.shape_cast %173 : vector<1x12x64xbf16> to vector<12x64xbf16>
    %cst_150 = arith.constant dense<0.000000e+00> : vector<16x64xf32>
    %175 = tpu.matmul %172, %174, %cst_150 {dimension_numbers = #tpu.dot_dimension_numbers<[1], [0], [0], [1], [0, 0, 1, 1], [], []>} : vector<16x12xbf16>, vector<12x64xbf16>, vector<16x64xf32> -> vector<16x64xf32>
    %176 = arith.addf %170, %175 : vector<16x64xf32>
    %c32_151 = arith.constant 32 : index
    %c0_152 = arith.constant 0 : index
    %177 = vector.load %arg25[%c32_151, %c0_152] : memref<48x12xf32, #tpu.memory_space<vmem>>, vector<16x12xf32>
    %178 = arith.truncf %177 : vector<16x12xf32> to vector<16x12xbf16>
    %c10_153 = arith.constant 10 : index
    %c0_154 = arith.constant 0 : index
    %c0_155 = arith.constant 0 : index
    %179 = vector.load %arg9[%c10_153, %c0_154, %c0_155] : memref<11x12x64xbf16, #tpu.memory_space<vmem>>, vector<1x12x64xbf16>
    %180 = vector.shape_cast %179 : vector<1x12x64xbf16> to vector<12x64xbf16>
    %cst_156 = arith.constant dense<0.000000e+00> : vector<16x64xf32>
    %181 = tpu.matmul %178, %180, %cst_156 {dimension_numbers = #tpu.dot_dimension_numbers<[1], [0], [0], [1], [0, 0, 1, 1], [], []>} : vector<16x12xbf16>, vector<12x64xbf16>, vector<16x64xf32> -> vector<16x64xf32>
    %182 = arith.addf %176, %181 : vector<16x64xf32>
    %c0_157 = arith.constant 0 : index
    %c0_158 = arith.constant 0 : index
    %183 = vector.load %arg10[%c0_157, %c0_158] : memref<1x64xf32, #tpu.memory_space<vmem>>, vector<1x64xf32>
    %184 = vector.broadcast %183 : vector<1x64xf32> to vector<16x64xf32>
    %185 = arith.mulf %182, %184 : vector<16x64xf32>
    %c0_159 = arith.constant 0 : index
    %c0_160 = arith.constant 0 : index
    %186 = vector.load %arg11[%c0_159, %c0_160] : memref<1x64xf32, #tpu.memory_space<vmem>>, vector<1x64xf32>
    %187 = vector.broadcast %186 : vector<1x64xf32> to vector<16x64xf32>
    %188 = arith.addf %185, %187 : vector<16x64xf32>
    %cst_161 = arith.constant 0.000000e+00 : f32
    %189 = vector.broadcast %cst_161 : f32 to vector<16x64xf32>
    %190 = arith.cmpf ogt, %188, %189 : vector<16x64xf32>
    %191 = vector.broadcast %99 : f32 to vector<16x64xf32>
    %192 = arith.mulf %191, %188 : vector<16x64xf32>
    %193 = arith.select %190, %188, %192 : vector<16x64xi1>, vector<16x64xf32>
    %c2_162 = arith.constant 2 : index
    %c0_163 = arith.constant 0 : index
    %194 = memref.load %arg22[%c2_162, %c0_163] : memref<4x2xf32, #tpu.memory_space<smem>>
    %c2_164 = arith.constant 2 : index
    %c1_165 = arith.constant 1 : index
    %195 = memref.load %arg22[%c2_164, %c1_165] : memref<4x2xf32, #tpu.memory_space<smem>>
    %196 = arith.truncf %193 : vector<16x64xf32> to vector<16x64xbf16>
    %c0_166 = arith.constant 0 : index
    %c0_167 = arith.constant 0 : index
    %197 = vector.load %arg12[%c0_166, %c0_167] : memref<64x12xbf16, #tpu.memory_space<vmem>>, vector<64x12xbf16>
    %cst_168 = arith.constant dense<0.000000e+00> : vector<16x12xf32>
    %198 = tpu.matmul %196, %197, %cst_168 {dimension_numbers = #tpu.dot_dimension_numbers<[1], [0], [0], [1], [0, 0, 1, 1], [], []>} : vector<16x64xbf16>, vector<64x12xbf16>, vector<16x12xf32> -> vector<16x12xf32>
    %c0_169 = arith.constant 0 : index
    %c0_170 = arith.constant 0 : index
    %199 = vector.load %arg13[%c0_169, %c0_170] : memref<1x12xf32, #tpu.memory_space<vmem>>, vector<1x12xf32>
    %200 = vector.broadcast %199 : vector<1x12xf32> to vector<16x12xf32>
    %201 = arith.addf %198, %200 : vector<16x12xf32>
    %cst_171 = arith.constant 0.000000e+00 : f32
    %202 = vector.broadcast %cst_171 : f32 to vector<16x12xf32>
    %203 = arith.cmpf ogt, %201, %202 : vector<16x12xf32>
    %204 = vector.broadcast %194 : f32 to vector<16x12xf32>
    %205 = arith.mulf %204, %201 : vector<16x12xf32>
    %206 = arith.select %203, %201, %205 : vector<16x12xi1>, vector<16x12xf32>
    %cst_172 = arith.constant 0.000000e+00 : f32
    %207 = vector.broadcast %cst_172 : f32 to vector<16x12xf32>
    %c0_173 = arith.constant 0 : index
    %c0_174 = arith.constant 0 : index
    %208 = vector.load %arg26[%c0_173, %c0_174] : memref<48x12xf32, #tpu.memory_space<vmem>>, vector<16x12xf32>
    tpu.vector_store %arg26[%c0_173, %c0_174], %207 {strides = array<i32>} : memref<48x12xf32, #tpu.memory_space<vmem>>, vector<16x12xf32>,
    %cst_175 = arith.constant 0.000000e+00 : f32
    %209 = vector.broadcast %cst_175 : f32 to vector<16x12xf32>
    %c32_176 = arith.constant 32 : index
    %c0_177 = arith.constant 0 : index
    %210 = vector.load %arg26[%c32_176, %c0_177] : memref<48x12xf32, #tpu.memory_space<vmem>>, vector<16x12xf32>
    tpu.vector_store %arg26[%c32_176, %c0_177], %209 {strides = array<i32>} : memref<48x12xf32, #tpu.memory_space<vmem>>, vector<16x12xf32>,
    %c16_178 = arith.constant 16 : index
    %c0_179 = arith.constant 0 : index
    %211 = vector.load %arg26[%c16_178, %c0_179] : memref<48x12xf32, #tpu.memory_space<vmem>>, vector<16x12xf32>
    tpu.vector_store %arg26[%c16_178, %c0_179], %206 {strides = array<i32>} : memref<48x12xf32, #tpu.memory_space<vmem>>, vector<16x12xf32>,
    %cst_180 = arith.constant 0.000000e+00 : f32
    %212 = vector.broadcast %cst_180 : f32 to vector<16x64xf32>
    %c0_181 = arith.constant 0 : index
    %c0_182 = arith.constant 0 : index
    %213 = vector.load %arg26[%c0_181, %c0_182] : memref<48x12xf32, #tpu.memory_space<vmem>>, vector<16x12xf32>
    %214 = arith.truncf %213 : vector<16x12xf32> to vector<16x12xbf16>
    %c0_183 = arith.constant 0 : index
    %c0_184 = arith.constant 0 : index
    %c0_185 = arith.constant 0 : index
    %215 = vector.load %arg14[%c0_183, %c0_184, %c0_185] : memref<11x12x64xbf16, #tpu.memory_space<vmem>>, vector<1x12x64xbf16>
    %216 = vector.shape_cast %215 : vector<1x12x64xbf16> to vector<12x64xbf16>
    %cst_186 = arith.constant dense<0.000000e+00> : vector<16x64xf32>
    %217 = tpu.matmul %214, %216, %cst_186 {dimension_numbers = #tpu.dot_dimension_numbers<[1], [0], [0], [1], [0, 0, 1, 1], [], []>} : vector<16x12xbf16>, vector<12x64xbf16>, vector<16x64xf32> -> vector<16x64xf32>
    %218 = arith.addf %212, %217 : vector<16x64xf32>
    %c8_187 = arith.constant 8 : index
    %c0_188 = arith.constant 0 : index
    %219 = vector.load %arg26[%c8_187, %c0_188] : memref<48x12xf32, #tpu.memory_space<vmem>>, vector<16x12xf32>
    %220 = arith.truncf %219 : vector<16x12xf32> to vector<16x12xbf16>
    %c1_189 = arith.constant 1 : index
    %c0_190 = arith.constant 0 : index
    %c0_191 = arith.constant 0 : index
    %221 = vector.load %arg14[%c1_189, %c0_190, %c0_191] : memref<11x12x64xbf16, #tpu.memory_space<vmem>>, vector<1x12x64xbf16>
    %222 = vector.shape_cast %221 : vector<1x12x64xbf16> to vector<12x64xbf16>
    %cst_192 = arith.constant dense<0.000000e+00> : vector<16x64xf32>
    %223 = tpu.matmul %220, %222, %cst_192 {dimension_numbers = #tpu.dot_dimension_numbers<[1], [0], [0], [1], [0, 0, 1, 1], [], []>} : vector<16x12xbf16>, vector<12x64xbf16>, vector<16x64xf32> -> vector<16x64xf32>
    %224 = arith.addf %218, %223 : vector<16x64xf32>
    %c12_193 = arith.constant 12 : index
    %c0_194 = arith.constant 0 : index
    %225 = vector.load %arg26[%c12_193, %c0_194] : memref<48x12xf32, #tpu.memory_space<vmem>>, vector<16x12xf32>
    %226 = arith.truncf %225 : vector<16x12xf32> to vector<16x12xbf16>
    %c2_195 = arith.constant 2 : index
    %c0_196 = arith.constant 0 : index
    %c0_197 = arith.constant 0 : index
    %227 = vector.load %arg14[%c2_195, %c0_196, %c0_197] : memref<11x12x64xbf16, #tpu.memory_space<vmem>>, vector<1x12x64xbf16>
    %228 = vector.shape_cast %227 : vector<1x12x64xbf16> to vector<12x64xbf16>
    %cst_198 = arith.constant dense<0.000000e+00> : vector<16x64xf32>
    %229 = tpu.matmul %226, %228, %cst_198 {dimension_numbers = #tpu.dot_dimension_numbers<[1], [0], [0], [1], [0, 0, 1, 1], [], []>} : vector<16x12xbf16>, vector<12x64xbf16>, vector<16x64xf32> -> vector<16x64xf32>
    %230 = arith.addf %224, %229 : vector<16x64xf32>
    %c14_199 = arith.constant 14 : index
    %c0_200 = arith.constant 0 : index
    %231 = vector.load %arg26[%c14_199, %c0_200] : memref<48x12xf32, #tpu.memory_space<vmem>>, vector<16x12xf32>
    %232 = arith.truncf %231 : vector<16x12xf32> to vector<16x12xbf16>
    %c3_201 = arith.constant 3 : index
    %c0_202 = arith.constant 0 : index
    %c0_203 = arith.constant 0 : index
    %233 = vector.load %arg14[%c3_201, %c0_202, %c0_203] : memref<11x12x64xbf16, #tpu.memory_space<vmem>>, vector<1x12x64xbf16>
    %234 = vector.shape_cast %233 : vector<1x12x64xbf16> to vector<12x64xbf16>
    %cst_204 = arith.constant dense<0.000000e+00> : vector<16x64xf32>
    %235 = tpu.matmul %232, %234, %cst_204 {dimension_numbers = #tpu.dot_dimension_numbers<[1], [0], [0], [1], [0, 0, 1, 1], [], []>} : vector<16x12xbf16>, vector<12x64xbf16>, vector<16x64xf32> -> vector<16x64xf32>
    %236 = arith.addf %230, %235 : vector<16x64xf32>
    %c15_205 = arith.constant 15 : index
    %c0_206 = arith.constant 0 : index
    %237 = vector.load %arg26[%c15_205, %c0_206] : memref<48x12xf32, #tpu.memory_space<vmem>>, vector<16x12xf32>
    %238 = arith.truncf %237 : vector<16x12xf32> to vector<16x12xbf16>
    %c4_207 = arith.constant 4 : index
    %c0_208 = arith.constant 0 : index
    %c0_209 = arith.constant 0 : index
    %239 = vector.load %arg14[%c4_207, %c0_208, %c0_209] : memref<11x12x64xbf16, #tpu.memory_space<vmem>>, vector<1x12x64xbf16>
    %240 = vector.shape_cast %239 : vector<1x12x64xbf16> to vector<12x64xbf16>
    %cst_210 = arith.constant dense<0.000000e+00> : vector<16x64xf32>
    %241 = tpu.matmul %238, %240, %cst_210 {dimension_numbers = #tpu.dot_dimension_numbers<[1], [0], [0], [1], [0, 0, 1, 1], [], []>} : vector<16x12xbf16>, vector<12x64xbf16>, vector<16x64xf32> -> vector<16x64xf32>
    %242 = arith.addf %236, %241 : vector<16x64xf32>
    %c16_211 = arith.constant 16 : index
    %c0_212 = arith.constant 0 : index
    %243 = vector.load %arg26[%c16_211, %c0_212] : memref<48x12xf32, #tpu.memory_space<vmem>>, vector<16x12xf32>
    %244 = arith.truncf %243 : vector<16x12xf32> to vector<16x12xbf16>
    %c5_213 = arith.constant 5 : index
    %c0_214 = arith.constant 0 : index
    %c0_215 = arith.constant 0 : index
    %245 = vector.load %arg14[%c5_213, %c0_214, %c0_215] : memref<11x12x64xbf16, #tpu.memory_space<vmem>>, vector<1x12x64xbf16>
    %246 = vector.shape_cast %245 : vector<1x12x64xbf16> to vector<12x64xbf16>
    %cst_216 = arith.constant dense<0.000000e+00> : vector<16x64xf32>
    %247 = tpu.matmul %244, %246, %cst_216 {dimension_numbers = #tpu.dot_dimension_numbers<[1], [0], [0], [1], [0, 0, 1, 1], [], []>} : vector<16x12xbf16>, vector<12x64xbf16>, vector<16x64xf32> -> vector<16x64xf32>
    %248 = arith.addf %242, %247 : vector<16x64xf32>
    %c17_217 = arith.constant 17 : index
    %c0_218 = arith.constant 0 : index
    %249 = vector.load %arg26[%c17_217, %c0_218] : memref<48x12xf32, #tpu.memory_space<vmem>>, vector<16x12xf32>
    %250 = arith.truncf %249 : vector<16x12xf32> to vector<16x12xbf16>
    %c6_219 = arith.constant 6 : index
    %c0_220 = arith.constant 0 : index
    %c0_221 = arith.constant 0 : index
    %251 = vector.load %arg14[%c6_219, %c0_220, %c0_221] : memref<11x12x64xbf16, #tpu.memory_space<vmem>>, vector<1x12x64xbf16>
    %252 = vector.shape_cast %251 : vector<1x12x64xbf16> to vector<12x64xbf16>
    %cst_222 = arith.constant dense<0.000000e+00> : vector<16x64xf32>
    %253 = tpu.matmul %250, %252, %cst_222 {dimension_numbers = #tpu.dot_dimension_numbers<[1], [0], [0], [1], [0, 0, 1, 1], [], []>} : vector<16x12xbf16>, vector<12x64xbf16>, vector<16x64xf32> -> vector<16x64xf32>
    %254 = arith.addf %248, %253 : vector<16x64xf32>
    %c18_223 = arith.constant 18 : index
    %c0_224 = arith.constant 0 : index
    %255 = vector.load %arg26[%c18_223, %c0_224] : memref<48x12xf32, #tpu.memory_space<vmem>>, vector<16x12xf32>
    %256 = arith.truncf %255 : vector<16x12xf32> to vector<16x12xbf16>
    %c7_225 = arith.constant 7 : index
    %c0_226 = arith.constant 0 : index
    %c0_227 = arith.constant 0 : index
    %257 = vector.load %arg14[%c7_225, %c0_226, %c0_227] : memref<11x12x64xbf16, #tpu.memory_space<vmem>>, vector<1x12x64xbf16>
    %258 = vector.shape_cast %257 : vector<1x12x64xbf16> to vector<12x64xbf16>
    %cst_228 = arith.constant dense<0.000000e+00> : vector<16x64xf32>
    %259 = tpu.matmul %256, %258, %cst_228 {dimension_numbers = #tpu.dot_dimension_numbers<[1], [0], [0], [1], [0, 0, 1, 1], [], []>} : vector<16x12xbf16>, vector<12x64xbf16>, vector<16x64xf32> -> vector<16x64xf32>
    %260 = arith.addf %254, %259 : vector<16x64xf32>
    %c20_229 = arith.constant 20 : index
    %c0_230 = arith.constant 0 : index
    %261 = vector.load %arg26[%c20_229, %c0_230] : memref<48x12xf32, #tpu.memory_space<vmem>>, vector<16x12xf32>
    %262 = arith.truncf %261 : vector<16x12xf32> to vector<16x12xbf16>
    %c8_231 = arith.constant 8 : index
    %c0_232 = arith.constant 0 : index
    %c0_233 = arith.constant 0 : index
    %263 = vector.load %arg14[%c8_231, %c0_232, %c0_233] : memref<11x12x64xbf16, #tpu.memory_space<vmem>>, vector<1x12x64xbf16>
    %264 = vector.shape_cast %263 : vector<1x12x64xbf16> to vector<12x64xbf16>
    %cst_234 = arith.constant dense<0.000000e+00> : vector<16x64xf32>
    %265 = tpu.matmul %262, %264, %cst_234 {dimension_numbers = #tpu.dot_dimension_numbers<[1], [0], [0], [1], [0, 0, 1, 1], [], []>} : vector<16x12xbf16>, vector<12x64xbf16>, vector<16x64xf32> -> vector<16x64xf32>
    %266 = arith.addf %260, %265 : vector<16x64xf32>
    %c24_235 = arith.constant 24 : index
    %c0_236 = arith.constant 0 : index
    %267 = vector.load %arg26[%c24_235, %c0_236] : memref<48x12xf32, #tpu.memory_space<vmem>>, vector<16x12xf32>
    %268 = arith.truncf %267 : vector<16x12xf32> to vector<16x12xbf16>
    %c9_237 = arith.constant 9 : index
    %c0_238 = arith.constant 0 : index
    %c0_239 = arith.constant 0 : index
    %269 = vector.load %arg14[%c9_237, %c0_238, %c0_239] : memref<11x12x64xbf16, #tpu.memory_space<vmem>>, vector<1x12x64xbf16>
    %270 = vector.shape_cast %269 : vector<1x12x64xbf16> to vector<12x64xbf16>
    %cst_240 = arith.constant dense<0.000000e+00> : vector<16x64xf32>
    %271 = tpu.matmul %268, %270, %cst_240 {dimension_numbers = #tpu.dot_dimension_numbers<[1], [0], [0], [1], [0, 0, 1, 1], [], []>} : vector<16x12xbf16>, vector<12x64xbf16>, vector<16x64xf32> -> vector<16x64xf32>
    %272 = arith.addf %266, %271 : vector<16x64xf32>
    %c32_241 = arith.constant 32 : index
    %c0_242 = arith.constant 0 : index
    %273 = vector.load %arg26[%c32_241, %c0_242] : memref<48x12xf32, #tpu.memory_space<vmem>>, vector<16x12xf32>
    %274 = arith.truncf %273 : vector<16x12xf32> to vector<16x12xbf16>
    %c10_243 = arith.constant 10 : index
    %c0_244 = arith.constant 0 : index
    %c0_245 = arith.constant 0 : index
    %275 = vector.load %arg14[%c10_243, %c0_244, %c0_245] : memref<11x12x64xbf16, #tpu.memory_space<vmem>>, vector<1x12x64xbf16>
    %276 = vector.shape_cast %275 : vector<1x12x64xbf16> to vector<12x64xbf16>
    %cst_246 = arith.constant dense<0.000000e+00> : vector<16x64xf32>
    %277 = tpu.matmul %274, %276, %cst_246 {dimension_numbers = #tpu.dot_dimension_numbers<[1], [0], [0], [1], [0, 0, 1, 1], [], []>} : vector<16x12xbf16>, vector<12x64xbf16>, vector<16x64xf32> -> vector<16x64xf32>
    %278 = arith.addf %272, %277 : vector<16x64xf32>
    %279 = arith.addf %278, %193 : vector<16x64xf32>
    %c0_247 = arith.constant 0 : index
    %c0_248 = arith.constant 0 : index
    %280 = vector.load %arg15[%c0_247, %c0_248] : memref<1x64xf32, #tpu.memory_space<vmem>>, vector<1x64xf32>
    %281 = vector.broadcast %280 : vector<1x64xf32> to vector<16x64xf32>
    %282 = arith.mulf %279, %281 : vector<16x64xf32>
    %c0_249 = arith.constant 0 : index
    %c0_250 = arith.constant 0 : index
    %283 = vector.load %arg16[%c0_249, %c0_250] : memref<1x64xf32, #tpu.memory_space<vmem>>, vector<1x64xf32>
    %284 = vector.broadcast %283 : vector<1x64xf32> to vector<16x64xf32>
    %285 = arith.addf %282, %284 : vector<16x64xf32>
    %cst_251 = arith.constant 0.000000e+00 : f32
    %286 = vector.broadcast %cst_251 : f32 to vector<16x64xf32>
    %287 = arith.cmpf ogt, %285, %286 : vector<16x64xf32>
    %288 = vector.broadcast %195 : f32 to vector<16x64xf32>
    %289 = arith.mulf %288, %285 : vector<16x64xf32>
    %290 = arith.select %287, %285, %289 : vector<16x64xi1>, vector<16x64xf32>
    %c3_252 = arith.constant 3 : index
    %c0_253 = arith.constant 0 : index
    %291 = memref.load %arg22[%c3_252, %c0_253] : memref<4x2xf32, #tpu.memory_space<smem>>
    %c3_254 = arith.constant 3 : index
    %c1_255 = arith.constant 1 : index
    %292 = memref.load %arg22[%c3_254, %c1_255] : memref<4x2xf32, #tpu.memory_space<smem>>
    %293 = arith.truncf %290 : vector<16x64xf32> to vector<16x64xbf16>
    %c0_256 = arith.constant 0 : index
    %c0_257 = arith.constant 0 : index
    %294 = vector.load %arg17[%c0_256, %c0_257] : memref<64x25xbf16, #tpu.memory_space<vmem>>, vector<64x25xbf16>
    %cst_258 = arith.constant dense<0.000000e+00> : vector<16x25xf32>
    %295 = tpu.matmul %293, %294, %cst_258 {dimension_numbers = #tpu.dot_dimension_numbers<[1], [0], [0], [1], [0, 0, 1, 1], [], []>} : vector<16x64xbf16>, vector<64x25xbf16>, vector<16x25xf32> -> vector<16x25xf32>
    %c0_259 = arith.constant 0 : index
    %c0_260 = arith.constant 0 : index
    %296 = vector.load %arg18[%c0_259, %c0_260] : memref<1x25xf32, #tpu.memory_space<vmem>>, vector<1x25xf32>
    %297 = vector.broadcast %296 : vector<1x25xf32> to vector<16x25xf32>
    %298 = arith.addf %295, %297 : vector<16x25xf32>
    %cst_261 = arith.constant 0.000000e+00 : f32
    %299 = vector.broadcast %cst_261 : f32 to vector<16x25xf32>
    %300 = arith.cmpf ogt, %298, %299 : vector<16x25xf32>
    %301 = vector.broadcast %291 : f32 to vector<16x25xf32>
    %302 = arith.mulf %301, %298 : vector<16x25xf32>
    %303 = arith.select %300, %298, %302 : vector<16x25xi1>, vector<16x25xf32>
    %cst_262 = arith.constant 0.000000e+00 : f32
    %304 = vector.broadcast %cst_262 : f32 to vector<16x25xf32>
    %c0_263 = arith.constant 0 : index
    %c0_264 = arith.constant 0 : index
    %305 = vector.load %arg27[%c0_263, %c0_264] : memref<48x25xf32, #tpu.memory_space<vmem>>, vector<16x25xf32>
    tpu.vector_store %arg27[%c0_263, %c0_264], %304 {strides = array<i32>} : memref<48x25xf32, #tpu.memory_space<vmem>>, vector<16x25xf32>,
    %cst_265 = arith.constant 0.000000e+00 : f32
    %306 = vector.broadcast %cst_265 : f32 to vector<16x25xf32>
    %c32_266 = arith.constant 32 : index
    %c0_267 = arith.constant 0 : index
    %307 = vector.load %arg27[%c32_266, %c0_267] : memref<48x25xf32, #tpu.memory_space<vmem>>, vector<16x25xf32>
    tpu.vector_store %arg27[%c32_266, %c0_267], %306 {strides = array<i32>} : memref<48x25xf32, #tpu.memory_space<vmem>>, vector<16x25xf32>,
    %c16_268 = arith.constant 16 : index
    %c0_269 = arith.constant 0 : index
    %308 = vector.load %arg27[%c16_268, %c0_269] : memref<48x25xf32, #tpu.memory_space<vmem>>, vector<16x25xf32>
    tpu.vector_store %arg27[%c16_268, %c0_269], %303 {strides = array<i32>} : memref<48x25xf32, #tpu.memory_space<vmem>>, vector<16x25xf32>,
    %cst_270 = arith.constant 0.000000e+00 : f32
    %309 = vector.broadcast %cst_270 : f32 to vector<16x128xf32>
    %c0_271 = arith.constant 0 : index
    %c0_272 = arith.constant 0 : index
    %310 = vector.load %arg27[%c0_271, %c0_272] : memref<48x25xf32, #tpu.memory_space<vmem>>, vector<16x25xf32>
    %311 = arith.truncf %310 : vector<16x25xf32> to vector<16x25xbf16>
    %c0_273 = arith.constant 0 : index
    %c0_274 = arith.constant 0 : index
    %c0_275 = arith.constant 0 : index
    %312 = vector.load %arg19[%c0_273, %c0_274, %c0_275] : memref<11x25x128xbf16, #tpu.memory_space<vmem>>, vector<1x25x128xbf16>
    %313 = vector.shape_cast %312 : vector<1x25x128xbf16> to vector<25x128xbf16>
    %cst_276 = arith.constant dense<0.000000e+00> : vector<16x128xf32>
    %314 = tpu.matmul %311, %313, %cst_276 {dimension_numbers = #tpu.dot_dimension_numbers<[1], [0], [0], [1], [0, 0, 1, 1], [], []>} : vector<16x25xbf16>, vector<25x128xbf16>, vector<16x128xf32> -> vector<16x128xf32>
    %315 = arith.addf %309, %314 : vector<16x128xf32>
    %c8_277 = arith.constant 8 : index
    %c0_278 = arith.constant 0 : index
    %316 = vector.load %arg27[%c8_277, %c0_278] : memref<48x25xf32, #tpu.memory_space<vmem>>, vector<16x25xf32>
    %317 = arith.truncf %316 : vector<16x25xf32> to vector<16x25xbf16>
    %c1_279 = arith.constant 1 : index
    %c0_280 = arith.constant 0 : index
    %c0_281 = arith.constant 0 : index
    %318 = vector.load %arg19[%c1_279, %c0_280, %c0_281] : memref<11x25x128xbf16, #tpu.memory_space<vmem>>, vector<1x25x128xbf16>
    %319 = vector.shape_cast %318 : vector<1x25x128xbf16> to vector<25x128xbf16>
    %cst_282 = arith.constant dense<0.000000e+00> : vector<16x128xf32>
    %320 = tpu.matmul %317, %319, %cst_282 {dimension_numbers = #tpu.dot_dimension_numbers<[1], [0], [0], [1], [0, 0, 1, 1], [], []>} : vector<16x25xbf16>, vector<25x128xbf16>, vector<16x128xf32> -> vector<16x128xf32>
    %321 = arith.addf %315, %320 : vector<16x128xf32>
    %c12_283 = arith.constant 12 : index
    %c0_284 = arith.constant 0 : index
    %322 = vector.load %arg27[%c12_283, %c0_284] : memref<48x25xf32, #tpu.memory_space<vmem>>, vector<16x25xf32>
    %323 = arith.truncf %322 : vector<16x25xf32> to vector<16x25xbf16>
    %c2_285 = arith.constant 2 : index
    %c0_286 = arith.constant 0 : index
    %c0_287 = arith.constant 0 : index
    %324 = vector.load %arg19[%c2_285, %c0_286, %c0_287] : memref<11x25x128xbf16, #tpu.memory_space<vmem>>, vector<1x25x128xbf16>
    %325 = vector.shape_cast %324 : vector<1x25x128xbf16> to vector<25x128xbf16>
    %cst_288 = arith.constant dense<0.000000e+00> : vector<16x128xf32>
    %326 = tpu.matmul %323, %325, %cst_288 {dimension_numbers = #tpu.dot_dimension_numbers<[1], [0], [0], [1], [0, 0, 1, 1], [], []>} : vector<16x25xbf16>, vector<25x128xbf16>, vector<16x128xf32> -> vector<16x128xf32>
    %327 = arith.addf %321, %326 : vector<16x128xf32>
    %c14_289 = arith.constant 14 : index
    %c0_290 = arith.constant 0 : index
    %328 = vector.load %arg27[%c14_289, %c0_290] : memref<48x25xf32, #tpu.memory_space<vmem>>, vector<16x25xf32>
    %329 = arith.truncf %328 : vector<16x25xf32> to vector<16x25xbf16>
    %c3_291 = arith.constant 3 : index
    %c0_292 = arith.constant 0 : index
    %c0_293 = arith.constant 0 : index
    %330 = vector.load %arg19[%c3_291, %c0_292, %c0_293] : memref<11x25x128xbf16, #tpu.memory_space<vmem>>, vector<1x25x128xbf16>
    %331 = vector.shape_cast %330 : vector<1x25x128xbf16> to vector<25x128xbf16>
    %cst_294 = arith.constant dense<0.000000e+00> : vector<16x128xf32>
    %332 = tpu.matmul %329, %331, %cst_294 {dimension_numbers = #tpu.dot_dimension_numbers<[1], [0], [0], [1], [0, 0, 1, 1], [], []>} : vector<16x25xbf16>, vector<25x128xbf16>, vector<16x128xf32> -> vector<16x128xf32>
    %333 = arith.addf %327, %332 : vector<16x128xf32>
    %c15_295 = arith.constant 15 : index
    %c0_296 = arith.constant 0 : index
    %334 = vector.load %arg27[%c15_295, %c0_296] : memref<48x25xf32, #tpu.memory_space<vmem>>, vector<16x25xf32>
    %335 = arith.truncf %334 : vector<16x25xf32> to vector<16x25xbf16>
    %c4_297 = arith.constant 4 : index
    %c0_298 = arith.constant 0 : index
    %c0_299 = arith.constant 0 : index
    %336 = vector.load %arg19[%c4_297, %c0_298, %c0_299] : memref<11x25x128xbf16, #tpu.memory_space<vmem>>, vector<1x25x128xbf16>
    %337 = vector.shape_cast %336 : vector<1x25x128xbf16> to vector<25x128xbf16>
    %cst_300 = arith.constant dense<0.000000e+00> : vector<16x128xf32>
    %338 = tpu.matmul %335, %337, %cst_300 {dimension_numbers = #tpu.dot_dimension_numbers<[1], [0], [0], [1], [0, 0, 1, 1], [], []>} : vector<16x25xbf16>, vector<25x128xbf16>, vector<16x128xf32> -> vector<16x128xf32>
    %339 = arith.addf %333, %338 : vector<16x128xf32>
    %c16_301 = arith.constant 16 : index
    %c0_302 = arith.constant 0 : index
    %340 = vector.load %arg27[%c16_301, %c0_302] : memref<48x25xf32, #tpu.memory_space<vmem>>, vector<16x25xf32>
    %341 = arith.truncf %340 : vector<16x25xf32> to vector<16x25xbf16>
    %c5_303 = arith.constant 5 : index
    %c0_304 = arith.constant 0 : index
    %c0_305 = arith.constant 0 : index
    %342 = vector.load %arg19[%c5_303, %c0_304, %c0_305] : memref<11x25x128xbf16, #tpu.memory_space<vmem>>, vector<1x25x128xbf16>
    %343 = vector.shape_cast %342 : vector<1x25x128xbf16> to vector<25x128xbf16>
    %cst_306 = arith.constant dense<0.000000e+00> : vector<16x128xf32>
    %344 = tpu.matmul %341, %343, %cst_306 {dimension_numbers = #tpu.dot_dimension_numbers<[1], [0], [0], [1], [0, 0, 1, 1], [], []>} : vector<16x25xbf16>, vector<25x128xbf16>, vector<16x128xf32> -> vector<16x128xf32>
    %345 = arith.addf %339, %344 : vector<16x128xf32>
    %c17_307 = arith.constant 17 : index
    %c0_308 = arith.constant 0 : index
    %346 = vector.load %arg27[%c17_307, %c0_308] : memref<48x25xf32, #tpu.memory_space<vmem>>, vector<16x25xf32>
    %347 = arith.truncf %346 : vector<16x25xf32> to vector<16x25xbf16>
    %c6_309 = arith.constant 6 : index
    %c0_310 = arith.constant 0 : index
    %c0_311 = arith.constant 0 : index
    %348 = vector.load %arg19[%c6_309, %c0_310, %c0_311] : memref<11x25x128xbf16, #tpu.memory_space<vmem>>, vector<1x25x128xbf16>
    %349 = vector.shape_cast %348 : vector<1x25x128xbf16> to vector<25x128xbf16>
    %cst_312 = arith.constant dense<0.000000e+00> : vector<16x128xf32>
    %350 = tpu.matmul %347, %349, %cst_312 {dimension_numbers = #tpu.dot_dimension_numbers<[1], [0], [0], [1], [0, 0, 1, 1], [], []>} : vector<16x25xbf16>, vector<25x128xbf16>, vector<16x128xf32> -> vector<16x128xf32>
    %351 = arith.addf %345, %350 : vector<16x128xf32>
    %c18_313 = arith.constant 18 : index
    %c0_314 = arith.constant 0 : index
    %352 = vector.load %arg27[%c18_313, %c0_314] : memref<48x25xf32, #tpu.memory_space<vmem>>, vector<16x25xf32>
    %353 = arith.truncf %352 : vector<16x25xf32> to vector<16x25xbf16>
    %c7_315 = arith.constant 7 : index
    %c0_316 = arith.constant 0 : index
    %c0_317 = arith.constant 0 : index
    %354 = vector.load %arg19[%c7_315, %c0_316, %c0_317] : memref<11x25x128xbf16, #tpu.memory_space<vmem>>, vector<1x25x128xbf16>
    %355 = vector.shape_cast %354 : vector<1x25x128xbf16> to vector<25x128xbf16>
    %cst_318 = arith.constant dense<0.000000e+00> : vector<16x128xf32>
    %356 = tpu.matmul %353, %355, %cst_318 {dimension_numbers = #tpu.dot_dimension_numbers<[1], [0], [0], [1], [0, 0, 1, 1], [], []>} : vector<16x25xbf16>, vector<25x128xbf16>, vector<16x128xf32> -> vector<16x128xf32>
    %357 = arith.addf %351, %356 : vector<16x128xf32>
    %c20_319 = arith.constant 20 : index
    %c0_320 = arith.constant 0 : index
    %358 = vector.load %arg27[%c20_319, %c0_320] : memref<48x25xf32, #tpu.memory_space<vmem>>, vector<16x25xf32>
    %359 = arith.truncf %358 : vector<16x25xf32> to vector<16x25xbf16>
    %c8_321 = arith.constant 8 : index
    %c0_322 = arith.constant 0 : index
    %c0_323 = arith.constant 0 : index
    %360 = vector.load %arg19[%c8_321, %c0_322, %c0_323] : memref<11x25x128xbf16, #tpu.memory_space<vmem>>, vector<1x25x128xbf16>
    %361 = vector.shape_cast %360 : vector<1x25x128xbf16> to vector<25x128xbf16>
    %cst_324 = arith.constant dense<0.000000e+00> : vector<16x128xf32>
    %362 = tpu.matmul %359, %361, %cst_324 {dimension_numbers = #tpu.dot_dimension_numbers<[1], [0], [0], [1], [0, 0, 1, 1], [], []>} : vector<16x25xbf16>, vector<25x128xbf16>, vector<16x128xf32> -> vector<16x128xf32>
    %363 = arith.addf %357, %362 : vector<16x128xf32>
    %c24_325 = arith.constant 24 : index
    %c0_326 = arith.constant 0 : index
    %364 = vector.load %arg27[%c24_325, %c0_326] : memref<48x25xf32, #tpu.memory_space<vmem>>, vector<16x25xf32>
    %365 = arith.truncf %364 : vector<16x25xf32> to vector<16x25xbf16>
    %c9_327 = arith.constant 9 : index
    %c0_328 = arith.constant 0 : index
    %c0_329 = arith.constant 0 : index
    %366 = vector.load %arg19[%c9_327, %c0_328, %c0_329] : memref<11x25x128xbf16, #tpu.memory_space<vmem>>, vector<1x25x128xbf16>
    %367 = vector.shape_cast %366 : vector<1x25x128xbf16> to vector<25x128xbf16>
    %cst_330 = arith.constant dense<0.000000e+00> : vector<16x128xf32>
    %368 = tpu.matmul %365, %367, %cst_330 {dimension_numbers = #tpu.dot_dimension_numbers<[1], [0], [0], [1], [0, 0, 1, 1], [], []>} : vector<16x25xbf16>, vector<25x128xbf16>, vector<16x128xf32> -> vector<16x128xf32>
    %369 = arith.addf %363, %368 : vector<16x128xf32>
    %c32_331 = arith.constant 32 : index
    %c0_332 = arith.constant 0 : index
    %370 = vector.load %arg27[%c32_331, %c0_332] : memref<48x25xf32, #tpu.memory_space<vmem>>, vector<16x25xf32>
    %371 = arith.truncf %370 : vector<16x25xf32> to vector<16x25xbf16>
    %c10_333 = arith.constant 10 : index
    %c0_334 = arith.constant 0 : index
    %c0_335 = arith.constant 0 : index
    %372 = vector.load %arg19[%c10_333, %c0_334, %c0_335] : memref<11x25x128xbf16, #tpu.memory_space<vmem>>, vector<1x25x128xbf16>
    %373 = vector.shape_cast %372 : vector<1x25x128xbf16> to vector<25x128xbf16>
    %cst_336 = arith.constant dense<0.000000e+00> : vector<16x128xf32>
    %374 = tpu.matmul %371, %373, %cst_336 {dimension_numbers = #tpu.dot_dimension_numbers<[1], [0], [0], [1], [0, 0, 1, 1], [], []>} : vector<16x25xbf16>, vector<25x128xbf16>, vector<16x128xf32> -> vector<16x128xf32>
    %375 = arith.addf %369, %374 : vector<16x128xf32>
    %c0_337 = arith.constant 0 : index
    %c0_338 = arith.constant 0 : index
    %376 = vector.load %arg20[%c0_337, %c0_338] : memref<1x128xf32, #tpu.memory_space<vmem>>, vector<1x128xf32>
    %377 = vector.broadcast %376 : vector<1x128xf32> to vector<16x128xf32>
    %378 = arith.mulf %375, %377 : vector<16x128xf32>
    %c0_339 = arith.constant 0 : index
    %c0_340 = arith.constant 0 : index
    %379 = vector.load %arg21[%c0_339, %c0_340] : memref<1x128xf32, #tpu.memory_space<vmem>>, vector<1x128xf32>
    %380 = vector.broadcast %379 : vector<1x128xf32> to vector<16x128xf32>
    %381 = arith.addf %378, %380 : vector<16x128xf32>
    %cst_341 = arith.constant 0.000000e+00 : f32
    %382 = vector.broadcast %cst_341 : f32 to vector<16x128xf32>
    %383 = arith.cmpf ogt, %381, %382 : vector<16x128xf32>
    %384 = vector.broadcast %292 : f32 to vector<16x128xf32>
    %385 = arith.mulf %384, %381 : vector<16x128xf32>
    %386 = arith.select %383, %381, %385 : vector<16x128xi1>, vector<16x128xf32>
    %cst_342 = arith.constant dense<0xFF800000> : vector<128xf32>
    %387 = vector.multi_reduction <maximumf>, %386, %cst_342 [0] : vector<16x128xf32> to vector<128xf32>
    %388 = vector.shape_cast %387 : vector<128xf32> to vector<1x1x128xf32>
    %c0_343 = arith.constant 0 : index
    %c0_344 = arith.constant 0 : index
    %c0_345 = arith.constant 0 : index
    %389 = vector.load %arg23[%c0_343, %c0_344, %c0_345] : memref<1x1x128xf32, #tpu.memory_space<vmem>>, vector<1x1x128xf32>
    tpu.vector_store %arg23[%c0_343, %c0_344, %c0_345], %388 {strides = array<i32>} : memref<1x1x128xf32, #tpu.memory_space<vmem>>, vector<1x1x128xf32>,
    return
  }
  func.func @transform_0(%arg0: i32) -> (i32, i32, i32) {
    %c0_i32 = arith.constant 0 : i32
    %c0_i32_0 = arith.constant 0 : i32
    %c0_i32_1 = arith.constant 0 : i32
    return %arg0, %c0_i32, %c0_i32_0 : i32, i32, i32
  }
  func.func @transform_1(%arg0: i32) -> (i32, i32) {
    %c0_i32 = arith.constant 0 : i32
    %c0_i32_0 = arith.constant 0 : i32
    %c0_i32_1 = arith.constant 0 : i32
    return %c0_i32, %c0_i32_0 : i32, i32
  }
  func.func @transform_2(%arg0: i32) -> (i32, i32) {
    %c0_i32 = arith.constant 0 : i32
    %c0_i32_0 = arith.constant 0 : i32
    %c0_i32_1 = arith.constant 0 : i32
    return %c0_i32, %c0_i32_0 : i32, i32
  }
  func.func @transform_3(%arg0: i32) -> (i32, i32, i32) {
    %c0_i32 = arith.constant 0 : i32
    %c0_i32_0 = arith.constant 0 : i32
    %c0_i32_1 = arith.constant 0 : i32
    %c0_i32_2 = arith.constant 0 : i32
    return %c0_i32, %c0_i32_0, %c0_i32_1 : i32, i32, i32
  }
  func.func @transform_4(%arg0: i32) -> (i32, i32) {
    %c0_i32 = arith.constant 0 : i32
    %c0_i32_0 = arith.constant 0 : i32
    %c0_i32_1 = arith.constant 0 : i32
    return %c0_i32, %c0_i32_0 : i32, i32
  }
  func.func @transform_5(%arg0: i32) -> (i32, i32) {
    %c0_i32 = arith.constant 0 : i32
    %c0_i32_0 = arith.constant 0 : i32
    %c0_i32_1 = arith.constant 0 : i32
    return %c0_i32, %c0_i32_0 : i32, i32
  }
  func.func @transform_6(%arg0: i32) -> (i32, i32) {
    %c0_i32 = arith.constant 0 : i32
    %c0_i32_0 = arith.constant 0 : i32
    %c0_i32_1 = arith.constant 0 : i32
    return %c0_i32, %c0_i32_0 : i32, i32
  }
  func.func @transform_7(%arg0: i32) -> (i32, i32) {
    %c0_i32 = arith.constant 0 : i32
    %c0_i32_0 = arith.constant 0 : i32
    %c0_i32_1 = arith.constant 0 : i32
    return %c0_i32, %c0_i32_0 : i32, i32
  }
  func.func @transform_8(%arg0: i32) -> (i32, i32, i32) {
    %c0_i32 = arith.constant 0 : i32
    %c0_i32_0 = arith.constant 0 : i32
    %c0_i32_1 = arith.constant 0 : i32
    %c0_i32_2 = arith.constant 0 : i32
    return %c0_i32, %c0_i32_0, %c0_i32_1 : i32, i32, i32
  }
  func.func @transform_9(%arg0: i32) -> (i32, i32) {
    %c0_i32 = arith.constant 0 : i32
    %c0_i32_0 = arith.constant 0 : i32
    %c0_i32_1 = arith.constant 0 : i32
    return %c0_i32, %c0_i32_0 : i32, i32
  }
  func.func @transform_10(%arg0: i32) -> (i32, i32) {
    %c0_i32 = arith.constant 0 : i32
    %c0_i32_0 = arith.constant 0 : i32
    %c0_i32_1 = arith.constant 0 : i32
    return %c0_i32, %c0_i32_0 : i32, i32
  }
  func.func @transform_11(%arg0: i32) -> (i32, i32) {
    %c0_i32 = arith.constant 0 : i32
    %c0_i32_0 = arith.constant 0 : i32
    %c0_i32_1 = arith.constant 0 : i32
    return %c0_i32, %c0_i32_0 : i32, i32
  }
  func.func @transform_12(%arg0: i32) -> (i32, i32) {
    %c0_i32 = arith.constant 0 : i32
    %c0_i32_0 = arith.constant 0 : i32
    %c0_i32_1 = arith.constant 0 : i32
    return %c0_i32, %c0_i32_0 : i32, i32
  }
  func.func @transform_13(%arg0: i32) -> (i32, i32, i32) {
    %c0_i32 = arith.constant 0 : i32
    %c0_i32_0 = arith.constant 0 : i32
    %c0_i32_1 = arith.constant 0 : i32
    %c0_i32_2 = arith.constant 0 : i32
    return %c0_i32, %c0_i32_0, %c0_i32_1 : i32, i32, i32
  }
  func.func @transform_14(%arg0: i32) -> (i32, i32) {
    %c0_i32 = arith.constant 0 : i32
    %c0_i32_0 = arith.constant 0 : i32
    %c0_i32_1 = arith.constant 0 : i32
    return %c0_i32, %c0_i32_0 : i32, i32
  }
  func.func @transform_15(%arg0: i32) -> (i32, i32) {
    %c0_i32 = arith.constant 0 : i32
    %c0_i32_0 = arith.constant 0 : i32
    %c0_i32_1 = arith.constant 0 : i32
    return %c0_i32, %c0_i32_0 : i32, i32
  }
  func.func @transform_16(%arg0: i32) -> (i32, i32) {
    %c0_i32 = arith.constant 0 : i32
    %c0_i32_0 = arith.constant 0 : i32
    %c0_i32_1 = arith.constant 0 : i32
    return %c0_i32, %c0_i32_0 : i32, i32
  }
  func.func @transform_17(%arg0: i32) -> (i32, i32) {
    %c0_i32 = arith.constant 0 : i32
    %c0_i32_0 = arith.constant 0 : i32
    %c0_i32_1 = arith.constant 0 : i32
    return %c0_i32, %c0_i32_0 : i32, i32
  }
  func.func @transform_18(%arg0: i32) -> (i32, i32, i32) {
    %c0_i32 = arith.constant 0 : i32
    %c0_i32_0 = arith.constant 0 : i32
    %c0_i32_1 = arith.constant 0 : i32
    %c0_i32_2 = arith.constant 0 : i32
    return %c0_i32, %c0_i32_0, %c0_i32_1 : i32, i32, i32
  }
  func.func @transform_19(%arg0: i32) -> (i32, i32) {
    %c0_i32 = arith.constant 0 : i32
    %c0_i32_0 = arith.constant 0 : i32
    %c0_i32_1 = arith.constant 0 : i32
    return %c0_i32, %c0_i32_0 : i32, i32
  }
  func.func @transform_20(%arg0: i32) -> (i32, i32) {
    %c0_i32 = arith.constant 0 : i32
    %c0_i32_0 = arith.constant 0 : i32
    %c0_i32_1 = arith.constant 0 : i32
    return %c0_i32, %c0_i32_0 : i32, i32
  }
  func.func @transform_21(%arg0: i32) -> (i32, i32) {
    %c0_i32 = arith.constant 0 : i32
    %c0_i32_0 = arith.constant 0 : i32
    %c0_i32_1 = arith.constant 0 : i32
    return %c0_i32, %c0_i32_0 : i32, i32
  }
  func.func @transform_22(%arg0: i32) -> (i32, i32, i32) {
    %c0_i32 = arith.constant 0 : i32
    %c0_i32_0 = arith.constant 0 : i32
    %c0_i32_1 = arith.constant 0 : i32
    return %arg0, %c0_i32, %c0_i32_0 : i32, i32, i32
  }
}

module attributes {stable_mosaic.version = 11 : i64} {
  func.func @_cls_kernel(%arg0: memref<2x128xf32, #tpu.memory_space<vmem>>, %arg1: memref<2x128xf32, #tpu.memory_space<vmem>>, %arg2: memref<2x128xf32, #tpu.memory_space<vmem>>, %arg3: memref<384x128xbf16, #tpu.memory_space<vmem>>, %arg4: memref<1x128xf32, #tpu.memory_space<vmem>>, %arg5: memref<128x64xbf16, #tpu.memory_space<vmem>>, %arg6: memref<1x64xf32, #tpu.memory_space<vmem>>, %arg7: memref<1x64xf32, #tpu.memory_space<vmem>>, %arg8: memref<1x1xf32, #tpu.memory_space<vmem>>, %arg9: memref<3xf32, #tpu.memory_space<smem>>, %arg10: memref<2x1xf32, #tpu.memory_space<vmem>>) attributes {dimension_semantics = [], scalar_prefetch = 0 : i64, scratch_operands = 0 : i64, tpu.core_type = #tpu.core_type<tc>} {
    %c0 = arith.constant 0 : index
    %c0_0 = arith.constant 0 : index
    %0 = vector.load %arg0[%c0, %c0_0] : memref<2x128xf32, #tpu.memory_space<vmem>>, vector<2x128xf32>
    %c0_1 = arith.constant 0 : index
    %c0_2 = arith.constant 0 : index
    %1 = vector.load %arg1[%c0_1, %c0_2] : memref<2x128xf32, #tpu.memory_space<vmem>>, vector<2x128xf32>
    %c0_3 = arith.constant 0 : index
    %c0_4 = arith.constant 0 : index
    %2 = vector.load %arg2[%c0_3, %c0_4] : memref<2x128xf32, #tpu.memory_space<vmem>>, vector<2x128xf32>
    %3 = tpu.concatenate %0, %1, %2 in 1 : vector<2x128xf32>, vector<2x128xf32>, vector<2x128xf32> -> vector<2x384xf32>
    %4 = arith.truncf %3 : vector<2x384xf32> to vector<2x384xbf16>
    %c0_5 = arith.constant 0 : index
    %c0_6 = arith.constant 0 : index
    %5 = vector.load %arg3[%c0_5, %c0_6] : memref<384x128xbf16, #tpu.memory_space<vmem>>, vector<384x128xbf16>
    %cst = arith.constant dense<0.000000e+00> : vector<2x128xf32>
    %6 = tpu.matmul %4, %5, %cst {dimension_numbers = #tpu.dot_dimension_numbers<[1], [0], [0], [1], [0, 0, 1, 1], [], []>} : vector<2x384xbf16>, vector<384x128xbf16>, vector<2x128xf32> -> vector<2x128xf32>
    %c0_7 = arith.constant 0 : index
    %c0_8 = arith.constant 0 : index
    %7 = vector.load %arg4[%c0_7, %c0_8] : memref<1x128xf32, #tpu.memory_space<vmem>>, vector<1x128xf32>
    %8 = vector.broadcast %7 : vector<1x128xf32> to vector<2x128xf32>
    %9 = arith.addf %6, %8 : vector<2x128xf32>
    %cst_9 = arith.constant 0.000000e+00 : f32
    %10 = vector.broadcast %cst_9 : f32 to vector<2x128xf32>
    %11 = arith.cmpf ogt, %9, %10 : vector<2x128xf32>
    %c0_10 = arith.constant 0 : index
    %12 = memref.load %arg9[%c0_10] : memref<3xf32, #tpu.memory_space<smem>>
    %13 = vector.broadcast %12 : f32 to vector<2x128xf32>
    %14 = arith.mulf %13, %9 : vector<2x128xf32>
    %15 = arith.select %11, %9, %14 : vector<2x128xi1>, vector<2x128xf32>
    %16 = arith.truncf %15 : vector<2x128xf32> to vector<2x128xbf16>
    %c0_11 = arith.constant 0 : index
    %c0_12 = arith.constant 0 : index
    %17 = vector.load %arg5[%c0_11, %c0_12] : memref<128x64xbf16, #tpu.memory_space<vmem>>, vector<128x64xbf16>
    %cst_13 = arith.constant dense<0.000000e+00> : vector<2x64xf32>
    %18 = tpu.matmul %16, %17, %cst_13 {dimension_numbers = #tpu.dot_dimension_numbers<[1], [0], [0], [1], [0, 0, 1, 1], [], []>} : vector<2x128xbf16>, vector<128x64xbf16>, vector<2x64xf32> -> vector<2x64xf32>
    %c0_14 = arith.constant 0 : index
    %c0_15 = arith.constant 0 : index
    %19 = vector.load %arg6[%c0_14, %c0_15] : memref<1x64xf32, #tpu.memory_space<vmem>>, vector<1x64xf32>
    %20 = vector.broadcast %19 : vector<1x64xf32> to vector<2x64xf32>
    %21 = arith.addf %18, %20 : vector<2x64xf32>
    %cst_16 = arith.constant 0.000000e+00 : f32
    %22 = vector.broadcast %cst_16 : f32 to vector<2x64xf32>
    %23 = arith.cmpf ogt, %21, %22 : vector<2x64xf32>
    %c1 = arith.constant 1 : index
    %24 = memref.load %arg9[%c1] : memref<3xf32, #tpu.memory_space<smem>>
    %25 = vector.broadcast %24 : f32 to vector<2x64xf32>
    %26 = arith.mulf %25, %21 : vector<2x64xf32>
    %27 = arith.select %23, %21, %26 : vector<2x64xi1>, vector<2x64xf32>
    %c0_17 = arith.constant 0 : index
    %c0_18 = arith.constant 0 : index
    %28 = vector.load %arg7[%c0_17, %c0_18] : memref<1x64xf32, #tpu.memory_space<vmem>>, vector<1x64xf32>
    %29 = vector.broadcast %28 : vector<1x64xf32> to vector<2x64xf32>
    %30 = arith.mulf %27, %29 : vector<2x64xf32>
    %cst_19 = arith.constant dense<0.000000e+00> : vector<2xf32>
    %31 = vector.multi_reduction <add>, %30, %cst_19 [1] : vector<2x64xf32> to vector<2xf32>
    %32 = vector.shape_cast %31 : vector<2xf32> to vector<2x1xf32>
    %c0_20 = arith.constant 0 : index
    %c0_21 = arith.constant 0 : index
    %33 = vector.load %arg8[%c0_20, %c0_21] : memref<1x1xf32, #tpu.memory_space<vmem>>, vector<1x1xf32>
    %34 = vector.broadcast %33 : vector<1x1xf32> to vector<2x1xf32>
    %35 = arith.addf %32, %34 : vector<2x1xf32>
    %cst_22 = arith.constant 0.000000e+00 : f32
    %36 = vector.broadcast %cst_22 : f32 to vector<2x1xf32>
    %37 = arith.cmpf ogt, %35, %36 : vector<2x1xf32>
    %c2 = arith.constant 2 : index
    %38 = memref.load %arg9[%c2] : memref<3xf32, #tpu.memory_space<smem>>
    %39 = vector.broadcast %38 : f32 to vector<2x1xf32>
    %40 = arith.mulf %39, %35 : vector<2x1xf32>
    %41 = arith.select %37, %35, %40 : vector<2x1xi1>, vector<2x1xf32>
    %c0_23 = arith.constant 0 : index
    %c0_24 = arith.constant 0 : index
    %42 = vector.load %arg10[%c0_23, %c0_24] : memref<2x1xf32, #tpu.memory_space<vmem>>, vector<2x1xf32>
    tpu.vector_store %arg10[%c0_23, %c0_24], %41 {strides = array<i32>} : memref<2x1xf32, #tpu.memory_space<vmem>>, vector<2x1xf32>,
    return
  }
}

</mosaic_0001>

<bundles_post_ra>
// kernel: _lambda_.7
= control target key start
LH: loop header
LB: loop body
LE: loop exit
PB: predicated region body
PF: predicated region fallthrough
CT: control target
= control target key end

     0   :  { %s773_s0 = inlined_call_operand.vmem [shape: f32[2,128], index: 0, kind: input, shape index: {}]   ;;  %s774_s1 = inlined_call_operand.vmem [shape: f32[2,128], index: 1, kind: input, shape index: {}]   ;;  %s775_s2 = inlined_call_operand.vmem [shape: f32[2,128], index: 2, kind: input, shape index: {}]   ;;  %s776_s3 = inlined_call_operand.hbm [shape: bf16[384,128], index: 3, kind: input, shape index: {}]   ;;  %s777_s4 = inlined_call_operand.vmem [shape: f32[1,128], index: 4, kind: input, shape index: {}]   ;;  %s778_s5 = inlined_call_operand.hbm [shape: bf16[128,64], index: 5, kind: input, shape index: {}]   ;;  %s779_s6 = inlined_call_operand.vmem [shape: f32[1,64], index: 6, kind: input, shape index: {}]   ;;  %s780_s7 = inlined_call_operand.vmem [shape: f32[1,64], index: 7, kind: input, shape index: {}]   ;;  %s781_s8 = inlined_call_operand.<no memory space> [shape: f32[1,1], index: 8, kind: input, shape index: {}]   ;;  %s782_s9 = inlined_call_operand.vmem [shape: f32[3], index: 9, kind: input, shape index: {}]   ;;  %s783_s10 = inlined_call_operand.vmem [shape: f32[2,1], index: 10, kind: output, shape index: {}]  }
   0x1   :  { %v15_v0 = vstv %s781_s8 }
   0x2   :  { %16 = vst [vmem:[#allocation2] sm:$0x1] %v15_v0 }
   0x3   :  { %17 = vsyncpa [#allocation4], 0 }
   0x4   :  { %18 = vsyncpa [#allocation7], 0  ;;  %s30_s17 = sshll.u32 %s776_s3, 4  ;;  %s31_s17 = int_to_ptr.hbm [resolvable:$true] %s30_s17 }
   0x5   :  { %19 = vsyncpa [#allocation5], 0  ;;  %s680_s18 = smov [#allocation3]   ;;  %s45_s22 = sshll.u32 %s778_s5, 4  ;;  %s46_s22 = int_to_ptr.hbm [resolvable:$true] %s45_s22 }
   0x6   :  { %s32_s19 = sshll.u32 %s680_s18, 4  ;;  %s681_s23 = smov 64   ;;  %s33_s19 = int_to_ptr.vmem [resolvable:$true] %s32_s19 }
   0x7   :  { %s682_s24 = smov 4   ;;  %s683_s8 = smov [#allocation6]  }
   0x8   :  { %38 = dma.hbm_to_vmem [thread:$0]  %s31_s17, 3072, %s33_s19, [#allocation4], %s681_s23, %s681_s23, %s682_s24  }
   0x9   :  { %s47_s25 = sshll.u32 %s683_s8, 4  ;;  %s65_s28 = sshll.u32 %s782_s9, 4  ;;  %s48_s25 = int_to_ptr.vmem [resolvable:$true] %s47_s25  ;;  %s66_s28 = int_to_ptr.vmem [resolvable:$true] %s65_s28 }
   0xa   :  { %53 = dma.hbm_to_vmem [thread:$0]  %s46_s22, 1024, %s48_s25, [#allocation7], %s681_s23, %s681_s23, %s682_s24  }
   0xb   :  { %s684_s3 = smov [#allocation8]  }
   0xc   :  { %68 = dma.vmem_to_smem %s66_s28, 16, %s684_s3, [#allocation5]  }
   0xd   :  { %674 = dma.done.wait [#allocation4], 3072  }
   0xe   :  { %675 = vsyncadd [#allocation4], 4294964224 }
   0xf   :  { %676 = dma.done.wait [#allocation7], 1024  }
  0x10   :  { %677 = vsyncadd [#allocation7], 4294966272 }
  0x11   :  { %678 = dma.done.wait [#allocation5], 16  }
  0x12   :  { %679 = vsyncadd [#allocation5], 4294967280 }
  0x13   :  { %81 = sfence }
  0x14   :  { %v580_v1 = vld [vmem:[#allocation3 + $0x38] sm:$0xff]  ;;  %v579_v4 = vld [vmem:[#allocation3 + $0x30] sm:$0xff]  ;;  %v578_v7 = vld [vmem:[#allocation3 + $0x28] sm:$0xff]  ;;  %s571_s13 = sld [smem:[#allocation8 + $0x1]]  ;;  %vm420_vm2 = vcmask 517120   ;;  %vm434_vm4 = vcmask 1024  }
  0x15   :  { %v588_v2 = vld [vmem:[#allocation3 + $0x78] sm:$0xff]  ;;  %284 = vmatpush.bf16.msra.mxu0 %v580_v1  ;;  %v587_v5 = vld [vmem:[#allocation3 + $0x70] sm:$0xff]  ;;  %v586_v8 = vld [vmem:[#allocation3 + $0x68] sm:$0xff]  ;;  %s572_s17 = sld [smem:[#allocation8 + $0x2]] }
  0x16   :  { %v596_v3 = vld [vmem:[#allocation3 + $0xb8] sm:$0xff]  ;;  %297 = vmatpush.bf16.msra.mxu1 %v588_v2  ;;  %v595_v6 = vld [vmem:[#allocation3 + $0xb0] sm:$0xff]  ;;  %v594_v9 = vld [vmem:[#allocation3 + $0xa8] sm:$0xff] }
  0x17   :  { %310 = vmatpush.bf16.msra.mxu2 %v596_v3  ;;  %v577_v10 = vld [vmem:[#allocation3 + $0x20] sm:$0xff]  ;;  %v604_v11 = vld [vmem:[#allocation6 + $0x38] sm:$0xff]  ;;  %v603_v14 = vld [vmem:[#allocation6 + $0x30] sm:$0xff] }
  0x18   :  { %v585_v12 = vld [vmem:[#allocation3 + $0x60] sm:$0xff]  ;;  %397 = vmatpush.bf16.msra.mxu3 %v604_v11  ;;  %v576_v15 = vld [vmem:[#allocation3 + $0x18] sm:$0xff]  ;;  %v602_v18 = vld [vmem:[#allocation6 + $0x28] sm:$0xff] }
  0x19   :  { %285 = vmatpush.bf16.msra.mxu0 %v579_v4  ;;  %v593_v13 = vld [vmem:[#allocation3 + $0xa0] sm:$0xff]  ;;  %v584_v16 = vld [vmem:[#allocation3 + $0x58] sm:$0xff]  ;;  %v575_v19 = vld [vmem:[#allocation3 + $0x10] sm:$0xff] }
  0x1a   :  { %298 = vmatpush.bf16.msra.mxu1 %v587_v5  ;;  %v592_v17 = vld [vmem:[#allocation3 + $0x98] sm:$0xff]  ;;  %v583_v20 = vld [vmem:[#allocation3 + $0x50] sm:$0xff]  ;;  %v601_v22 = vld [vmem:[#allocation6 + $0x20] sm:$0xff]  ;;  %v412_v55 = vstv %s571_s13 }
  0x1b   :  { %311 = vmatpush.bf16.msra.mxu2 %v595_v6  ;;  %v591_v21 = vld [vmem:[#allocation3 + $0x90] sm:$0xff]  ;;  %v574_v23 = vld [vmem:[#allocation3 + $0x8] sm:$0xff]  ;;  %v600_v26 = vld [vmem:[#allocation6 + $0x18] sm:$0xff]  ;;  %v431_v1 = vstv %s572_s17 }
  0x1c   :  { %398 = vmatpush.bf16.msra.mxu3 %v603_v14  ;;  %v582_v24 = vld [vmem:[#allocation3 + $0x48] sm:$0xff]  ;;  %v573_v27 = vld [vmem:[#allocation3] sm:$0xff]  ;;  %v599_v36 = vld [vmem:[#allocation6 + $0x10] sm:$0xff] }
  0x1d   :  { %286 = vmatpush.bf16.msra.mxu0 %v578_v7  ;;  %v590_v25 = vld [vmem:[#allocation3 + $0x88] sm:$0xff]  ;;  %v581_v28 = vld [vmem:[#allocation3 + $0x40] sm:$0xff]  ;;  %v610_v39 = vld [vmem:[%s777_s4] ss:$0 sm:$0xff] }
  0x1e   :  { %299 = vmatpush.bf16.msra.mxu1 %v586_v8  ;;  %v82_v29 = vld [vmem:[%s773_s0] sm:$0x3]  ;;  %v598_v37 = vld [vmem:[#allocation6 + $0x8] sm:$0xff] }
  0x1f   :  { %312 = vmatpush.bf16.msra.mxu2 %v594_v9  ;;  %v83_v30 = vld [vmem:[%s774_s1] sm:$0x3]  ;;  %v85_v33 = vpack.c.bf16 %v82_v29, %v82_v29 }
  0x20   :  { %399 = vmatpush.bf16.msra.mxu3 %v602_v18  ;;  %v589_v31 = vld [vmem:[#allocation3 + $0x80] sm:$0xff]  ;;  %v86_v34 = vpack.c.bf16 %v83_v30, %v83_v30  ;;  %v611_v53 = vld [vmem:[%s779_s6] ss:$0 sm:$0xff] }
  0x21   :  { %287 = vmatpush.bf16.msra.mxu0 %v577_v10  ;;  %v84_v32 = vld [vmem:[%s775_s2] sm:$0x3]  ;;  %s324_s2 = sld [smem:[#allocation8]] }
  0x22   :  { %300 = vmatpush.bf16.msra.mxu1 %v585_v12  ;;  %v87_v35 = vpack.c.bf16 %v84_v32, %v84_v32  ;;  %v597_v38 = vld [vmem:[#allocation6] sm:$0xff]  ;;  %v612_v57 = vld [vmem:[%s780_s7] ss:$0 sm:$0xff] }
  0x23   :  { %313 = vmatpush.bf16.msra.mxu2 %v593_v13  ;;  %v613_v63 = vld [vmem:[#allocation2] ss:$0 sm:$0xff] }
  0x24   :  { %400 = vmatpush.bf16.msra.mxu3 %v601_v22 }
  0x25   :  { %288 = vmatpush.bf16.msra.mxu0 %v576_v15 }
  0x26   :  { %301 = vmatpush.bf16.msra.mxu1 %v584_v16 }
  0x27   :  { %314 = vmatpush.bf16.msra.mxu2 %v592_v17  ;;  %v325_v45 = vstv %s324_s2 }
  0x28   :  { %401 = vmatpush.bf16.msra.mxu3 %v600_v26 }
  0x29   :  { %289 = vmatpush.bf16.msra.mxu0 %v575_v19 }
  0x2a   :  { %302 = vmatpush.bf16.msra.mxu1 %v583_v20 }
  0x2b   :  { %315 = vmatpush.bf16.msra.mxu2 %v591_v21 }
  0x2c   :  { %402 = vmatpush.bf16.msra.mxu3 %v599_v36 }
  0x2d   :  { %290 = vmatpush.bf16.msra.mxu0 %v574_v23 }
  0x2e   :  { %303 = vmatpush.bf16.msra.mxu1 %v582_v24 }
  0x2f   :  { %316 = vmatpush.bf16.msra.mxu2 %v590_v25 }
  0x30   :  { %403 = vmatpush.bf16.msra.mxu3 %v598_v37 }
  0x31   :  { %291 = vmatpush.bf16.msra.mxu0 %v573_v27 }
  0x32   :  { %304 = vmatpush.bf16.msra.mxu1 %v581_v28 }
  0x33   :  { %317 = vmatpush.bf16.msra.mxu2 %v589_v31 }
  0x34   :  { %292 = vmatmul.bf16.vlgmr.msra.gmra.mxu0 %v85_v33  ;;  %404 = vmatpush.bf16.msra.mxu3 %v597_v38 }
  0x35   :  { %305 = vmatmul.bf16.vlgmr.msra.gmra.mxu1 %v86_v34 }
  0x36   :  { %318 = vmatmul.bf16.vlgmr.msra.gmra.mxu2 %v87_v35 }
  0xb1   :  { %v293_v40 = vpop.f32.mrf.mxu0 }
  0xb2   :  { %v306_v41 = vpop.f32.mrf.mxu1  ;;  %v294_v42 = vadd.f32 %v610_v39, %v293_v40 }
  0xb4   :  { %v307_v43 = vadd.f32 %v306_v41, %v294_v42 }
  0xb9   :  { %v319_v44 = vpop.f32.mrf.mxu2  ;;  %v295_v47 = vpop.f32.mrf.mxu0 }
  0xba   :  { %v320_v46 = vadd.f32 %v319_v44, %v307_v43  ;;  %v308_v48 = vpop.f32.mrf.mxu1 }
  0xbc   :  { %v326_v49 = vmul.f32 %v325_v45, %v320_v46  ;;  %vm323_vm0 = vcmp.gt.f32.partialorder %v320_v46, 0.0 }
  0xbe   :  { %v327_v50 = vsel %vm323_vm0, %v320_v46, %v326_v49 }
  0xbf   :  { %v328_v51 = vpack.c.bf16 %v327_v50, %v327_v50 }
  0xc1   :  { %v321_v52 = vpop.f32.mrf.mxu2  ;;  %405 = vmatmul.bf16.vlgmr.msra.gmra.mxu3 %v328_v51 }
 0x144   :  { %v406_v54 = vpop.f32.mrf.mxu3 }
 0x145   :  { %v407_v56 = vadd.f32 %v611_v53, %v406_v54 }
 0x147   :  { %v413_v58 = vmul.f32 %v412_v55, %v407_v56  ;;  %vm410_vm1 = vcmp.gt.f32.partialorder %v407_v56, 0.0 }
 0x149   :  { %v414_v59 = vsel %vm410_vm1, %v407_v56, %v413_v58 }
 0x14a   :  { %v419_v60 = vmul.f32 %v612_v57, %v414_v59 }
 0x14c   :  { %v408_v61 = vpop.f32.mrf.mxu3  ;;  %v421_v62 = vsel %vm420_vm2, %v419_v60, 0.0 }
 0x14d   :  { %422 = vadd.xlane.f32.xlu0 %v421_v62 }
 0x1c0   :  { %v423_v0 = vpop.xlane.xlu0 %422 }
 0x1c1   :  { %v428_v2 = vadd.f32 %v613_v63, %v423_v0 }
 0x1c3   :  { %vm429_vm3 = vcmp.gt.f32.partialorder %v428_v2, 0.0  ;;  %v432_v3 = vmul.f32 %v431_v1, %v428_v2 }
 0x1c5   :  { %v433_v4 = vsel %vm429_vm3, %v428_v2, %v432_v3 }
 0x1c6   :  { %435 = vst.msk [vmem:[%s783_s10] sm:$0x3] %vm434_vm4, %v433_v4 }
 0x1c7   :  { %440 = vsyncpa [#allocation4], 1 }
 0x1c8   :  { %441 = vsyncpa [#allocation7], 1 }
 0x1c9   :  { %442 = vsyncpa [#allocation5], 1 }

// kernel: _lambda_.5
= control target key start
LH: loop header
LB: loop body
LE: loop exit
PB: predicated region body
PF: predicated region fallthrough
CT: control target
= control target key end

     0   :  { %s1802_s0 = inlined_call_operand.hbm [shape: f32[2,16,33], index: 0, kind: input, shape index: {}]   ;;  %s1803_s1 = inlined_call_operand.hbm [shape: bf16[3,33,32], index: 1, kind: input, shape index: {}]   ;;  %s1804_s2 = inlined_call_operand.hbm [shape: f32[1,32], index: 2, kind: input, shape index: {}]   ;;  %s1805_s3 = inlined_call_operand.hbm [shape: bf16[3,32,64], index: 3, kind: input, shape index: {}]   ;;  %s1806_s4 = inlined_call_operand.hbm [shape: f32[1,64], index: 4, kind: input, shape index: {}]   ;;  %s1807_s5 = inlined_call_operand.hbm [shape: bf16[3,64,128], index: 5, kind: input, shape index: {}]   ;;  %s1808_s6 = inlined_call_operand.hbm [shape: f32[1,128], index: 6, kind: input, shape index: {}]   ;;  %s1809_s7 = inlined_call_operand.hbm [shape: f32[3], index: 7, kind: input, shape index: {}]   ;;  %s1810_s8 = inlined_call_operand.vmem [shape: f32[2,1,128], index: 8, kind: output, shape index: {}]  }
   0x1   :  { %1811 = sst [smem:[#allocation20_spill]] %s1803_s1 }
   0x2   :  { %13 = vsyncpa [#allocation3], 0 }
   0x3   :  { %15 = vsyncpa [#allocation3 + $0x1], 0 }
   0x4   :  { %16 = vsyncpa [#allocation6], 0 }
   0x5   :  { %17 = vsyncpa [#allocation9], 0 }
   0x6   :  { %18 = vsyncpa [#allocation12], 0 }
   0x7   :  { %19 = vsyncpa [#allocation4], 0  ;;  %s1648_s27 = smov 0   ;;  %s1650_s28 = smov 0  }
   0x8   :  { %s1652_s29 = smov 0   ;;  %s1654_s30 = smov 0  }
   0x9 LB: > { %s1812_s1 = sld [smem:[#allocation20_spill]]  ;;  %s1672_s12 = sadd.s32 4294967295, %s1589_s30   ;;  %s1589_s30 = sphi %s1654_s30, %s1820_s30   ;;  %s1585_s29 = sphi %s1652_s29, %s1819_s29   ;;  %s1581_s28 = sphi %s1650_s28, %s1818_s28   ;;  %s1577_s27 = sphi %s1648_s27, %s1817_s27  }
   0xa   : > { %p1041_p0 = scmp.ge.s32.totalorder %s1589_s30, 1  ;;  %p46_p1 = scmp.eq.s32.totalorder %s1672_s12, 0 }
   0xb   : > { %p229_p2 = scmp.lt.s32.totalorder %s1589_s30, 3  ;;  %s1591_s14 = smov [#allocation5]  }
   0xc   : > { %s242_s15 = sshll.u32 %s1591_s14, 4  ;;  %s266_s18 = sshll.u32 %s1805_s3, 4  ;;  %s243_s15 = int_to_ptr.vmem [resolvable:$true] %s242_s15  ;;  %s267_s18 = int_to_ptr.hbm [resolvable:$true] %s266_s18 }
   0xd   : > { %p1677_p3 = pnand %p1041_p0, %p229_p2  ;;  %s292_s22 = sshll.u32 %s1807_s5, 4  ;;  %s293_s22 = int_to_ptr.hbm [resolvable:$true] %s292_s22 }
   0xe   : > { %s1592_s23 = smov [#allocation8]   ;;  %s1593_s25 = smov 64  }
   0xf   : > { %s240_s11 = sshll.u32 %s1812_s1, 4  ;;  %p1226_p4 = pneg %p1677_p3  ;;  %s241_s11 = int_to_ptr.hbm [resolvable:$true] %s240_s11 }
  0x10   : > { %s268_s24 = sshll.u32 %s1592_s23, 4  ;;  %s1594_s26 = smov 4   ;;  %s269_s24 = int_to_ptr.vmem [resolvable:$true] %s268_s24 }
  0x11   : > { %p1688_p5 = pnand %p1226_p4, %p46_p1  ;;  %s255_s14 = sshll.u32 %s1804_s2, 4  ;;  %s256_s14 = int_to_ptr.hbm [resolvable:$true] %s255_s14 }
  0x12   : > { %s1595_s16 = smov [#allocation11]   ;;  %s1596_s20 = smov [#allocation7]  }
  0x13   : > { %1229 = dma.hbm_to_vmem [thread:$0]  (!%p1688_p5), %s241_s11, 960, %s243_s15, [#allocation6], %s1593_s25, %s1593_s25, %s1594_s26  }
  0x14   : > { %1235 = dma.hbm_to_vmem [thread:$0]  (!%p1688_p5), %s267_s18, 768, %s269_s24, [#allocation9], %s1593_s25, %s1593_s25, %s1594_s26  }
  0x15   : > { %s294_s17 = sshll.u32 %s1595_s16, 4  ;;  %s257_s21 = sshll.u32 %s1596_s20, 4  ;;  %s295_s17 = int_to_ptr.vmem [resolvable:$true] %s294_s17  ;;  %s258_s21 = int_to_ptr.vmem [resolvable:$true] %s257_s21 }
  0x16   : > { %1241 = dma.hbm_to_vmem [thread:$0]  (!%p1688_p5), %s293_s22, 1536, %s295_s17, [#allocation12], %s1593_s25, %s1593_s25, %s1594_s26  }
  0x17   : > { %s281_s11 = sshll.u32 %s1806_s4, 4  ;;  %s307_s24 = sshll.u32 %s1808_s6, 4  ;;  %s282_s11 = int_to_ptr.hbm [resolvable:$true] %s281_s11  ;;  %s308_s24 = int_to_ptr.hbm [resolvable:$true] %s307_s24 }
  0x18   : > { %1232 = dma.hbm_to_vmem [thread:$0]  (!%p1688_p5), %s256_s14, 16, %s258_s21, [#allocation6]  }
  0x19   : > { %s1597_s22 = smov [#allocation10]   ;;  %s1598_s1 = smov [#allocation13]  }
  0x1a   : > { %s283_s25 = sshll.u32 %s1597_s22, 4  ;;  %s309_s26 = sshll.u32 %s1598_s1, 4  ;;  %s284_s25 = int_to_ptr.vmem [resolvable:$true] %s283_s25  ;;  %s310_s26 = int_to_ptr.vmem [resolvable:$true] %s309_s26 }
  0x1b   : > { %1238 = dma.hbm_to_vmem [thread:$0]  (!%p1688_p5), %s282_s11, 16, %s284_s25, [#allocation9]  }
  0x1c   : > { %s319_s14 = sshll.u32 %s1809_s7, 4  ;;  %s1599_s16 = smov [#allocation14]   ;;  %s320_s14 = int_to_ptr.hbm [resolvable:$true] %s319_s14 }
  0x1d   : > { %1244 = dma.hbm_to_vmem [thread:$0]  (!%p1688_p5), %s308_s24, 16, %s310_s26, [#allocation12]  }
  0x1e   : > { %1247 = dma.hbm_to_smem (!%p1688_p5), %s320_s14, 16, %s1599_s16, [#allocation4]  }
  0x1f   : > { %s1722_s17 = sadd.s32 1, %s1589_s30   ;;  %s32_s21 = sadd.s32 1, %s1585_s29 }
  0x20   : > { %s29_s20 = ssub.s32 %s1589_s30, %s1722_s17  ;;  %p39_p7 = scmp.ne.s32.totalorder %s1585_s29, %s1581_s28 }
  0x21   : > { %p30_p6 = scmp.eq.s32.totalorder %s29_s20, 0  ;;  %p40_p8 = scmp.eq.s32.totalorder %s1589_s30, 0 }
  0x22   : > { %p45_p9 = scmp.ne.s32.totalorder %s1581_s28, %s1577_s27  ;;  %p1259_p12 = scmp.lt.s32.totalorder %s1589_s30, 2 }
  0x23   : > { %s1733_s23 = scalar_select %p30_p6, %s1585_s29, %s32_s21  }
  0x24   : > { %p41_p10 = por %p40_p8, %p39_p7  ;;  %p1737_p11 = por %p46_p1, %p45_p9 }
  0x25   : > { %s330_s19 = sand.u32 1, %s1585_s29   ;;  %s1171_s18 = sshll.u32 %s1589_s30, 4 }
  0x26   : > { %s1050_s15 = sshll.u32 %s330_s19, 4  ;;  %s339_s25 = scalar_lea.hbm %s1802_s0, %s1171_s18 }
  0x27   : > { %s334_s1 = scalar_lea.vmem [#allocation2], %s1050_s15  ;;  %s340_s9 = sshll.u32 %s339_s25, 4  ;;  %s341_s9 = int_to_ptr.hbm [resolvable:$true] %s340_s9 }
  0x28   : > { %s342_s26 = sshll.u32 %s334_s1, 4  ;;  %p1747_p13 = pnand %p1259_p12, %p41_p10  ;;  %s343_s26 = int_to_ptr.vmem [resolvable:$true] %s342_s26 }
  0x29   : > { %s331_s10 = scalar_lea.sflag [#allocation3], %s330_s19  ;;  %s1509_s14 = sshra.s32 %s341_s9, 4  ;;  %s1510_s14 = int_to_ptr.hbm [resolvable:$true] %s1509_s14 }
  0x2a   : > { %s1511_s16 = scalar_lea.hbm %s1510_s14, 16  ;;  %p1513_p2 = pneg %p1747_p13 }
  0x2b   : > { %p1512_p0 = scmp.ne.s32.totalorder %s1510_s14, %s1511_s16  ;;  %s1516_s21 = scalar_lea.hbm %s1802_s0, 32 }
  0x2c   : > { %p1517_p6 = scmp.lt.s32.totalorder %s1510_s14, %s1802_s0  ;;  %p1518_p7 = scmp.lt.s32.totalorder %s1516_s21, %s1511_s16 }
  0x2d   : > { %p1514_p4 = pnand %p1513_p2, %p1512_p0 }
  0x2e   : > { %p1519_p8 = por %p1518_p7, %p1517_p6 }
  0x2f   : > { %p1515_p5 = pneg %p1514_p4 }
  0x31   : > { %p1520_p9 = pnand %p1519_p8, %p1515_p5 }
  0x33   : > { %1523 = shalt.err (!%p1520_p9)
}
  0x34   : > { %s1600_s19 = smov 128   ;;  %s1601_s24 = smov 8  }
  0x35   : > { %1251 = dma.hbm_to_vmem [thread:$0]  (!%p1747_p13), %s341_s9, 256, %s343_s26, %s331_s10, %s1600_s19, %s1600_s19, %s1601_s24  }
  0x36   : > { %354 = sbr.rel (%p1677_p3) target bundleno = 584 (0x248), region = 52  ;;  %s356_s22 = sand.u32 (!%p1677_p3), 1, %s1581_s28  }
  0x37   : > { %s1054_s25 = sshll.u32 (!%p1677_p3), %s356_s22, 4  ;;  %s357_s1 = scalar_lea.sflag (!%p1677_p3), [#allocation3], %s356_s22 }
  0x38   : > { %s360_s30 = scalar_lea.vmem (!%p1677_p3), [#allocation2], %s1054_s25 }
  0x3b   : > { %1556 = dma.done.wait (%p1737_p11), %s357_s1, 256  }
  0x3c   : > { %1558 = vsyncadd (%p1737_p11), %s357_s1, 4294967040 }
  0x3d   : > { %1560 = dma.done.wait (%p46_p1), [#allocation6], 976  }
  0x3e   : > { %1562 = vsyncadd (%p46_p1), [#allocation6], 4294966320 }
  0x3f   : > { %1564 = dma.done.wait (%p46_p1), [#allocation9], 784  }
  0x40   : > { %1566 = vsyncadd (%p46_p1), [#allocation9], 4294966512 }
  0x41   : > { %1568 = dma.done.wait (%p46_p1), [#allocation12], 1552  }
  0x42   : > { %1570 = vsyncadd (%p46_p1), [#allocation12], 4294965744 }
  0x43   : > { %1572 = dma.done.wait (%p46_p1), [#allocation4], 16  }
  0x44   : > { %1574 = vsyncadd (%p46_p1), [#allocation4], 4294967280 }
  0x45   : > { %401 = sfence }
  0x46   : > { %v446_v0 = vld [vmem:[#allocation5 + $0x24] sm:$0x1]  ;;  %vm478_vm0 = vcmask 1040384   ;;  %v440_v1 = vld [vmem:[#allocation5 + $0x10] sm:$0x1]  ;;  %v1602_v5 = vmov 0  }
  0x47   : > { %v468_v2 = vunpack.c.l.b16 %v446_v0  ;;  %v507_v3 = vunpack.c.l.b16 %v440_v1  ;;  %v537_v4 = vld [vmem:[#allocation5 + $0x38] sm:$0x1]  ;;  %v480_v6 = vsel %vm478_vm0, 65535, %v1602_v5  ;;  %v432_v10 = vld [vmem:[%s360_s30] sm:$0xff]  ;;  %v1173_v21 = vld [vmem:[#allocation5 + $0x8] sm:$0xff]  ;;  %vm474_vm1 = vcmask 269312  }
  0x48   : > { %v548_v7 = vunpack.c.l.b16 %v537_v4  ;;  %v433_v11 = vld [vmem:[%s360_s30 + $0x8] sm:$0xff]  ;;  %v434_v13 = vpack.c.bf16 %v432_v10, %v432_v10  ;;  %v1177_v22 = vld [vmem:[#allocation5 + $0x30] sm:$0xff]  ;;  %v1172_v27 = vld [vmem:[#allocation5] sm:$0xff]  ;;  %s582_s13 = sld [smem:[#allocation14]]  ;;  %vm625_vm4 = vcmask 261120   ;;  %vm777_vm7 = vcmask 523264  }
  0x49   : > { %v471_v8 = vpack.c.b16 %v468_v2, %v468_v2  ;;  %v510_v9 = vpack.c.b16 %v507_v3, %v507_v3  ;;  %v435_v14 = vpack.c.bf16 %v433_v11, %v433_v11  ;;  %v1175_v20 = vld [vmem:[#allocation5 + $0x1c] sm:$0xff]  ;;  %v1174_v26 = vld [vmem:[#allocation5 + $0x14] sm:$0xff]  ;;  %v1176_v28 = vld [vmem:[#allocation5 + $0x28] sm:$0xff]  ;;  %s1116_s11 = sld [smem:[#allocation14 + $0x1]]  ;;  %vm902_vm10 = vcmask 1041408   ;;  %p428_p1 = scmp.lt.s32.totalorder %s1672_s12, 1 }
  0x4a   : > { %v551_v12 = vpack.c.b16 %v548_v7, %v548_v7  ;;  %v449_v18 = vunpack.c.l.b16 %v434_v13  ;;  %v1183_v32 = vld [vmem:[#allocation8 + $0x28] sm:$0xff]  ;;  %v1181_v33 = vld [vmem:[#allocation8 + $0x18] sm:$0xff]  ;;  %v1182_v34 = vld [vmem:[#allocation8 + $0x20] sm:$0xff]  ;;  %s1168_s26 = sld [smem:[#allocation14 + $0x2]] }
  0x4b   : > { %v482_v15 = vand.u32 %v480_v6, %v471_v8  ;;  %v516_v16 = vand.u32 %v510_v9, %v480_v6  ;;  %v450_v19 = vunpack.c.l.b16 %v435_v14  ;;  %635 = vmatpush.bf16.msra.mxu3 %v1181_v33  ;;  %v1180_v35 = vld [vmem:[#allocation8 + $0x10] sm:$0xff]  ;;  %v1179_v38 = vld [vmem:[#allocation8 + $0x8] sm:$0xff]  ;;  %v1178_v40 = vld [vmem:[#allocation8] sm:$0xff]  ;;  %s1822_s12 = smov (!%p428_p1, %s1672_s12), 1 }
  0x4c   : > { %v558_v17 = vand.u32 %v551_v12, %v480_v6  ;;  %v1311_v41 = vld [vmem:[#allocation7] ss:$0 sm:$0xff]  ;;  %v1187_v2 = vld [vmem:[#allocation11 + $0x18] sm:$0xff]  ;;  %v1186_v4 = vld [vmem:[#allocation11 + $0x10] sm:$0xff]  ;;  %s430_s10 = scalar_lea.vmem %s1810_s8, %s1822_s12 }
  0x4d   : > { %489 = vmatpush.bf16.msra.mxu0 %v482_v15  ;;  %523 = vmatpush.bf16.msra.mxu1 %v516_v16  ;;  %v451_v23 = vpack.c.b16 %v450_v19, %v449_v18  ;;  %v1195_v3 = vld [vmem:[#allocation11 + $0x58] sm:$0xff]  ;;  %v1194_v6 = vld [vmem:[#allocation11 + $0x50] sm:$0xff]  ;;  %v1185_v7 = vld [vmem:[#allocation11 + $0x8] sm:$0xff] }
  0x4e   : > { %565 = vmatpush.bf16.msra.mxu2 %v558_v17  ;;  %v585_v45 = vstv %s582_s13  ;;  %v1191_v5 = vld [vmem:[#allocation11 + $0x38] sm:$0xff]  ;;  %v1190_v9 = vld [vmem:[#allocation11 + $0x30] sm:$0xff]  ;;  %v1193_v10 = vld [vmem:[#allocation11 + $0x48] sm:$0xff] }
  0x4f   : > { %v453_v24 = vshrl.u32 %v451_v23, 16  ;;  %v455_v25 = vshll.u32 %v451_v23, 16  ;;  %v538_v31 = vrot.slane %v451_v23, 1  ;;  %636 = vmatpush.bf16.msra.mxu3 %v1180_v35  ;;  %v1184_v11 = vld [vmem:[#allocation11] sm:$0xff]  ;;  %v1189_v12 = vld [vmem:[#allocation11 + $0x28] sm:$0xff] }
  0x50   : > { %v1192_v13 = vld [vmem:[#allocation11 + $0x40] sm:$0xff]  ;;  %v1312_v19 = vld [vmem:[#allocation10] ss:$0 sm:$0xff] }
  0x51   : > { %490 = vmatpush.bf16.msra.mxu0 %v1175_v20  ;;  %524 = vmatpush.bf16.msra.mxu1 %v1173_v21  ;;  %v457_v29 = vrot.slane %v455_v25, 1  ;;  %v1188_v15 = vld [vmem:[#allocation11 + $0x20] sm:$0xff] }
  0x52   : > { %566 = vmatpush.bf16.msra.mxu2 %v1177_v22  ;;  %v717_v22 = vstv %s1116_s11 }
  0x53   : > { %v458_v30 = vor.u32 %v457_v29, %v453_v24  ;;  %663 = vmatpush.bf16.msrb.mxu3 %v1179_v38 }
  0x55   : > { %491 = vmatpush.bf16.msra.mxu0 %v1174_v26  ;;  %525 = vmatpush.bf16.msra.mxu1 %v1172_v27 }
  0x56   : > { %567 = vmatpush.bf16.msra.mxu2 %v1176_v28 }
  0x57   : > { %664 = vmatpush.bf16.msrb.mxu3 %v1178_v40 }
  0x58   : > { %1070 = vmatmul.msk.bf16.vlgmr.msra.gmra.mxu0 %vm474_vm1, %v458_v30  ;;  %1079 = vmatmul.msk.bf16.vlgmr.msra.gmra.mxu1 %vm474_vm1, %v451_v23 }
  0x59   : > { %1088 = vmatmul.msk.bf16.vlgmr.msra.gmra.mxu2 %vm474_vm1, %v538_v31  ;;  %698 = vmatpush.bf16.msrb.mxu0 %v1183_v32 }
  0x5a   : > { %825 = vmatpush.bf16.msrb.mxu2 %v1187_v2  ;;  %785 = vmatpush.bf16.msrb.mxu1 %v1191_v5 }
  0x5d   : > { %699 = vmatpush.bf16.msrb.mxu0 %v1182_v34 }
  0x5e   : > { %826 = vmatpush.bf16.msrb.mxu2 %v1186_v4  ;;  %786 = vmatpush.bf16.msrb.mxu1 %v1190_v9 }
  0x62   : > { %827 = vmatpush.bf16.msrb.mxu2 %v1185_v7  ;;  %787 = vmatpush.bf16.msrb.mxu1 %v1189_v12 }
  0x66   : > { %828 = vmatpush.bf16.msrb.mxu2 %v1184_v11  ;;  %788 = vmatpush.bf16.msrb.mxu1 %v1188_v15 }
  0xd5   : > { %v493_v36 = vpop.f32.mrf.mxu0  ;;  %v527_v37 = vpop.f32.mrf.mxu1 }
  0xd6   : > { %v528_v39 = vadd.f32 %v527_v37, %v493_v36 }
  0xdc   : > { %v569_v42 = vpop.f32.mrf.mxu2 }
  0xdd   : > { %v574_v43 = vadd.f32 %v569_v42, %v528_v39  ;;  %v495_v46 = vpop.f32.mrf.mxu0  ;;  %v529_v47 = vpop.f32.mrf.mxu1 }
  0xde   : > { %v530_v49 = vadd.f32 %v529_v47, %v495_v46  ;;  %v1313_v47 = vld [vmem:[#allocation13] ss:$0 sm:$0xff] }
  0xdf   : > { %v580_v44 = vadd.f32 %v1311_v41, %v574_v43 }
  0xe1   : > { %v586_v48 = vmul.f32 %v585_v45, %v580_v44  ;;  %vm583_vm2 = vcmp.gt.f32.partialorder %v580_v44, 0.0 }
  0xe3   : > { %v588_v52 = vsel %vm583_vm2, %v580_v44, %v586_v48 }
  0xe4   : > { %v571_v50 = vpop.f32.mrf.mxu2  ;;  %v590_v55 = vpack.c.bf16 %v588_v52, %v588_v52 }
  0xe5   : > { %v575_v51 = vadd.f32 %v571_v50, %v530_v49 }
  0xe6   : > { %v603_v58 = vunpack.c.l.b16 %v590_v55 }
  0xe7   : > { %v581_v53 = vadd.f32 %v1311_v41, %v575_v51 }
  0xe9   : > { %vm584_vm3 = vcmp.gt.f32.partialorder %v581_v53, 0.0  ;;  %v587_v54 = vmul.f32 %v585_v45, %v581_v53 }
  0xeb   : > { %v589_v56 = vsel %vm584_vm3, %v581_v53, %v587_v54  ;;  %v897_v53 = vstv %s1168_s26 }
  0xec   : > { %v591_v57 = vpack.c.bf16 %v589_v56, %v589_v56 }
  0xee   : > { %v604_v59 = vunpack.c.l.b16 %v591_v57 }
  0xf0   : > { %v605_v60 = vpack.c.b16 %v604_v59, %v603_v58 }
  0xf2   : > { %v676_v61 = vrot.slane %v605_v60, 1  ;;  %v609_v62 = vshll.u32 %v605_v60, 16  ;;  %v607_v63 = vshrl.u32 %v605_v60, 16 }
  0xf4   : > { %1115 = vmatmul.msk.bf16.vlgmr.msrb.gmra.mxu0 %vm625_vm4, %v676_v61  ;;  %v611_v0 = vrot.slane %v609_v62, 1 }
  0xf6   : > { %v612_v1 = vor.u32 %v611_v0, %v607_v63 }
  0xf8   : > { %1097 = vmatmul.msk.bf16.vlgmr.msra.gmra.mxu3 %vm625_vm4, %v612_v1 }
  0xf9   : > { %876 = vmatpush.bf16.msra.mxu3 %v1195_v3 }
  0xfd   : > { %877 = vmatpush.bf16.msra.mxu3 %v1194_v6 }
 0x101   : > { %878 = vmatpush.bf16.msra.mxu3 %v1193_v10 }
 0x105   : > { %879 = vmatpush.bf16.msra.mxu3 %v1192_v13 }
 0x108   : > { %1106 = vmatmul.msk.bf16.vlgmr.msrb.gmra.mxu3 %vm625_vm4, %v605_v60 }
 0x171   : > { %v701_v16 = vpop.f32.mrf.mxu0 }
 0x179   : > { %v703_v26 = vpop.f32.mrf.mxu0 }
 0x17b   : > { %v638_v8 = vpop.f32.mrf.mxu3 }
 0x183   : > { %v640_v14 = vpop.f32.mrf.mxu3 }
 0x18b   : > { %v666_v17 = vpop.f32.mrf.mxu3 }
 0x18c   : > { %v667_v18 = vadd.f32 %v666_v17, %v638_v8 }
 0x18e   : > { %v706_v20 = vadd.f32 %v701_v16, %v667_v18 }
 0x190   : > { %v712_v21 = vadd.f32 %v1312_v19, %v706_v20 }
 0x192   : > { %v718_v24 = vmul.f32 %v717_v22, %v712_v21  ;;  %vm715_vm5 = vcmp.gt.f32.partialorder %v712_v21, 0.0 }
 0x193   : > { %v668_v23 = vpop.f32.mrf.mxu3 }
 0x194   : > { %v669_v25 = vadd.f32 %v668_v23, %v640_v14  ;;  %v720_v28 = vsel %vm715_vm5, %v712_v21, %v718_v24 }
 0x195   : > { %v722_v31 = vpack.c.bf16 %v720_v28, %v720_v28 }
 0x196   : > { %v707_v27 = vadd.f32 %v703_v26, %v669_v25 }
 0x197   : > { %v743_v34 = vunpack.c.l.b16 %v722_v31 }
 0x198   : > { %v713_v29 = vadd.f32 %v1312_v19, %v707_v27 }
 0x19a   : > { %vm716_vm6 = vcmp.gt.f32.partialorder %v713_v29, 0.0  ;;  %v719_v30 = vmul.f32 %v717_v22, %v713_v29 }
 0x19c   : > { %v721_v32 = vsel %vm716_vm6, %v713_v29, %v719_v30 }
 0x19d   : > { %v723_v33 = vpack.c.bf16 %v721_v32, %v721_v32 }
 0x19f   : > { %v744_v35 = vunpack.c.l.b16 %v723_v33 }
 0x1a1   : > { %v745_v36 = vpack.c.b16 %v744_v35, %v743_v34 }
 0x1a3   : > { %1150 = vmatmul.msk.bf16.vlgmr.msrb.gmra.mxu2 %vm777_vm7, %v745_v36  ;;  %v844_v37 = vrot.slane %v745_v36, 1  ;;  %v749_v38 = vshll.u32 %v745_v36, 16  ;;  %v747_v39 = vshrl.u32 %v745_v36, 16 }
 0x1a5   : > { %1167 = vmatmul.msk.bf16.vlgmr.msra.gmra.mxu3 %vm777_vm7, %v844_v37  ;;  %v751_v40 = vrot.slane %v749_v38, 1 }
 0x1a7   : > { %v752_v41 = vor.u32 %v751_v40, %v747_v39 }
 0x1a9   : > { %1133 = vmatmul.msk.bf16.vlgmr.msrb.gmra.mxu1 %vm777_vm7, %v752_v41 }
 0x226   : > { %v790_v42 = vpop.f32.mrf.mxu1  ;;  %v830_v43 = vpop.f32.mrf.mxu2 }
 0x227   : > { %v831_v44 = vadd.f32 %v830_v43, %v790_v42 }
 0x228   : > { %v881_v45 = vpop.f32.mrf.mxu3 }
 0x229   : > { %v886_v46 = vadd.f32 %v881_v45, %v831_v44 }
 0x22b   : > { %v892_v51 = vadd.f32 %v1313_v47, %v886_v46 }
 0x22d   : > { %v898_v56 = vmul.f32 %v897_v53, %v892_v51  ;;  %vm895_vm8 = vcmp.gt.f32.partialorder %v892_v51, 0.0 }
 0x22e   : > { %v792_v48 = vpop.f32.mrf.mxu1  ;;  %v832_v49 = vpop.f32.mrf.mxu2 }
 0x22f   : > { %v833_v50 = vadd.f32 %v832_v49, %v792_v48  ;;  %v900_v59 = vsel %vm895_vm8, %v892_v51, %v898_v56 }
 0x230   : > { %v883_v52 = vpop.f32.mrf.mxu3 }
 0x231   : > { %v887_v54 = vadd.f32 %v883_v52, %v833_v50 }
 0x233   : > { %v893_v55 = vadd.f32 %v1313_v47, %v887_v54 }
 0x235   : > { %vm896_vm9 = vcmp.gt.f32.partialorder %v893_v55, 0.0  ;;  %v899_v57 = vmul.f32 %v897_v53, %v893_v55 }
 0x237   : > { %v901_v58 = vsel %vm896_vm9, %v893_v55, %v899_v57 }
 0x238   : > { %v903_v60 = vsel %vm902_vm10, %v901_v58, -inf }
 0x239   : > { %v904_v61 = vmax.f32 %v900_v59, %v903_v60 }
 0x23b   : > { %v905_v62 = vrot.slane %v904_v61, 4 }
 0x23d   : > { %v906_v63 = vmax.f32 %v904_v61, %v905_v62 }
 0x23f   : > { %v907_v0 = vrot.slane %v906_v63, 2 }
 0x241   : > { %v908_v1 = vmax.f32 %v906_v63, %v907_v0 }
 0x243   : > { %v909_v2 = vrot.slane %v908_v1, 1 }
 0x245   : > { %v910_v3 = vmax.f32 %v908_v1, %v909_v2 }
 0x247   : > { %911 = vst [vmem:[%s430_s10] sm:$0x1] %v910_v3 }
 0x248 PF: > { %p22_p3 = scmp.ge.s32.totalorder %s1722_s17, 4   ;;  %s1817_s27 = smov %s1581_s28 }
 0x249   : > { %s1818_s28 = smov %s1585_s29  ;;  %s1819_s29 = smov %s1733_s23 }
 0x24a   : > { %s1820_s30 = smov %s1722_s17  ;;  %24 = sbr.rel (!%p22_p3) target bundleno = 9 (0x9), region = 127 }
 0x24f   :  { %929 = vsyncpa [#allocation3], 1 }
 0x250   :  { %931 = vsyncpa [#allocation3 + $0x1], 1 }
 0x251   :  { %932 = vsyncpa [#allocation6], 1 }
 0x252   :  { %933 = vsyncpa [#allocation9], 1 }
 0x253   :  { %934 = vsyncpa [#allocation12], 1 }
 0x254   :  { %935 = vsyncpa [#allocation4], 1 }
 0x255   :  { %937 = vsyncpa [#allocation4 + $0x1], 1 }

// kernel: _lambda_.6
= control target key start
LH: loop header
LB: loop body
LE: loop exit
PB: predicated region body
PF: predicated region fallthrough
CT: control target
= control target key end

     0   :  { %s2918_s0 = inlined_call_operand.vmem [shape: s32[2,12,1], index: 0, kind: input, shape index: {}]   ;;  %s2919_s1 = inlined_call_operand.hbm [shape: bf16[64,8], index: 1, kind: input, shape index: {}]   ;;  %s2920_s2 = inlined_call_operand.vmem [shape: f32[1,8], index: 2, kind: input, shape index: {}]   ;;  %s2921_s3 = inlined_call_operand.vmem [shape: bf16[9,8,32], index: 3, kind: input, shape index: {}]   ;;  %s2922_s4 = inlined_call_operand.vmem [shape: f32[1,32], index: 4, kind: input, shape index: {}]   ;;  %s2923_s5 = inlined_call_operand.vmem [shape: f32[1,32], index: 5, kind: input, shape index: {}]   ;;  %s2924_s6 = inlined_call_operand.hbm [shape: bf16[32,16], index: 6, kind: input, shape index: {}]   ;;  %s2925_s7 = inlined_call_operand.vmem [shape: f32[1,16], index: 7, kind: input, shape index: {}]   ;;  %s2926_s8 = inlined_call_operand.hbm [shape: bf16[9,16,64], index: 8, kind: input, shape index: {}]   ;;  %s2927_s9 = inlined_call_operand.vmem [shape: f32[1,64], index: 9, kind: input, shape index: {}]   ;;  %s2928_s10 = inlined_call_operand.vmem [shape: f32[1,64], index: 10, kind: input, shape index: {}]   ;;  %s2929_s11 = inlined_call_operand.hbm [shape: bf16[64,32], index: 11, kind: input, shape index: {}]   ;;  %s2930_s12 = inlined_call_operand.hbm [shape: f32[1,32], index: 12, kind: input, shape index: {}]   ;;  %s2931_s13 = inlined_call_operand.hbm [shape: bf16[9,32,128], index: 13, kind: input, shape index: {}]   ;;  %s2932_s14 = inlined_call_operand.hbm [shape: f32[1,128], index: 14, kind: input, shape index: {}]   ;;  %s2933_s15 = inlined_call_operand.hbm [shape: f32[1,128], index: 15, kind: input, shape index: {}]   ;;  %s2934_s16 = inlined_call_operand.hbm [shape: f32[3,2], index: 16, kind: input, shape index: {}]   ;;  %s2935_s17 = inlined_call_operand.vmem [shape: f32[2,1,128], index: 17, kind: output, shape index: {}]  }
   0x1   :  { %2937 = sst [smem:[#allocation27_spill]] %s2918_s0 }
   0x2   :  { %2938 = sst [smem:[#allocation28_spill]] %s2919_s1 }
   0x3   :  { %2939 = sst [smem:[#allocation29_spill]] %s2924_s6 }
   0x4   :  { %2940 = sst [smem:[#allocation30_spill]] %s2928_s10 }
   0x5   :  { %2941 = sst [smem:[#allocation31_spill]] %s2929_s11 }
   0x6   :  { %2942 = sst [smem:[#allocation32_spill]] %s2931_s13 }
   0x7   :  { %2943 = sst [smem:[#allocation33_spill]] %s2935_s17 }
   0x8   :  { %22 = vsyncpa [#allocation6], 0 }
   0x9   :  { %23 = vsyncpa [#allocation9], 0 }
   0xa   :  { %24 = vsyncpa [#allocation12], 0 }
   0xb   :  { %25 = vsyncpa [#allocation15], 0 }
   0xc   :  { %26 = vsyncpa [#allocation18], 0 }
   0xd   :  { %27 = vsyncpa [#allocation7], 0  ;;  %s2715_s24 = smov 0  }
   0xe LB: > { %2944 = sst [smem:[#allocation26_spill]] %s2610_s24  ;;  %s2721_s25 = sadd.s32 4294967295, %s2610_s24   ;;  %s2610_s24 = sphi %s2715_s24, %s33_s24  }
   0xf   : > { %p1958_p0 = scmp.ge.s32.totalorder %s2610_s24, 1  ;;  %p426_p1 = scmp.lt.s32.totalorder %s2610_s24, 3 }
  0x10   : > { %p2276_p2 = scmp.eq.s32.totalorder %s2721_s25, 0  ;;  %s2945_s6 = sld [smem:[#allocation29_spill]] }
  0x11   : > { %p2729_p3 = pnand %p1958_p0, %p426_p1  ;;  %s2947_s11 = sld [smem:[#allocation31_spill]] }
  0x12   : > { %s2612_s19 = smov [#allocation8]   ;;  %s2613_s21 = smov [#allocation11]  }
  0x13   : > { %p2248_p4 = pneg %p2729_p3  ;;  %s465_s1 = sshll.u32 %s2612_s19, 4  ;;  %s466_s1 = int_to_ptr.vmem [resolvable:$true] %s465_s1 }
  0x14   : > { %s502_s22 = sshll.u32 %s2613_s21, 4  ;;  %s2949_s13 = sld [smem:[#allocation32_spill]]  ;;  %s503_s22 = int_to_ptr.vmem [resolvable:$true] %s502_s22 }
  0x15   : > { %p2740_p5 = pnand %p2276_p2, %p2248_p4  ;;  %s2614_s0 = smov 64  }
  0x16   : > { %s463_s28 = sshll.u32 %s2945_s6, 4  ;;  %s2615_s30 = smov 4   ;;  %s464_s28 = int_to_ptr.hbm [resolvable:$true] %s463_s28 }
  0x17   : > { %s500_s18 = sshll.u32 %s2947_s11, 4  ;;  %s2616_s19 = smov [#allocation14]   ;;  %s501_s18 = int_to_ptr.hbm [resolvable:$true] %s500_s18 }
  0x18   : > { %2254 = dma.hbm_to_vmem [thread:$0]  (!%p2740_p5), %s464_s28, 256, %s466_s1, [#allocation9], %s2614_s0, %s2614_s0, %s2615_s30  }
  0x19   : > { %2260 = dma.hbm_to_vmem [thread:$0]  (!%p2740_p5), %s501_s18, 512, %s503_s22, [#allocation12], %s2614_s0, %s2614_s0, %s2615_s30  }
  0x1a   : > { %s526_s27 = sshll.u32 %s2949_s13, 4  ;;  %s528_s6 = sshll.u32 %s2616_s19, 4  ;;  %s527_s27 = int_to_ptr.hbm [resolvable:$true] %s526_s27  ;;  %s529_s6 = int_to_ptr.vmem [resolvable:$true] %s528_s6 }
  0x1b   : > { %s2950_s17 = sld [smem:[#allocation28_spill]]  ;;  %s480_s13 = sshll.u32 %s2926_s8, 4  ;;  %s481_s13 = int_to_ptr.hbm [resolvable:$true] %s480_s13 }
  0x1c   : > { %2266 = dma.hbm_to_vmem [thread:$0]  (!%p2740_p5), %s527_s27, 2304, %s529_s6, [#allocation15], %s2614_s0, %s2614_s0, %s2615_s30  }
  0x1d   : > { %s2617_s10 = smov [#allocation5]   ;;  %s2618_s18 = smov [#allocation10]  }
  0x1e   : > { %s439_s28 = sshll.u32 %s2617_s10, 4  ;;  %s482_s1 = sshll.u32 %s2618_s18, 4  ;;  %s440_s28 = int_to_ptr.vmem [resolvable:$true] %s439_s28  ;;  %s483_s1 = int_to_ptr.vmem [resolvable:$true] %s482_s1 }
  0x1f   : > { %2257 = dma.hbm_to_vmem [thread:$0]  (!%p2740_p5), %s481_s13, 1152, %s483_s1, [#allocation9], %s2614_s0, %s2614_s0, %s2615_s30  }
  0x20   : > { %s541_s27 = sshll.u32 %s2932_s14, 4  ;;  %s2619_s10 = smov [#allocation13]   ;;  %s542_s27 = int_to_ptr.hbm [resolvable:$true] %s541_s27 }
  0x21   : > { %s437_s21 = sshll.u32 %s2950_s17, 4  ;;  %s515_s17 = sshll.u32 %s2930_s12, 4  ;;  %s438_s21 = int_to_ptr.hbm [resolvable:$true] %s437_s21  ;;  %s516_s17 = int_to_ptr.hbm [resolvable:$true] %s515_s17 }
  0x22   : > { %2251 = dma.hbm_to_vmem [thread:$0]  (!%p2740_p5), %s438_s21, 512, %s440_s28, [#allocation6], %s2614_s0, %s2614_s0, %s2615_s30  }
  0x23   : > { %s517_s19 = sshll.u32 %s2619_s10, 4  ;;  %s2620_s21 = smov [#allocation16]   ;;  %s518_s19 = int_to_ptr.vmem [resolvable:$true] %s517_s19 }
  0x24   : > { %2263 = dma.hbm_to_vmem [thread:$0]  (!%p2740_p5), %s516_s17, 16, %s518_s19, [#allocation12]  }
  0x25   : > { %s543_s23 = sshll.u32 %s2620_s21, 4  ;;  %s553_s18 = sshll.u32 %s2933_s15, 4  ;;  %s544_s23 = int_to_ptr.vmem [resolvable:$true] %s543_s23  ;;  %s554_s18 = int_to_ptr.hbm [resolvable:$true] %s553_s18 }
  0x26   : > { %2269 = dma.hbm_to_vmem [thread:$0]  (!%p2740_p5), %s542_s27, 16, %s544_s23, [#allocation15]  }
  0x27   : > { %s565_s30 = sshll.u32 %s2934_s16, 4  ;;  %s2621_s1 = smov [#allocation17]   ;;  %s566_s30 = int_to_ptr.hbm [resolvable:$true] %s565_s30 }
  0x28   : > { %s555_s11 = sshll.u32 %s2621_s1, 4  ;;  %s2622_s24 = smov [#allocation19]   ;;  %s556_s11 = int_to_ptr.vmem [resolvable:$true] %s555_s11 }
  0x29   : > { %2272 = dma.hbm_to_vmem [thread:$0]  (!%p2740_p5), %s554_s18, 16, %s556_s11, [#allocation18]  }
  0x2a   : > { %2275 = dma.hbm_to_smem (!%p2740_p5), %s566_s30, 64, %s2622_s24, [#allocation7]  }
  0x2b   : > { %586 = sbr.rel (%p2729_p3) target bundleno = 1186 (0x4a2), region = 88 }
  0x30   : > { %2585 = dma.done.wait (%p2276_p2), [#allocation6], 512  }
  0x31   : > { %2587 = vsyncadd (%p2276_p2), [#allocation6], 4294966784 }
  0x32   : > { %2589 = dma.done.wait (%p2276_p2), [#allocation9], 1408  }
  0x33   : > { %2591 = vsyncadd (%p2276_p2), [#allocation9], 4294965888 }
  0x34   : > { %2593 = dma.done.wait (%p2276_p2), [#allocation12], 528  }
  0x35   : > { %2595 = vsyncadd (%p2276_p2), [#allocation12], 4294966768 }
  0x36   : > { %2597 = dma.done.wait (%p2276_p2), [#allocation15], 2320  }
  0x37   : > { %2599 = vsyncadd (%p2276_p2), [#allocation15], 4294964976 }
  0x38   : > { %2601 = dma.done.wait (%p2276_p2), [#allocation18], 16  }
  0x39   : > { %2603 = vsyncadd (%p2276_p2), [#allocation18], 4294967280 }
  0x3a   : > { %2605 = dma.done.wait (%p2276_p2), [#allocation7], 64  }
  0x3b   : > { %2607 = vsyncadd (%p2276_p2), [#allocation7], 4294967232 }
  0x3c   : > { %633 = sfence }
  0x3d   : > { %p678_p6 = scmp.lt.s32.totalorder %s2721_s25, 1  ;;  %v2178_v0 = vld [vmem:[#allocation5 + $0x18] sm:$0xff]  ;;  %vm765_vm0 = vcmask 64512   ;;  %v2623_v1 = vmov 0   ;;  %v2624_v2 = vmov 0.0   ;;  %vm1077_vm1 = vcmask 130048  }
  0x3e   : > { %2315 = vset.pattern.permute.xlu0 %v2623_v1  ;;  %766 = vst.msk [vmem:[#allocation2] sm:$0xff] %vm765_vm0, %v2624_v2  ;;  %748 = vmatpush.bf16.msra.mxu0 %v2178_v0  ;;  %vm1052_vm2 = vcmask 261120   ;;  %s2951_s6 = sld [smem:[#allocation27_spill]]  ;;  %v2177_v5 = vld [vmem:[#allocation5 + $0x10] sm:$0xff]  ;;  %v2176_v6 = vld [vmem:[#allocation5 + $0x8] sm:$0xff]  ;;  %v2175_v7 = vld [vmem:[#allocation5] sm:$0xff]  ;;  %v689_v8 = vlaneseq }
  0x3f   : > { %s2956_s25 = smov (!%p678_p6, %s2721_s25), 1  ;;  %767 = vst.msk [vmem:[#allocation2 + $0x14] sm:$0xff] %vm765_vm0, %v2624_v2  ;;  %vm740_vm5 = vcmask 523264   ;;  %v1999_v15 = vld [vmem:[%s2921_s3 + $0x4] sm:$0xf]  ;;  %vm783_vm6 = vcmask 1043456  }
  0x40   : > { %1078 = vst.msk [vmem:[#allocation3] sm:$0xff] %vm1077_vm1, %v2624_v2  ;;  %s2174_s29 = sshll.u32 %s2956_s25, 4  ;;  %v690_v10 = vand.u32 127, %v689_v8  ;;  %v774_v16 = vld [vmem:[%s2921_s3] sm:$0xf]  ;;  %v785_v17 = vsel %vm783_vm6, %v1999_v15, 0 }
  0x41   : > { %1079 = vst.msk [vmem:[#allocation3 + $0x14] sm:$0xff] %vm1077_vm1, %v2624_v2  ;;  %v805_v18 = vsel %vm783_vm6, %v774_v16, 0  ;;  %794 = vmatpush.bf16.msra.mxu1 %v785_v17  ;;  %v2006_v19 = vld [vmem:[%s2921_s3 + $0x10] sm:$0xf]  ;;  %v2004_v20 = vld [vmem:[%s2921_s3 + $0xc] sm:$0xf] }
  0x42   : > { %1439 = vst.msk [vmem:[#allocation4] sm:$0xff] %vm1052_vm2, %v2624_v2  ;;  %749 = vmatpush.bf16.msra.mxu0 %v2177_v5  ;;  %814 = vmatpush.bf16.msra.mxu2 %v805_v18  ;;  %v2002_v21 = vld [vmem:[%s2921_s3 + $0x8] sm:$0xf]  ;;  %v884_v22 = vsel %vm783_vm6, %v2006_v19, 0  ;;  %v857_v23 = vsel %vm783_vm6, %v2004_v20, 0  ;;  %s701_s11 = sld [smem:[#allocation19]] }
  0x43   : > { %1440 = vst.msk [vmem:[#allocation4 + $0x14] sm:$0xff] %vm1052_vm2, %v2624_v2  ;;  %v830_v24 = vsel %vm783_vm6, %v2002_v21, 0  ;;  %v2010_v25 = vld [vmem:[%s2921_s3 + $0x18] sm:$0xf]  ;;  %v2008_v27 = vld [vmem:[%s2921_s3 + $0x14] sm:$0xf] }
  0x44   : > { %s682_s22 = scalar_lea.vmem %s2951_s6, %s2174_s29  ;;  %v938_v26 = vsel %vm783_vm6, %v2010_v25, 0  ;;  %839 = vmatpush.bf16.msra.mxu3 %v830_v24  ;;  %v911_v28 = vsel %vm783_vm6, %v2008_v27, 0  ;;  %v2316_v29 = vld [vmem:[%s2920_s2] ss:$0 sm:$0xff]  ;;  %vm769_vm8 = vcmask 60416   ;;  %s1981_s23 = sld [smem:[#allocation19 + $0x1]] }
  0x45   : > { %v687_v3 = vld [vmem:[%s682_s22] sm:$0xff]  ;;  %v688_v4 = vld [vmem:[%s682_s22 + $0x8] sm:$0xf]  ;;  %866 = vmatpush.bf16.msrb.mxu1 %v857_v23  ;;  %v2012_v40 = vld [vmem:[%s2921_s3 + $0x1c] sm:$0xf]  ;;  %s2016_s18 = sld [smem:[#allocation19 + $0x80]] }
  0x46   : > { %692 = vperm.xlu0 %2315, %v687_v3   ;;  %750 = vmatpush.bf16.msra.mxu0 %v2176_v6  ;;  %v771_v38 = vld [vmem:[#allocation2] sm:$0xff]  ;;  %v965_v48 = vsel %vm783_vm6, %v2012_v40, 0  ;;  %v957_v0 = vld [vmem:[#allocation2 + $0x14] sm:$0xf]  ;;  %v984_v3 = vld [vmem:[#allocation2 + $0x18] sm:$0xf] }
  0x47   : > { %893 = vmatpush.bf16.msrb.mxu2 %v884_v22  ;;  %v2014_v39 = vld [vmem:[%s2921_s3 + $0x20] sm:$0xf]  ;;  %vm1081_vm14 = vcmask 125952   ;;  %s2952_s20 = sld [smem:[#allocation30_spill]] }
  0x48   : > { %920 = vmatpush.bf16.msrb.mxu3 %v911_v28  ;;  %v760_v31 = vstv %s701_s11  ;;  %v992_v47 = vsel %vm783_vm6, %v2014_v39, 0  ;;  %v2179_v17 = vld [vmem:[#allocation8] sm:$0xff]  ;;  %s2017_s11 = sld [smem:[#allocation19 + $0x81]] }
  0x49   : > { %v2318_v40 = vld [vmem:[%s2923_s5] ss:$0 sm:$0xff]  ;;  %s2072_s17 = sld [smem:[#allocation19 + $0x100]] }
  0x4a   : > { %751 = vmatpush.bf16.msra.mxu0 %v2175_v7  ;;  %s2073_s6 = sld [smem:[#allocation19 + $0x101]] }
  0x4b   : > { %s2953_s10 = sld [smem:[#allocation33_spill]] }
  0x4e   : > { %695 = vperm.xlu0 %2315, %v688_v4   ;;  %947 = vmatpush.bf16.msrb.mxu0 %v938_v26 }
  0x51   : > { %s685_s19 = scalar_lea.vmem %s2953_s10, %s2956_s25 }
  0xb8   : > { %v693_v9 = vpop.permute.xlu0 %692 }
  0xb9   : > { %vm697_vm3 = vcmp.eq.s32.totalorder %v693_v9, %v690_v10 }
  0xba   : > { %v699_v12 = vsel %vm697_vm3, 1.0, %v2624_v2 }
  0xc0   : > { %v696_v11 = vpop.permute.xlu0 %695 }
  0xc1   : > { %vm698_vm4 = vcmp.eq.s32.totalorder %v696_v11, %v690_v10  ;;  %v2180_v11 = vld [vmem:[#allocation8 + $0x8] sm:$0xff] }
  0xc2   : > { %v700_v13 = vsel %vm698_vm4, 1.0, %v2624_v2  ;;  %vm1442_vm4 = vcmask 257024  }
  0xc3   : > { %v703_v14 = vpack.c.bf16 %v700_v13, %v699_v12 }
  0xc5   : > { %1998 = vmatmul.msk.bf16.vlgmr.msra.gmra.mxu0 %vm740_vm5, %v703_v14 }
 0x142   : > { %v753_v30 = vpop.f32.mrf.mxu0 }
 0x143   : > { %v754_v32 = vadd.f32 %v2316_v29, %v753_v30 }
 0x145   : > { %vm758_vm7 = vcmp.gt.f32.partialorder %v754_v32, 0.0  ;;  %v761_v33 = vmul.f32 %v760_v31, %v754_v32 }
 0x147   : > { %v763_v34 = vsel %vm758_vm7, %v754_v32, %v761_v33 }
 0x148   : > { %768 = vst.msk [vmem:[#allocation2 + $0x8] sm:$0xff] %vm765_vm0, %v763_v34 }
 0x14a   : > { %v755_v35 = vpop.f32.mrf.mxu0 }
 0x14b   : > { %v756_v36 = vadd.f32 %v2316_v29, %v755_v35 }
 0x14d   : > { %vm759_vm9 = vcmp.gt.f32.partialorder %v756_v36, 0.0  ;;  %v762_v37 = vmul.f32 %v760_v31, %v756_v36 }
 0x14f   : > { %v764_v41 = vsel %vm759_vm9, %v756_v36, %v762_v37  ;;  %v775_v42 = vld [vmem:[#allocation2 + $0x4] sm:$0xff]  ;;  %v776_v43 = vld [vmem:[#allocation2 + $0xc] sm:$0xf]  ;;  %v2317_v36 = vld [vmem:[%s2922_s4] ss:$0 sm:$0xff] }
 0x150   : > { %v772_v44 = vld [vmem:[#allocation2 + $0x8] sm:$0xf]  ;;  %770 = vst.msk [vmem:[#allocation2 + $0x10] sm:$0xf] %vm769_vm8, %v764_v41  ;;  %v777_v45 = vpack.c.bf16 %v776_v43, %v775_v42 }
 0x151   : > { %v773_v46 = vpack.c.bf16 %v772_v44, %v771_v38  ;;  %v821_v49 = vld [vmem:[#allocation2 + $0x6] sm:$0xff] }
 0x152   : > { %2000 = vmatmul.msk.bf16.vlgmr.msra.gmra.mxu1 %vm765_vm0, %v777_v45  ;;  %v848_v57 = vld [vmem:[#allocation2 + $0x7] sm:$0xff] }
 0x153   : > { %2001 = vmatmul.msk.bf16.vlgmr.msra.gmra.mxu2 %vm765_vm0, %v773_v46  ;;  %974 = vmatpush.bf16.msra.mxu1 %v965_v48  ;;  %v875_v58 = vld [vmem:[#allocation2 + $0x8] sm:$0xff]  ;;  %v1024_v46 = vstv %s1981_s23 }
 0x154   : > { %1001 = vmatpush.bf16.msra.mxu2 %v992_v47 }
 0x157   : > { %v822_v50 = vld [vmem:[#allocation2 + $0xe] sm:$0xf]  ;;  %v930_v52 = vld [vmem:[#allocation2 + $0x12] sm:$0xf] }
 0x158   : > { %v929_v51 = vld [vmem:[#allocation2 + $0xa] sm:$0xff]  ;;  %v823_v53 = vpack.c.bf16 %v822_v50, %v821_v49 }
 0x159   : > { %v931_v54 = vpack.c.bf16 %v930_v52, %v929_v51  ;;  %v849_v55 = vld [vmem:[#allocation2 + $0xf] sm:$0xf] }
 0x15a   : > { %2003 = vmatmul.msk.bf16.vlgmr.msra.gmra.mxu3 %vm765_vm0, %v823_v53  ;;  %v876_v56 = vld [vmem:[#allocation2 + $0x10] sm:$0xf]  ;;  %v850_v59 = vpack.c.bf16 %v849_v55, %v848_v57  ;;  %v2184_v57 = vld [vmem:[#allocation10 + $0x18] sm:$0xff] }
 0x15b   : > { %2011 = vmatmul.msk.bf16.vlgmr.msrb.gmra.mxu0 %vm765_vm0, %v931_v54  ;;  %v877_v60 = vpack.c.bf16 %v876_v56, %v875_v58  ;;  %v902_v61 = vld [vmem:[#allocation2 + $0x9] sm:$0xff]  ;;  %v903_v62 = vld [vmem:[#allocation2 + $0x11] sm:$0xf]  ;;  %1062 = vmatpush.bf16.msra.mxu3 %v2180_v11  ;;  %v2182_v54 = vld [vmem:[#allocation10 + $0x8] sm:$0xff] }
 0x15c   : > { %v904_v63 = vpack.c.bf16 %v903_v62, %v902_v61  ;;  %v956_v1 = vld [vmem:[#allocation2 + $0xc] sm:$0xff]  ;;  %1110 = vmatpush.bf16.msra.mxu0 %v2182_v54  ;;  %v2183_v56 = vld [vmem:[#allocation10 + $0x10] sm:$0xff]  ;;  %v2186_v61 = vld [vmem:[#allocation10 + $0x28] sm:$0xff] }
 0x15d   : > { %v983_v2 = vld [vmem:[#allocation2 + $0x10] sm:$0xff]  ;;  %v958_v4 = vpack.c.bf16 %v957_v0, %v956_v1  ;;  %v2319_v62 = vld [vmem:[%s2925_s7] ss:$0 sm:$0xff]  ;;  %v1072_v0 = vstv %s2016_s18 }
 0x15e   : > { %v985_v5 = vpack.c.bf16 %v984_v3, %v983_v2  ;;  %v2181_v55 = vld [vmem:[#allocation10] sm:$0xff] }
 0x15f   : > { %1063 = vmatpush.bf16.msra.mxu3 %v2179_v17  ;;  %v2185_v58 = vld [vmem:[#allocation10 + $0x20] sm:$0xff] }
 0x160   : > { %1224 = vmatpush.bf16.msrb.mxu0 %v2185_v58 }
 0x162   : > { %2005 = vmatmul.msk.bf16.vlgmr.msrb.gmra.mxu1 %vm765_vm0, %v850_v59  ;;  %v2187_v59 = vld [vmem:[#allocation10 + $0x30] sm:$0xff] }
 0x163   : > { %2007 = vmatmul.msk.bf16.vlgmr.msrb.gmra.mxu2 %vm765_vm0, %v877_v60  ;;  %1133 = vmatpush.bf16.msrb.mxu1 %v2181_v55  ;;  %v2188_v60 = vld [vmem:[#allocation10 + $0x38] sm:$0xff] }
 0x164   : > { %1162 = vmatpush.bf16.msrb.mxu2 %v2183_v56 }
 0x16a   : > { %2009 = vmatmul.msk.bf16.vlgmr.msrb.gmra.mxu3 %vm765_vm0, %v904_v63 }
 0x16b   : > { %1193 = vmatpush.bf16.msrb.mxu3 %v2184_v57 }
 0x172   : > { %2013 = vmatmul.msk.bf16.vlgmr.msra.gmra.mxu1 %vm765_vm0, %v958_v4 }
 0x173   : > { %2015 = vmatmul.msk.bf16.vlgmr.msra.gmra.mxu2 %vm765_vm0, %v985_v5  ;;  %1255 = vmatpush.bf16.msra.mxu1 %v2186_v61 }
 0x174   : > { %1286 = vmatpush.bf16.msra.mxu2 %v2187_v59 }
 0x1cf   : > { %v796_v6 = vpop.f32.mrf.mxu1 }
 0x1d6   : > { %v816_v7 = vpop.f32.mrf.mxu2 }
 0x1d7   : > { %v798_v8 = vpop.f32.mrf.mxu1  ;;  %v817_v13 = vadd.f32 %v816_v7, %v796_v6  ;;  %v1083_v7 = vld [vmem:[#allocation3] sm:$0xff] }
 0x1d8   : > { %v949_v20 = vpop.f32.mrf.mxu0 }
 0x1dd   : > { %v841_v10 = vpop.f32.mrf.mxu3 }
 0x1de   : > { %v818_v9 = vpop.f32.mrf.mxu2  ;;  %v846_v16 = vadd.f32 %v841_v10, %v817_v13 }
 0x1df   : > { %v868_v12 = vpop.f32.mrf.mxu1  ;;  %v819_v21 = vadd.f32 %v818_v9, %v798_v8  ;;  %v2189_v8 = vld [vmem:[#allocation10 + $0x40] sm:$0xff] }
 0x1e0   : > { %v873_v19 = vadd.f32 %v868_v12, %v846_v16  ;;  %v951_v37 = vpop.f32.mrf.mxu0 }
 0x1e5   : > { %v843_v14 = vpop.f32.mrf.mxu3 }
 0x1e6   : > { %v895_v15 = vpop.f32.mrf.mxu2  ;;  %v847_v25 = vadd.f32 %v843_v14, %v819_v21 }
 0x1e7   : > { %v870_v18 = vpop.f32.mrf.mxu1  ;;  %v900_v22 = vadd.f32 %v895_v15, %v873_v19 }
 0x1e8   : > { %v874_v29 = vadd.f32 %v870_v18, %v847_v25 }
 0x1ed   : > { %v922_v24 = vpop.f32.mrf.mxu3 }
 0x1ee   : > { %v897_v23 = vpop.f32.mrf.mxu2  ;;  %v927_v26 = vadd.f32 %v922_v24, %v900_v22 }
 0x1ef   : > { %v976_v28 = vpop.f32.mrf.mxu1  ;;  %v901_v30 = vadd.f32 %v897_v23, %v874_v29 }
 0x1f0   : > { %v954_v27 = vadd.f32 %v949_v20, %v927_v26 }
 0x1f2   : > { %v981_v31 = vadd.f32 %v976_v28, %v954_v27  ;;  %v1296_v27 = vld [vmem:[#allocation3 + $0x14] sm:$0xf] }
 0x1f5   : > { %v924_v32 = vpop.f32.mrf.mxu3 }
 0x1f6   : > { %v1003_v33 = vpop.f32.mrf.mxu2  ;;  %v928_v34 = vadd.f32 %v924_v32, %v901_v30 }
 0x1f7   : > { %v1008_v35 = vadd.f32 %v1003_v33, %v981_v31  ;;  %v978_v41 = vpop.f32.mrf.mxu1 }
 0x1f8   : > { %v955_v38 = vadd.f32 %v951_v37, %v928_v34  ;;  %v1327_v34 = vld [vmem:[#allocation3 + $0x18] sm:$0xf] }
 0x1f9   : > { %v1014_v39 = vmul.f32 %v2317_v36, %v1008_v35 }
 0x1fa   : > { %v982_v42 = vadd.f32 %v978_v41, %v955_v38  ;;  %v2193_v38 = vld [vmem:[#allocation11 + $0x18] sm:$0xff] }
 0x1fb   : > { %v1020_v44 = vadd.f32 %v2318_v40, %v1014_v39 }
 0x1fd   : > { %v1025_v48 = vmul.f32 %v1024_v46, %v1020_v44  ;;  %vm1022_vm10 = vcmp.gt.f32.partialorder %v1020_v44, 0.0 }
 0x1fe   : > { %v1005_v43 = vpop.f32.mrf.mxu2 }
 0x1ff   : > { %v1009_v45 = vadd.f32 %v1005_v43, %v982_v42  ;;  %v1027_v51 = vsel %vm1022_vm10, %v1020_v44, %v1025_v48  ;;  %v2191_v44 = vld [vmem:[#allocation11 + $0x8] sm:$0xff]  ;;  %v2190_v48 = vld [vmem:[#allocation11] sm:$0xff] }
 0x201   : > { %v1015_v47 = vmul.f32 %v2317_v36, %v1009_v45 }
 0x203   : > { %v1021_v49 = vadd.f32 %v2318_v40, %v1015_v47  ;;  %v2192_v40 = vld [vmem:[#allocation11 + $0x10] sm:$0xff] }
 0x205   : > { %vm1023_vm11 = vcmp.gt.f32.partialorder %v1021_v49, 0.0  ;;  %v1026_v50 = vmul.f32 %v1024_v46, %v1021_v49 }
 0x207   : > { %v1028_v52 = vsel %vm1023_vm11, %v1021_v49, %v1026_v50 }
 0x208   : > { %v1031_v53 = vpack.c.bf16 %v1028_v52, %v1027_v51 }
 0x20a   : > { %2026 = vmatmul.msk.bf16.vlgmr.msra.gmra.mxu3 %vm1052_vm2, %v1031_v53 }
 0x20b   : > { %1317 = vmatpush.bf16.msra.mxu3 %v2188_v60 }
 0x28d   : > { %v1065_v63 = vpop.f32.mrf.mxu3 }
 0x28e   : > { %v1066_v1 = vadd.f32 %v2319_v62, %v1065_v63 }
 0x290   : > { %vm1070_vm12 = vcmp.gt.f32.partialorder %v1066_v1, 0.0  ;;  %v1073_v2 = vmul.f32 %v1072_v0, %v1066_v1 }
 0x292   : > { %v1075_v3 = vsel %vm1070_vm12, %v1066_v1, %v1073_v2  ;;  %v2320_v2 = vld [vmem:[%s2927_s9] ss:$0 sm:$0xff] }
 0x293   : > { %1080 = vst.msk [vmem:[#allocation3 + $0x8] sm:$0xff] %vm1077_vm1, %v1075_v3 }
 0x295   : > { %v1067_v4 = vpop.f32.mrf.mxu3 }
 0x296   : > { %v1068_v5 = vadd.f32 %v2319_v62, %v1067_v4 }
 0x298   : > { %vm1071_vm13 = vcmp.gt.f32.partialorder %v1068_v5, 0.0  ;;  %v1074_v6 = vmul.f32 %v1072_v0, %v1068_v5 }
 0x29a   : > { %v1076_v9 = vsel %vm1071_vm13, %v1068_v5, %v1074_v6  ;;  %v1088_v10 = vld [vmem:[#allocation3 + $0x4] sm:$0xff]  ;;  %v1089_v11 = vld [vmem:[#allocation3 + $0xc] sm:$0xf] }
 0x29b   : > { %v1084_v12 = vld [vmem:[#allocation3 + $0x8] sm:$0xf]  ;;  %1082 = vst.msk [vmem:[#allocation3 + $0x10] sm:$0xf] %vm1081_vm14, %v1076_v9  ;;  %v1090_v13 = vpack.c.bf16 %v1089_v11, %v1088_v10 }
 0x29c   : > { %v1085_v14 = vpack.c.bf16 %v1084_v12, %v1083_v7  ;;  %v1140_v15 = vld [vmem:[#allocation3 + $0x6] sm:$0xff]  ;;  %v2321_v7 = vld [vmem:[%s2952_s20] ss:$0 sm:$0xff] }
 0x29d   : > { %2031 = vmatmul.msk.bf16.vlgmr.msra.gmra.mxu0 %vm1077_vm1, %v1090_v13  ;;  %v1171_v17 = vld [vmem:[#allocation3 + $0x7] sm:$0xff] }
 0x29e   : > { %2036 = vmatmul.msk.bf16.vlgmr.msrb.gmra.mxu1 %vm1077_vm1, %v1085_v14  ;;  %1348 = vmatpush.bf16.msra.mxu0 %v2189_v8  ;;  %v1202_v24 = vld [vmem:[#allocation3 + $0x8] sm:$0xff]  ;;  %v1371_v14 = vstv %s2017_s11 }
 0x29f   : > { %1422 = vmatpush.bf16.msrb.mxu1 %v2193_v38  ;;  %v2209_v38 = vld [vmem:[#allocation14 + $0x78] sm:$0xff] }
 0x2a2   : > { %v1141_v16 = vld [vmem:[#allocation3 + $0xe] sm:$0xf]  ;;  %v1265_v29 = vld [vmem:[#allocation3 + $0x12] sm:$0xf] }
 0x2a3   : > { %v1172_v18 = vld [vmem:[#allocation3 + $0xf] sm:$0xf]  ;;  %v1142_v19 = vpack.c.bf16 %v1141_v16, %v1140_v15  ;;  %1423 = vmatpush.bf16.msrb.mxu1 %v2192_v40  ;;  %v2206_v40 = vld [vmem:[#allocation14 + $0x60] sm:$0xff] }
 0x2a4   : > { %v1173_v20 = vpack.c.bf16 %v1172_v18, %v1171_v17  ;;  %v1203_v21 = vld [vmem:[#allocation3 + $0x10] sm:$0xf] }
 0x2a5   : > { %2041 = vmatmul.msk.bf16.vlgmr.msrb.gmra.mxu2 %vm1077_vm1, %v1142_v19  ;;  %v1233_v22 = vld [vmem:[#allocation3 + $0x9] sm:$0xff]  ;;  %v1234_v23 = vld [vmem:[#allocation3 + $0x11] sm:$0xf]  ;;  %v1204_v25 = vpack.c.bf16 %v1203_v21, %v1202_v24 }
 0x2a6   : > { %2046 = vmatmul.msk.bf16.vlgmr.msrb.gmra.mxu3 %vm1077_vm1, %v1173_v20  ;;  %v1235_v26 = vpack.c.bf16 %v1234_v23, %v1233_v22  ;;  %v1264_v28 = vld [vmem:[#allocation3 + $0xa] sm:$0xff]  ;;  %v2197_v22 = vld [vmem:[#allocation14 + $0x18] sm:$0xff]  ;;  %v2195_v23 = vld [vmem:[#allocation14 + $0x8] sm:$0xff] }
 0x2a7   : > { %v1295_v30 = vld [vmem:[#allocation3 + $0xc] sm:$0xff]  ;;  %v1266_v31 = vpack.c.bf16 %v1265_v29, %v1264_v28  ;;  %1424 = vmatpush.bf16.msrb.mxu1 %v2191_v44  ;;  %1480 = vmatpush.bf16.msrb.mxu2 %v2197_v22  ;;  %v2198_v29 = vld [vmem:[#allocation14 + $0x20] sm:$0xff] }
 0x2a8   : > { %v1297_v32 = vpack.c.bf16 %v1296_v27, %v1295_v30  ;;  %v1326_v33 = vld [vmem:[#allocation3 + $0x10] sm:$0xff]  ;;  %1509 = vmatpush.bf16.msrb.mxu3 %v2195_v23  ;;  %v2199_v27 = vld [vmem:[#allocation14 + $0x28] sm:$0xff] }
 0x2a9   : > { %v1328_v35 = vpack.c.bf16 %v1327_v34, %v1326_v33  ;;  %v2196_v24 = vld [vmem:[#allocation14 + $0x10] sm:$0xff]  ;;  %v2201_v28 = vld [vmem:[#allocation14 + $0x38] sm:$0xff] }
 0x2aa   : > { %v2200_v30 = vld [vmem:[#allocation14 + $0x30] sm:$0xff]  ;;  %v2322_v34 = vld [vmem:[#allocation13] ss:$0 sm:$0xff] }
 0x2ab   : > { %1425 = vmatpush.bf16.msrb.mxu1 %v2190_v48  ;;  %1481 = vmatpush.bf16.msrb.mxu2 %v2196_v24  ;;  %v2204_v33 = vld [vmem:[#allocation14 + $0x50] sm:$0xff]  ;;  %v2211_v48 = vld [vmem:[#allocation14 + $0x88] sm:$0xff] }
 0x2ad   : > { %2051 = vmatmul.msk.bf16.vlgmr.msrb.gmra.mxu0 %vm1077_vm1, %v1204_v25  ;;  %v2194_v25 = vld [vmem:[#allocation14] sm:$0xff] }
 0x2ae   : > { %2056 = vmatmul.msk.bf16.vlgmr.msra.gmra.mxu1 %vm1077_vm1, %v1235_v26  ;;  %1510 = vmatpush.bf16.msrb.mxu3 %v2194_v25  ;;  %v2203_v26 = vld [vmem:[#allocation14 + $0x48] sm:$0xff] }
 0x2af   : > { %1546 = vmatpush.bf16.msrb.mxu0 %v2199_v27  ;;  %1585 = vmatpush.bf16.msra.mxu1 %v2201_v28 }
 0x2b3   : > { %1547 = vmatpush.bf16.msrb.mxu0 %v2198_v29  ;;  %1586 = vmatpush.bf16.msra.mxu1 %v2200_v30 }
 0x2b5   : > { %2061 = vmatmul.msk.bf16.vlgmr.msra.gmra.mxu2 %vm1077_vm1, %v1266_v31  ;;  %v2202_v31 = vld [vmem:[#allocation14 + $0x40] sm:$0xff] }
 0x2b6   : > { %2066 = vmatmul.msk.bf16.vlgmr.msra.gmra.mxu3 %vm1077_vm1, %v1297_v32  ;;  %1624 = vmatpush.bf16.msra.mxu2 %v2203_v26  ;;  %v2205_v32 = vld [vmem:[#allocation14 + $0x58] sm:$0xff] }
 0x2b7   : > { %1663 = vmatpush.bf16.msra.mxu3 %v2205_v32 }
 0x2ba   : > { %1625 = vmatpush.bf16.msra.mxu2 %v2202_v31 }
 0x2bb   : > { %1664 = vmatpush.bf16.msra.mxu3 %v2204_v33 }
 0x2bd   : > { %2071 = vmatmul.msk.bf16.vlgmr.msra.gmra.mxu0 %vm1077_vm1, %v1328_v35 }
 0x31a   : > { %v1112_v36 = vpop.f32.mrf.mxu0 }
 0x31b   : > { %v1135_v37 = vpop.f32.mrf.mxu1 }
 0x31c   : > { %v1136_v43 = vadd.f32 %v1135_v37, %v1112_v36  ;;  %v1434_v36 = vstv %s2072_s17  ;;  %v2207_v37 = vld [vmem:[#allocation14 + $0x68] sm:$0xff] }
 0x31d   : > { %1702 = vmatpush.bf16.msra.mxu0 %v2207_v37 }
 0x321   : > { %1703 = vmatpush.bf16.msra.mxu0 %v2206_v40 }
 0x322   : > { %v1114_v39 = vpop.f32.mrf.mxu0 }
 0x323   : > { %v1137_v45 = vpop.f32.mrf.mxu1 }
 0x324   : > { %v1138_v52 = vadd.f32 %v1137_v45, %v1114_v39 }
 0x328   : > { %v1164_v41 = vpop.f32.mrf.mxu2 }
 0x329   : > { %v1195_v42 = vpop.f32.mrf.mxu3  ;;  %v1169_v47 = vadd.f32 %v1164_v41, %v1136_v43  ;;  %v2208_v41 = vld [vmem:[#allocation14 + $0x70] sm:$0xff] }
 0x32a   : > { %v1226_v46 = vpop.f32.mrf.mxu0 }
 0x32b   : > { %v1200_v49 = vadd.f32 %v1195_v42, %v1169_v47  ;;  %v1257_v56 = vpop.f32.mrf.mxu1  ;;  %v1444_v47 = vld [vmem:[#allocation4] sm:$0xff] }
 0x32d   : > { %v1231_v54 = vadd.f32 %v1226_v46, %v1200_v49 }
 0x32f   : > { %v1262_v57 = vadd.f32 %v1257_v56, %v1231_v54 }
 0x330   : > { %v1166_v50 = vpop.f32.mrf.mxu2 }
 0x331   : > { %v1197_v51 = vpop.f32.mrf.mxu3  ;;  %v1170_v55 = vadd.f32 %v1166_v50, %v1138_v52 }
 0x332   : > { %v1228_v53 = vpop.f32.mrf.mxu0 }
 0x333   : > { %v1201_v58 = vadd.f32 %v1197_v51, %v1170_v55  ;;  %v1259_v3 = vpop.f32.mrf.mxu1  ;;  %v2210_v55 = vld [vmem:[#allocation14 + $0x80] sm:$0xff] }
 0x335   : > { %v1232_v63 = vadd.f32 %v1228_v53, %v1201_v58 }
 0x337   : > { %v1263_v4 = vadd.f32 %v1259_v3, %v1232_v63 }
 0x338   : > { %v1288_v59 = vpop.f32.mrf.mxu2 }
 0x339   : > { %v1319_v60 = vpop.f32.mrf.mxu3  ;;  %v1293_v61 = vadd.f32 %v1288_v59, %v1262_v57 }
 0x33a   : > { %v1350_v62 = vpop.f32.mrf.mxu0 }
 0x33b   : > { %v1324_v0 = vadd.f32 %v1319_v60, %v1293_v61 }
 0x33d   : > { %v1355_v1 = vadd.f32 %v1350_v62, %v1324_v0 }
 0x33f   : > { %v1361_v6 = vmul.f32 %v2320_v2, %v1355_v1 }
 0x340   : > { %v1290_v5 = vpop.f32.mrf.mxu2 }
 0x341   : > { %v1294_v8 = vadd.f32 %v1290_v5, %v1263_v4  ;;  %v1321_v9 = vpop.f32.mrf.mxu3  ;;  %v1367_v12 = vadd.f32 %v2321_v7, %v1361_v6  ;;  %v1713_v4 = vld [vmem:[#allocation4 + $0x14] sm:$0xf] }
 0x342   : > { %v1352_v11 = vpop.f32.mrf.mxu0 }
 0x343   : > { %v1325_v10 = vadd.f32 %v1321_v9, %v1294_v8  ;;  %v1372_v16 = vmul.f32 %v1371_v14, %v1367_v12  ;;  %vm1369_vm15 = vcmp.gt.f32.partialorder %v1367_v12, 0.0 }
 0x345   : > { %v1356_v13 = vadd.f32 %v1352_v11, %v1325_v10  ;;  %v1374_v19 = vsel %vm1369_vm15, %v1367_v12, %v1372_v16  ;;  %v1752_v11 = vld [vmem:[#allocation4 + $0x18] sm:$0xf] }
 0x347   : > { %v1362_v15 = vmul.f32 %v2320_v2, %v1356_v13 }
 0x349   : > { %v1368_v17 = vadd.f32 %v2321_v7, %v1362_v15 }
 0x34b   : > { %vm1370_vm0 = vcmp.gt.f32.partialorder %v1368_v17, 0.0  ;;  %v1373_v18 = vmul.f32 %v1371_v14, %v1368_v17 }
 0x34d   : > { %v1375_v20 = vsel %vm1370_vm0, %v1368_v17, %v1373_v18 }
 0x34e   : > { %v1378_v21 = vpack.c.bf16 %v1375_v20, %v1374_v19 }
 0x350   : > { %2090 = vmatmul.msk.bf16.vlgmr.msrb.gmra.mxu1 %vm740_vm5, %v1378_v21 }
 0x351   : > { %1741 = vmatpush.bf16.msrb.mxu1 %v2209_v38 }
 0x355   : > { %1742 = vmatpush.bf16.msrb.mxu1 %v2208_v41 }
 0x3cd   : > { %v1427_v35 = vpop.f32.mrf.mxu1 }
 0x3ce   : > { %v1428_v39 = vadd.f32 %v2322_v34, %v1427_v35 }
 0x3d0   : > { %vm1432_vm1 = vcmp.gt.f32.partialorder %v1428_v39, 0.0  ;;  %v1435_v42 = vmul.f32 %v1434_v36, %v1428_v39 }
 0x3d2   : > { %v1437_v43 = vsel %vm1432_vm1, %v1428_v39, %v1435_v42  ;;  %v2323_v42 = vld [vmem:[#allocation16] ss:$0 sm:$0xff] }
 0x3d3   : > { %1441 = vst.msk [vmem:[#allocation4 + $0x8] sm:$0xff] %vm1052_vm2, %v1437_v43 }
 0x3d5   : > { %v1429_v44 = vpop.f32.mrf.mxu1 }
 0x3d6   : > { %v1430_v45 = vadd.f32 %v2322_v34, %v1429_v44 }
 0x3d8   : > { %vm1433_vm3 = vcmp.gt.f32.partialorder %v1430_v45, 0.0  ;;  %v1436_v46 = vmul.f32 %v1434_v36, %v1430_v45 }
 0x3da   : > { %v1438_v49 = vsel %vm1433_vm3, %v1430_v45, %v1436_v46  ;;  %v1451_v50 = vld [vmem:[#allocation4 + $0x4] sm:$0xff]  ;;  %v1452_v51 = vld [vmem:[#allocation4 + $0xc] sm:$0xf] }
 0x3db   : > { %v1445_v52 = vld [vmem:[#allocation4 + $0x8] sm:$0xf]  ;;  %1443 = vst.msk [vmem:[#allocation4 + $0x10] sm:$0xf] %vm1442_vm4, %v1438_v49  ;;  %v1453_v53 = vpack.c.bf16 %v1452_v51, %v1451_v50  ;;  %v2324_v46 = vld [vmem:[#allocation17] ss:$0 sm:$0xff]  ;;  %v1804_v51 = vstv %s2073_s6 }
 0x3dc   : > { %v1446_v54 = vpack.c.bf16 %v1445_v52, %v1444_v47  ;;  %v1517_v56 = vld [vmem:[#allocation4 + $0x6] sm:$0xff] }
 0x3dd   : > { %2099 = vmatmul.msk.bf16.vlgmr.msrb.gmra.mxu2 %vm1052_vm2, %v1453_v53  ;;  %v1556_v58 = vld [vmem:[#allocation4 + $0x7] sm:$0xff] }
 0x3de   : > { %2108 = vmatmul.msk.bf16.vlgmr.msrb.gmra.mxu3 %vm1052_vm2, %v1446_v54  ;;  %1780 = vmatpush.bf16.msrb.mxu2 %v2211_v48  ;;  %v1595_v1 = vld [vmem:[#allocation4 + $0x8] sm:$0xff] }
 0x3e2   : > { %v1518_v57 = vld [vmem:[#allocation4 + $0xe] sm:$0xf]  ;;  %1781 = vmatpush.bf16.msrb.mxu2 %v2210_v55  ;;  %v1674_v6 = vld [vmem:[#allocation4 + $0x12] sm:$0xf] }
 0x3e3   : > { %v1557_v59 = vld [vmem:[#allocation4 + $0xf] sm:$0xf]  ;;  %v1519_v60 = vpack.c.bf16 %v1518_v57, %v1517_v56 }
 0x3e4   : > { %v1558_v61 = vpack.c.bf16 %v1557_v59, %v1556_v58  ;;  %v1596_v62 = vld [vmem:[#allocation4 + $0x10] sm:$0xf] }
 0x3e5   : > { %2117 = vmatmul.msk.bf16.vlgmr.msrb.gmra.mxu0 %vm1052_vm2, %v1519_v60  ;;  %v1634_v63 = vld [vmem:[#allocation4 + $0x9] sm:$0xff]  ;;  %v1635_v0 = vld [vmem:[#allocation4 + $0x11] sm:$0xf]  ;;  %v1597_v2 = vpack.c.bf16 %v1596_v62, %v1595_v1 }
 0x3e6   : > { %2126 = vmatmul.msk.bf16.vlgmr.msra.gmra.mxu1 %vm1052_vm2, %v1558_v61  ;;  %v1636_v3 = vpack.c.bf16 %v1635_v0, %v1634_v63  ;;  %v1673_v5 = vld [vmem:[#allocation4 + $0xa] sm:$0xff] }
 0x3e7   : > { %v1712_v7 = vld [vmem:[#allocation4 + $0xc] sm:$0xff]  ;;  %v1675_v8 = vpack.c.bf16 %v1674_v6, %v1673_v5 }
 0x3e8   : > { %v1714_v9 = vpack.c.bf16 %v1713_v4, %v1712_v7  ;;  %v1751_v10 = vld [vmem:[#allocation4 + $0x10] sm:$0xff] }
 0x3e9   : > { %v1753_v12 = vpack.c.bf16 %v1752_v11, %v1751_v10 }
 0x3ed   : > { %2135 = vmatmul.msk.bf16.vlgmr.msra.gmra.mxu2 %vm1052_vm2, %v1597_v2 }
 0x3ee   : > { %2144 = vmatmul.msk.bf16.vlgmr.msra.gmra.mxu3 %vm1052_vm2, %v1636_v3 }
 0x3f5   : > { %2153 = vmatmul.msk.bf16.vlgmr.msra.gmra.mxu0 %vm1052_vm2, %v1675_v8 }
 0x3f6   : > { %2162 = vmatmul.msk.bf16.vlgmr.msrb.gmra.mxu1 %vm1052_vm2, %v1714_v9 }
 0x3fd   : > { %2171 = vmatmul.msk.bf16.vlgmr.msrb.gmra.mxu2 %vm1052_vm2, %v1753_v12 }
 0x460   : > { %v1483_v13 = vpop.f32.mrf.mxu2 }
 0x461   : > { %v1512_v14 = vpop.f32.mrf.mxu3 }
 0x462   : > { %v1549_v15 = vpop.f32.mrf.mxu0  ;;  %v1513_v18 = vadd.f32 %v1512_v14, %v1483_v13 }
 0x463   : > { %v1588_v16 = vpop.f32.mrf.mxu1 }
 0x464   : > { %v1554_v20 = vadd.f32 %v1549_v15, %v1513_v18 }
 0x466   : > { %v1593_v24 = vadd.f32 %v1588_v16, %v1554_v20 }
 0x468   : > { %v1485_v17 = vpop.f32.mrf.mxu2 }
 0x469   : > { %v1514_v19 = vpop.f32.mrf.mxu3 }
 0x46a   : > { %v1551_v21 = vpop.f32.mrf.mxu0  ;;  %v1515_v23 = vadd.f32 %v1514_v19, %v1485_v17 }
 0x46b   : > { %v1590_v25 = vpop.f32.mrf.mxu1 }
 0x46c   : > { %v1555_v28 = vadd.f32 %v1551_v21, %v1515_v23 }
 0x46e   : > { %v1594_v32 = vadd.f32 %v1590_v25, %v1555_v28 }
 0x470   : > { %v1627_v22 = vpop.f32.mrf.mxu2 }
 0x471   : > { %v1632_v26 = vadd.f32 %v1627_v22, %v1593_v24  ;;  %v1666_v27 = vpop.f32.mrf.mxu3 }
 0x472   : > { %v1705_v30 = vpop.f32.mrf.mxu0 }
 0x473   : > { %v1671_v29 = vadd.f32 %v1666_v27, %v1632_v26  ;;  %v1744_v35 = vpop.f32.mrf.mxu1 }
 0x475   : > { %v1710_v34 = vadd.f32 %v1705_v30, %v1671_v29 }
 0x477   : > { %v1749_v38 = vadd.f32 %v1744_v35, %v1710_v34 }
 0x478   : > { %v1629_v31 = vpop.f32.mrf.mxu2 }
 0x479   : > { %v1633_v33 = vadd.f32 %v1629_v31, %v1594_v32  ;;  %v1668_v36 = vpop.f32.mrf.mxu3 }
 0x47a   : > { %v1707_v40 = vpop.f32.mrf.mxu0 }
 0x47b   : > { %v1672_v37 = vadd.f32 %v1668_v36, %v1633_v33  ;;  %v1746_v44 = vpop.f32.mrf.mxu1 }
 0x47d   : > { %v1711_v43 = vadd.f32 %v1707_v40, %v1672_v37 }
 0x47f   : > { %v1750_v47 = vadd.f32 %v1746_v44, %v1711_v43 }
 0x480   : > { %v1783_v39 = vpop.f32.mrf.mxu2 }
 0x481   : > { %v1788_v41 = vadd.f32 %v1783_v39, %v1749_v38 }
 0x483   : > { %v1794_v45 = vmul.f32 %v2323_v42, %v1788_v41 }
 0x485   : > { %v1800_v50 = vadd.f32 %v2324_v46, %v1794_v45 }
 0x487   : > { %v1805_v54 = vmul.f32 %v1804_v51, %v1800_v50  ;;  %vm1802_vm2 = vcmp.gt.f32.partialorder %v1800_v50, 0.0 }
 0x488   : > { %v1785_v48 = vpop.f32.mrf.mxu2 }
 0x489   : > { %v1789_v49 = vadd.f32 %v1785_v48, %v1750_v47  ;;  %v1807_v57 = vsel %vm1802_vm2, %v1800_v50, %v1805_v54 }
 0x48b   : > { %v1795_v52 = vmul.f32 %v2323_v42, %v1789_v49 }
 0x48d   : > { %v1801_v53 = vadd.f32 %v2324_v46, %v1795_v52 }
 0x48f   : > { %vm1803_vm5 = vcmp.gt.f32.partialorder %v1801_v53, 0.0  ;;  %v1806_v55 = vmul.f32 %v1804_v51, %v1801_v53 }
 0x491   : > { %v1808_v56 = vsel %vm1803_vm5, %v1801_v53, %v1806_v55 }
 0x492   : > { %v1809_v58 = vsel %vm783_vm6, %v1808_v56, -inf }
 0x493   : > { %v1810_v59 = vmax.f32 %v1807_v57, %v1809_v58 }
 0x495   : > { %v1811_v60 = vrot.slane %v1810_v59, 4 }
 0x497   : > { %v1812_v61 = vmax.f32 %v1810_v59, %v1811_v60 }
 0x499   : > { %v1813_v62 = vrot.slane %v1812_v61, 2 }
 0x49b   : > { %v1814_v63 = vmax.f32 %v1812_v61, %v1813_v62 }
 0x49d   : > { %v1815_v0 = vrot.slane %v1814_v63, 1 }
 0x49f   : > { %v1816_v1 = vmax.f32 %v1814_v63, %v1815_v0 }
 0x4a1   : > { %1817 = vst [vmem:[%s685_s19] sm:$0x1] %v1816_v1 }
 0x4a2 PF: > { %s2954_s21 = sld [smem:[#allocation26_spill]] }
 0x4a8   : > { %s33_s24 = sadd.s32 1, %s2954_s21  }
 0x4a9   : > { %p30_p7 = scmp.ge.s32.totalorder %s33_s24, 4  }
 0x4ab   :  { %32 = sbr.rel (!%p30_p7) target bundleno = 14 (0xe), region = 180 }
 0x4b0   :  { %1835 = vsyncpa [#allocation6], 1 }
 0x4b1   :  { %1837 = vsyncpa [#allocation6 + $0x1], 1 }
 0x4b2   :  { %1838 = vsyncpa [#allocation9], 1 }
 0x4b3   :  { %1839 = vsyncpa [#allocation12], 1 }
 0x4b4   :  { %1840 = vsyncpa [#allocation15], 1 }
 0x4b5   :  { %1841 = vsyncpa [#allocation18], 1 }
 0x4b6   :  { %1842 = vsyncpa [#allocation7], 1 }
 0x4b7   :  { %1844 = vsyncpa [#allocation7 + $0x1], 1 }

// kernel: _lambda_.4
= control target key start
LH: loop header
LB: loop body
LE: loop exit
PB: predicated region body
PF: predicated region fallthrough
CT: control target
= control target key end

     0   :  { %s4865_s0 = inlined_call_operand.vmem [shape: f32[2,16,33], index: 0, kind: input, shape index: {}]   ;;  %s4866_s1 = inlined_call_operand.hbm [shape: bf16[33,6], index: 1, kind: input, shape index: {}]   ;;  %s4867_s2 = inlined_call_operand.hbm [shape: f32[1,6], index: 2, kind: input, shape index: {}]   ;;  %s4868_s3 = inlined_call_operand.hbm [shape: bf16[11,6,32], index: 3, kind: input, shape index: {}]   ;;  %s4869_s4 = inlined_call_operand.hbm [shape: f32[1,32], index: 4, kind: input, shape index: {}]   ;;  %s4870_s5 = inlined_call_operand.hbm [shape: f32[1,32], index: 5, kind: input, shape index: {}]   ;;  %s4871_s6 = inlined_call_operand.hbm [shape: bf16[32,12], index: 6, kind: input, shape index: {}]   ;;  %s4872_s7 = inlined_call_operand.hbm [shape: f32[1,12], index: 7, kind: input, shape index: {}]   ;;  %s4873_s8 = inlined_call_operand.hbm [shape: bf16[11,12,64], index: 8, kind: input, shape index: {}]   ;;  %s4874_s9 = inlined_call_operand.hbm [shape: f32[1,64], index: 9, kind: input, shape index: {}]   ;;  %s4875_s10 = inlined_call_operand.hbm [shape: f32[1,64], index: 10, kind: input, shape index: {}]   ;;  %s4876_s11 = inlined_call_operand.hbm [shape: bf16[64,12], index: 11, kind: input, shape index: {}]   ;;  %s4877_s12 = inlined_call_operand.hbm [shape: f32[1,12], index: 12, kind: input, shape index: {}]   ;;  %s4878_s13 = inlined_call_operand.hbm [shape: bf16[11,12,64], index: 13, kind: input, shape index: {}]   ;;  %s4879_s14 = inlined_call_operand.hbm [shape: f32[1,64], index: 14, kind: input, shape index: {}]   ;;  %s4880_s15 = inlined_call_operand.hbm [shape: f32[1,64], index: 15, kind: input, shape index: {}]   ;;  %s4881_s16 = inlined_call_operand.hbm [shape: bf16[64,25], index: 16, kind: input, shape index: {}]   ;;  %s4882_s17 = inlined_call_operand.hbm [shape: f32[1,25], index: 17, kind: input, shape index: {}]   ;;  %s4883_s18 = inlined_call_operand.hbm [shape: bf16[11,25,128], index: 18, kind: input, shape index: {}]   ;;  %s4884_s19 = inlined_call_operand.hbm [shape: f32[1,128], index: 19, kind: input, shape index: {}]   ;;  %s4885_s20 = inlined_call_operand.hbm [shape: f32[1,128], index: 20, kind: input, shape index: {}]   ;;  %s4886_s21 = inlined_call_operand.vmem [shape: f32[4,2], index: 21, kind: input, shape index: {}]   ;;  %s4887_s22 = inlined_call_operand.vmem [shape: f32[2,1,128], index: 22, kind: output, shape index: {}]  }
   0x1   :  { %4892 = sst [smem:[#allocation54_spill]] %s4865_s0 }
   0x2   :  { %4893 = sst [smem:[#allocation55_spill]] %s4866_s1 }
   0x3   :  { %4894 = sst [smem:[#allocation56_spill]] %s4867_s2 }
   0x4   :  { %4895 = sst [smem:[#allocation57_spill]] %s4868_s3 }
   0x5   :  { %4896 = sst [smem:[#allocation58_spill]] %s4869_s4 }
   0x6   :  { %4897 = sst [smem:[#allocation59_spill]] %s4870_s5 }
   0x7   :  { %4898 = sst [smem:[#allocation60_spill]] %s4871_s6 }
   0x8   :  { %4899 = sst [smem:[#allocation61_spill]] %s4873_s8 }
   0x9   :  { %4900 = sst [smem:[#allocation62_spill]] %s4887_s22 }
   0xa   :  { %27 = vsyncpa [#allocation7], 0 }
   0xb   :  { %28 = vsyncpa [#allocation10], 0 }
   0xc   :  { %29 = vsyncpa [#allocation13], 0 }
   0xd   :  { %30 = vsyncpa [#allocation16], 0 }
   0xe   :  { %31 = vsyncpa [#allocation19], 0 }
   0xf   :  { %32 = vsyncpa [#allocation22], 0 }
  0x10   :  { %33 = vsyncpa [#allocation25], 0 }
  0x11   :  { %34 = vsyncpa [#allocation28], 0 }
  0x12   :  { %35 = vsyncpa [#allocation31], 0 }
  0x13   :  { %36 = vsyncpa [#allocation34], 0 }
  0x14   :  { %37 = vsyncpa [#allocation37], 0 }
  0x15   :  { %38 = vsyncpa [#allocation8], 0  ;;  %s4493_s3 = smov 0  }
  0x16 LB: > { %4901 = sst [smem:[#allocation51_spill]] %s4350_s3  ;;  %s4502_s0 = sadd.s32 4294967295, %s4350_s3   ;;  %s4350_s3 = sphi %s4493_s3, %s44_s3  }
  0x17   : > { %s4902_s30 = sld [smem:[#allocation56_spill]]  ;;  %p3060_p0 = scmp.ge.s32.totalorder %s4350_s3, 1 }
  0x18   : > { %4903 = sst [smem:[#allocation52_spill]] %s4502_s0  ;;  %p542_p1 = scmp.lt.s32.totalorder %s4350_s3, 3 }
  0x19   : > { %p3593_p2 = scmp.eq.s32.totalorder %s4502_s0, 0  ;;  %s4352_s1 = smov [#allocation9]  }
  0x1a   : > { %p4507_p3 = pnand %p3060_p0, %p542_p1  ;;  %s570_s5 = sshll.u32 %s4352_s1, 4  ;;  %s571_s5 = int_to_ptr.vmem [resolvable:$true] %s570_s5 }
  0x1b   : > { %s4906_s25 = sld [smem:[#allocation58_spill]]  ;;  %s4353_s27 = smov [#allocation12]  }
  0x1c   : > { %s4904_s23 = scalar_select %p4507_p3, 1, 0 }
  0x1d   : > { %s568_s4 = sshll.u32 %s4902_s30, 4  ;;  %p3529_p4 = pneg %p4507_p3  ;;  %s569_s4 = int_to_ptr.hbm [resolvable:$true] %s568_s4 }
  0x1e   : > { %4905 = sst [smem:[#allocation53_spill]] %s4904_s23  ;;  %s596_s28 = sshll.u32 %s4353_s27, 4  ;;  %s597_s28 = int_to_ptr.vmem [resolvable:$true] %s596_s28 }
  0x1f   : > { %p4518_p5 = pnand %p3593_p2, %p3529_p4  ;;  %s4908_s1 = sld [smem:[#allocation60_spill]] }
  0x20   : > { %s4354_s24 = smov [#allocation15]   ;;  %s4909_s8 = sld [smem:[#allocation61_spill]] }
  0x21   : > { %s594_s26 = sshll.u32 %s4906_s25, 4  ;;  %s619_s6 = sshll.u32 %s4354_s24, 4  ;;  %s595_s26 = int_to_ptr.hbm [resolvable:$true] %s594_s26  ;;  %s620_s6 = int_to_ptr.vmem [resolvable:$true] %s619_s6 }
  0x22   : > { %3535 = dma.hbm_to_vmem [thread:$0]  (!%p4518_p5), %s569_s4, 16, %s571_s5, [#allocation10]  }
  0x23   : > { %3541 = dma.hbm_to_vmem [thread:$0]  (!%p4518_p5), %s595_s26, 16, %s597_s28, [#allocation13]  }
  0x24   : > { %s4355_s27 = smov 64   ;;  %s4356_s23 = smov 4  }
  0x25   : > { %s617_s3 = sshll.u32 %s4908_s1, 4  ;;  %s670_s26 = sshll.u32 %s4875_s10, 4  ;;  %s618_s3 = int_to_ptr.hbm [resolvable:$true] %s617_s3  ;;  %s671_s26 = int_to_ptr.hbm [resolvable:$true] %s670_s26 }
  0x26   : > { %s643_s0 = sshll.u32 %s4909_s8, 4  ;;  %s4357_s28 = smov [#allocation18]   ;;  %s644_s0 = int_to_ptr.hbm [resolvable:$true] %s643_s0 }
  0x27   : > { %3547 = dma.hbm_to_vmem [thread:$0]  (!%p4518_p5), %s618_s3, 256, %s620_s6, [#allocation16], %s4355_s27, %s4355_s27, %s4356_s23  }
  0x28   : > { %s645_s29 = sshll.u32 %s4357_s28, 4  ;;  %s4358_s22 = smov [#allocation21]   ;;  %s646_s29 = int_to_ptr.vmem [resolvable:$true] %s645_s29 }
  0x29   : > { %3553 = dma.hbm_to_vmem [thread:$0]  (!%p4518_p5), %s644_s0, 1408, %s646_s29, [#allocation19], %s4355_s27, %s4355_s27, %s4356_s23  }
  0x2a   : > { %s672_s30 = sshll.u32 %s4358_s22, 4  ;;  %s696_s3 = sshll.u32 %s4877_s12, 4  ;;  %s673_s30 = int_to_ptr.vmem [resolvable:$true] %s672_s30  ;;  %s697_s3 = int_to_ptr.hbm [resolvable:$true] %s696_s3 }
  0x2b   : > { %3559 = dma.hbm_to_vmem [thread:$0]  (!%p4518_p5), %s671_s26, 16, %s673_s30, [#allocation22]  }
  0x2c   : > { %s722_s4 = sshll.u32 %s4879_s14, 4  ;;  %s4359_s5 = smov [#allocation24]   ;;  %s723_s4 = int_to_ptr.hbm [resolvable:$true] %s722_s4 }
  0x2d   : > { %s698_s28 = sshll.u32 %s4359_s5, 4  ;;  %s4360_s0 = smov [#allocation27]   ;;  %s699_s28 = int_to_ptr.vmem [resolvable:$true] %s698_s28 }
  0x2e   : > { %3565 = dma.hbm_to_vmem [thread:$0]  (!%p4518_p5), %s697_s3, 16, %s699_s28, [#allocation25]  }
  0x2f   : > { %s724_s29 = sshll.u32 %s4360_s0, 4  ;;  %s745_s24 = sshll.u32 %s4881_s16, 4  ;;  %s725_s29 = int_to_ptr.vmem [resolvable:$true] %s724_s29  ;;  %s746_s24 = int_to_ptr.hbm [resolvable:$true] %s745_s24 }
  0x30   : > { %3571 = dma.hbm_to_vmem [thread:$0]  (!%p4518_p5), %s723_s4, 16, %s725_s29, [#allocation28]  }
  0x31   : > { %s771_s6 = sshll.u32 %s4883_s18, 4  ;;  %s4361_s25 = smov [#allocation30]   ;;  %s772_s6 = int_to_ptr.hbm [resolvable:$true] %s771_s6 }
  0x32   : > { %s747_s5 = sshll.u32 %s4361_s25, 4  ;;  %s4362_s3 = smov [#allocation33]   ;;  %s748_s5 = int_to_ptr.vmem [resolvable:$true] %s747_s5 }
  0x33   : > { %3577 = dma.hbm_to_vmem [thread:$0]  (!%p4518_p5), %s746_s24, 512, %s748_s5, [#allocation31], %s4355_s27, %s4355_s27, %s4356_s23  }
  0x34   : > { %s773_s28 = sshll.u32 %s4362_s3, 4  ;;  %s4910_s1 = sld [smem:[#allocation55_spill]]  ;;  %s774_s28 = int_to_ptr.vmem [resolvable:$true] %s773_s28 }
  0x35   : > { %3583 = dma.hbm_to_vmem [thread:$0]  (!%p4518_p5), %s772_s6, 2816, %s774_s28, [#allocation34], %s4355_s27, %s4355_s27, %s4356_s23  }
  0x36   : > { %s4911_s30 = sld [smem:[#allocation57_spill]]  ;;  %s4363_s8 = smov [#allocation6]  }
  0x37   : > { %s555_s24 = sshll.u32 %s4363_s8, 4  ;;  %s4364_s5 = smov [#allocation11]   ;;  %s556_s24 = int_to_ptr.vmem [resolvable:$true] %s555_s24 }
  0x38   : > { %s581_s3 = sshll.u32 %s4364_s5, 4  ;;  %s632_s29 = sshll.u32 %s4872_s7, 4  ;;  %s582_s3 = int_to_ptr.vmem [resolvable:$true] %s581_s3  ;;  %s633_s29 = int_to_ptr.hbm [resolvable:$true] %s632_s29 }
  0x39   : > { %s4365_s26 = smov [#allocation14]   ;;  %s658_s22 = sshll.u32 %s4874_s9, 4  ;;  %s659_s22 = int_to_ptr.hbm [resolvable:$true] %s658_s22 }
  0x3a   : > { %s553_s4 = sshll.u32 %s4910_s1, 4  ;;  %s4912_s1 = sld [smem:[#allocation59_spill]]  ;;  %s554_s4 = int_to_ptr.hbm [resolvable:$true] %s553_s4 }
  0x3b   : > { %3532 = dma.hbm_to_vmem [thread:$0]  (!%p4518_p5), %s554_s4, 320, %s556_s24, [#allocation7], %s4355_s27, %s4355_s27, %s4356_s23  }
  0x3c   : > { %s579_s25 = sshll.u32 %s4911_s30, 4  ;;  %s608_s4 = sshll.u32 %s4365_s26, 4  ;;  %s580_s25 = int_to_ptr.hbm [resolvable:$true] %s579_s25  ;;  %s609_s4 = int_to_ptr.vmem [resolvable:$true] %s608_s4 }
  0x3d   : > { %3538 = dma.hbm_to_vmem [thread:$0]  (!%p4518_p5), %s580_s25, 704, %s582_s3, [#allocation10], %s4355_s27, %s4355_s27, %s4356_s23  }
  0x3e   : > { %s4366_s30 = smov [#allocation17]   ;;  %s4367_s8 = smov [#allocation20]  }
  0x3f   : > { %s634_s24 = sshll.u32 %s4366_s30, 4  ;;  %s660_s28 = sshll.u32 %s4367_s8, 4  ;;  %s635_s24 = int_to_ptr.vmem [resolvable:$true] %s634_s24  ;;  %s661_s28 = int_to_ptr.vmem [resolvable:$true] %s660_s28 }
  0x40   : > { %s606_s6 = sshll.u32 %s4912_s1, 4  ;;  %s681_s1 = sshll.u32 %s4876_s11, 4  ;;  %s607_s6 = int_to_ptr.hbm [resolvable:$true] %s606_s6  ;;  %s682_s1 = int_to_ptr.hbm [resolvable:$true] %s681_s1 }
  0x41   : > { %3544 = dma.hbm_to_vmem [thread:$0]  (!%p4518_p5), %s607_s6, 16, %s609_s4, [#allocation13]  }
  0x42   : > { %3550 = dma.hbm_to_vmem [thread:$0]  (!%p4518_p5), %s633_s29, 16, %s635_s24, [#allocation16]  }
  0x43   : > { %3556 = dma.hbm_to_vmem [thread:$0]  (!%p4518_p5), %s659_s22, 16, %s661_s28, [#allocation19]  }
  0x44   : > { %s4368_s6 = smov [#allocation23]   ;;  %s707_s5 = sshll.u32 %s4878_s13, 4  ;;  %s708_s5 = int_to_ptr.hbm [resolvable:$true] %s707_s5 }
  0x45   : > { %s683_s26 = sshll.u32 %s4368_s6, 4  ;;  %s734_s0 = sshll.u32 %s4880_s15, 4  ;;  %s684_s26 = int_to_ptr.vmem [resolvable:$true] %s683_s26  ;;  %s735_s0 = int_to_ptr.hbm [resolvable:$true] %s734_s0 }
  0x46   : > { %3562 = dma.hbm_to_vmem [thread:$0]  (!%p4518_p5), %s682_s1, 512, %s684_s26, [#allocation22], %s4355_s27, %s4355_s27, %s4356_s23  }
  0x47   : > { %s4369_s25 = smov [#allocation26]   ;;  %s4370_s3 = smov [#allocation29]  }
  0x48   : > { %s709_s22 = sshll.u32 %s4369_s25, 4  ;;  %s736_s8 = sshll.u32 %s4370_s3, 4  ;;  %s710_s22 = int_to_ptr.vmem [resolvable:$true] %s709_s22  ;;  %s737_s8 = int_to_ptr.vmem [resolvable:$true] %s736_s8 }
  0x49   : > { %3568 = dma.hbm_to_vmem [thread:$0]  (!%p4518_p5), %s708_s5, 1408, %s710_s22, [#allocation25], %s4355_s27, %s4355_s27, %s4356_s23  }
  0x4a   : > { %s760_s1 = sshll.u32 %s4882_s17, 4  ;;  %s786_s30 = sshll.u32 %s4884_s19, 4  ;;  %s761_s1 = int_to_ptr.hbm [resolvable:$true] %s760_s1  ;;  %s787_s30 = int_to_ptr.hbm [resolvable:$true] %s786_s30 }
  0x4b   : > { %3574 = dma.hbm_to_vmem [thread:$0]  (!%p4518_p5), %s735_s0, 16, %s737_s8, [#allocation28]  }
  0x4c   : > { %s4371_s29 = smov [#allocation32]   ;;  %s4372_s23 = smov [#allocation35]  }
  0x4d   : > { %s762_s24 = sshll.u32 %s4371_s29, 4  ;;  %s788_s27 = sshll.u32 %s4372_s23, 4  ;;  %s763_s24 = int_to_ptr.vmem [resolvable:$true] %s762_s24  ;;  %s789_s27 = int_to_ptr.vmem [resolvable:$true] %s788_s27 }
  0x4e   : > { %3580 = dma.hbm_to_vmem [thread:$0]  (!%p4518_p5), %s761_s1, 16, %s763_s24, [#allocation31]  }
  0x4f   : > { %s798_s22 = sshll.u32 %s4885_s20, 4  ;;  %s810_s8 = sshll.u32 %s4886_s21, 4  ;;  %s799_s22 = int_to_ptr.hbm [resolvable:$true] %s798_s22  ;;  %s811_s8 = int_to_ptr.vmem [resolvable:$true] %s810_s8 }
  0x50   : > { %3586 = dma.hbm_to_vmem [thread:$0]  (!%p4518_p5), %s787_s30, 16, %s789_s27, [#allocation34]  }
  0x51   : > { %s4373_s28 = smov [#allocation36]   ;;  %s4374_s1 = smov [#allocation38]  }
  0x52   : > { %s800_s6 = sshll.u32 %s4373_s28, 4  ;;  %831 = sbr.rel (%p4507_p3) target bundleno = 1463 (0x5b7), region = 108  ;;  %s801_s6 = int_to_ptr.vmem [resolvable:$true] %s800_s6 }
  0x53   : > { %3589 = dma.hbm_to_vmem [thread:$0]  (!%p4518_p5), %s799_s22, 16, %s801_s6, [#allocation37]  }
  0x54   : > { %3592 = dma.vmem_to_smem (!%p4518_p5), %s811_s8, 64, %s4374_s1, [#allocation8]  }
  0x55   : > { %s4914_s4 = sld [smem:[#allocation52_spill]] (!%p4507_p3) }
  0x57   : > { %4301 = dma.done.wait (%p3593_p2), [#allocation7], 320  }
  0x58   : > { %4303 = vsyncadd (%p3593_p2), [#allocation7], 4294966976 }
  0x59   : > { %4305 = dma.done.wait (%p3593_p2), [#allocation10], 720  }
  0x5a   : > { %4307 = vsyncadd (%p3593_p2), [#allocation10], 4294966576 }
  0x5b   : > { %4309 = dma.done.wait (%p3593_p2), [#allocation13], 32  }
  0x5c   : > { %4311 = vsyncadd (%p3593_p2), [#allocation13], 4294967264 }
  0x5d   : > { %4313 = dma.done.wait (%p3593_p2), [#allocation16], 272  }
  0x5e   : > { %4315 = vsyncadd (%p3593_p2), [#allocation16], 4294967024 }
  0x5f   : > { %4317 = dma.done.wait (%p3593_p2), [#allocation19], 1424  }
  0x60   : > { %4319 = vsyncadd (%p3593_p2), [#allocation19], 4294965872 }
  0x61   : > { %4321 = dma.done.wait (%p3593_p2), [#allocation22], 528  }
  0x62   : > { %4323 = vsyncadd (%p3593_p2), [#allocation22], 4294966768 }
  0x63   : > { %4325 = dma.done.wait (%p3593_p2), [#allocation25], 1424  }
  0x64   : > { %4327 = vsyncadd (%p3593_p2), [#allocation25], 4294965872 }
  0x65   : > { %4329 = dma.done.wait (%p3593_p2), [#allocation28], 32  }
  0x66   : > { %4331 = vsyncadd (%p3593_p2), [#allocation28], 4294967264 }
  0x67   : > { %4333 = dma.done.wait (%p3593_p2), [#allocation31], 528  }
  0x68   : > { %4335 = vsyncadd (%p3593_p2), [#allocation31], 4294966768 }
  0x69   : > { %4337 = dma.done.wait (%p3593_p2), [#allocation34], 2832  }
  0x6a   : > { %4339 = vsyncadd (%p3593_p2), [#allocation34], 4294964464 }
  0x6b   : > { %4341 = dma.done.wait (%p3593_p2), [#allocation37], 16  }
  0x6c   : > { %4343 = vsyncadd (%p3593_p2), [#allocation37], 4294967280 }
  0x6d   : > { %4345 = dma.done.wait (%p3593_p2), [#allocation8], 64  }
  0x6e   : > { %4347 = vsyncadd (%p3593_p2), [#allocation8], 4294967232 }
  0x6f   : > { %938 = sfence }
  0x70   : > { %v1011_v0 = vld [vmem:[#allocation6 + $0x10] sm:$0x1]  ;;  %vm1035_vm0 = vcmask 1040384   ;;  %p993_p6 = scmp.lt.s32.totalorder %s4914_s4, 1  ;;  %v4375_v2 = vmov 0   ;;  %v3390_v6 = vld [vmem:[#allocation6 + $0x8] sm:$0xff] }
  0x71   : > { %v1025_v1 = vunpack.c.l.b16 %v1011_v0  ;;  %v1037_v3 = vsel %vm1035_vm0, 65535, %v4375_v2  ;;  %s4915_s24 = sld [smem:[#allocation54_spill]]  ;;  %v3389_v7 = vld [vmem:[#allocation6] sm:$0xff]  ;;  %vm1031_vm1 = vcmask 269312   ;;  %vm1062_vm2 = vcmask 48128  }
  0x72   : > { %s4919_s4 = smov (!%p993_p6, %s4914_s4), 1  ;;  %v4376_v11 = vmov 0.0   ;;  %v1072_v12 = vld [vmem:[#allocation11] sm:$0x7]  ;;  %vm1080_vm3 = vcmask 1042432   ;;  %s1004_s27 = sld [smem:[#allocation38]] }
  0x73   : > { %v1028_v4 = vpack.c.b16 %v1025_v1, %v1025_v1  ;;  %s3388_s2 = sshll.u32 %s4919_s4, 4  ;;  %1063 = vst.msk [vmem:[#allocation2] sm:$0xff] %vm1062_vm2, %v4376_v11  ;;  %v1102_v13 = vsel %vm1080_vm3, %v1072_v12, 0  ;;  %v1076_v17 = vld [vmem:[#allocation11 + $0x4] sm:$0x7]  ;;  %s3107_s5 = sld [smem:[#allocation38 + $0x1]] }
  0x74   : > { %1064 = vst.msk [vmem:[#allocation2 + $0x8] sm:$0xff] %vm1062_vm2, %v4376_v11  ;;  %1111 = vmatpush.bf16.msra.mxu2 %v1102_v13  ;;  %v1082_v18 = vsel %vm1080_vm3, %v1076_v17, 0  ;;  %v1122_v19 = vld [vmem:[#allocation11 + $0x8] sm:$0x7]  ;;  %v1176_v20 = vld [vmem:[#allocation11 + $0x10] sm:$0x7] }
  0x75   : > { %v1039_v5 = vand.u32 %v1037_v3, %v1028_v4  ;;  %1065 = vst.msk [vmem:[#allocation2 + $0x20] sm:$0xff] %vm1062_vm2, %v4376_v11  ;;  %1091 = vmatpush.bf16.msra.mxu1 %v1082_v18  ;;  %v1230_v21 = vld [vmem:[#allocation11 + $0x18] sm:$0x7]  ;;  %v1127_v22 = vsel %vm1080_vm3, %v1122_v19, 0  ;;  %v1181_v23 = vsel %vm1080_vm3, %v1176_v20, 0  ;;  %vm1403_vm8 = vcmask 261120  }
  0x76   : > { %1066 = vst.msk [vmem:[#allocation2 + $0x28] sm:$0xff] %vm1062_vm2, %v4376_v11  ;;  %v1235_v24 = vsel %vm1080_vm3, %v1230_v21, 0  ;;  %1136 = vmatpush.bf16.msra.mxu3 %v1127_v22  ;;  %v1203_v25 = vld [vmem:[#allocation11 + $0x14] sm:$0x7]  ;;  %v1149_v27 = vld [vmem:[#allocation11 + $0xc] sm:$0x7] }
  0x77   : > { %1046 = vmatpush.bf16.msra.mxu0 %v1039_v5  ;;  %s997_s23 = scalar_lea.vmem %s4915_s24, %s3388_s2  ;;  %v1208_v26 = vsel %vm1080_vm3, %v1203_v25, 0  ;;  %v1154_v28 = vsel %vm1080_vm3, %v1149_v27, 0  ;;  %v3669_v29 = vld [vmem:[#allocation9] ss:$0 sm:$0xff]  ;;  %v1284_v32 = vld [vmem:[#allocation11 + $0x20] sm:$0x7] }
  0x78   : > { %v1002_v8 = vld [vmem:[%s997_s23] sm:$0xff]  ;;  %v1003_v9 = vld [vmem:[%s997_s23 + $0x8] sm:$0xff]  ;;  %1190 = vmatpush.bf16.msrb.mxu2 %v1181_v23  ;;  %v1057_v31 = vstv %s1004_s27  ;;  %v1289_v34 = vsel %vm1080_vm3, %v1284_v32, 0  ;;  %v1257_v40 = vld [vmem:[#allocation11 + $0x1c] sm:$0x7]  ;;  %vm1428_vm9 = vcmask 97280  }
  0x79   : > { %v1006_v10 = vpack.c.bf16 %v1003_v9, %v1002_v8  ;;  %1163 = vmatpush.bf16.msrb.mxu1 %v1154_v28  ;;  %v1262_v44 = vsel %vm1080_vm3, %v1257_v40, 0  ;;  %v1338_v45 = vld [vmem:[#allocation11 + $0x28] sm:$0x7]  ;;  %v1311_v47 = vld [vmem:[#allocation11 + $0x24] sm:$0x7]  ;;  %v3392_v19 = vld [vmem:[#allocation15 + $0x8] sm:$0xff] }
  0x7a   : > { %v1069_v14 = vld [vmem:[#allocation2] sm:$0xff]  ;;  %1217 = vmatpush.bf16.msrb.mxu3 %v1208_v26  ;;  %v1343_v46 = vsel %vm1080_vm3, %v1338_v45, 0  ;;  %v1316_v56 = vsel %vm1080_vm3, %v1311_v47, 0  ;;  %1429 = vst.msk [vmem:[#allocation3] sm:$0xff] %vm1428_vm9, %v4376_v11  ;;  %vm1453_vm10 = vcmask 1045504   ;;  %s3128_s25 = sld [smem:[#allocation38 + $0x80]] }
  0x7b   : > { %1047 = vmatpush.bf16.msra.mxu0 %v3390_v6  ;;  %v1070_v15 = vld [vmem:[#allocation2 + $0x8] sm:$0xff]  ;;  %v3670_v47 = vld [vmem:[#allocation12] ss:$0 sm:$0xff]  ;;  %1430 = vst.msk [vmem:[#allocation3 + $0x8] sm:$0xff] %vm1428_vm9, %v4376_v11  ;;  %s3129_s22 = sld [smem:[#allocation38 + $0x81]]  ;;  %vm1851_vm15 = vcmask 523264  }
  0x7c   : > { %v1071_v16 = vpack.c.bf16 %v1070_v15, %v1069_v14  ;;  %v1308_v0 = vld [vmem:[#allocation2 + $0x20] sm:$0xff]  ;;  %1431 = vst.msk [vmem:[#allocation3 + $0x20] sm:$0xff] %vm1428_vm9, %v4376_v11  ;;  %s3194_s0 = sld [smem:[#allocation38 + $0x100]] }
  0x7d   : > { %v1335_v61 = vld [vmem:[#allocation2 + $0x28] sm:$0xff]  ;;  %1432 = vst.msk [vmem:[#allocation3 + $0x28] sm:$0xff] %vm1428_vm9, %v4376_v11  ;;  %s3195_s3 = sld [smem:[#allocation38 + $0x101]] }
  0x7e   : > { %3118 = vmatmul.msk.bf16.vlgmr.msra.gmra.mxu2 %vm1062_vm2, %v1071_v16  ;;  %v1336_v1 = vpack.c.bf16 %v1335_v61, %v1308_v0  ;;  %1876 = vst.msk [vmem:[#allocation4] sm:$0xff] %vm1428_vm9, %v4376_v11  ;;  %s4837_s8 = sld [smem:[#allocation38 + $0x180]] }
  0x7f   : > { %1048 = vmatpush.bf16.msra.mxu0 %v3389_v7  ;;  %1298 = vmatpush.bf16.msra.mxu2 %v1289_v34  ;;  %1877 = vst.msk [vmem:[#allocation4 + $0x8] sm:$0xff] %vm1428_vm9, %v4376_v11  ;;  %s3269_s28 = sld [smem:[#allocation38 + $0x181]] }
  0x80   : > { %1878 = vst.msk [vmem:[#allocation4 + $0x20] sm:$0xff] %vm1428_vm9, %v4376_v11  ;;  %s4916_s26 = sld [smem:[#allocation62_spill]] }
  0x81   : > { %1879 = vst.msk [vmem:[#allocation4 + $0x28] sm:$0xff] %vm1428_vm9, %v4376_v11 }
  0x82   : > { %3116 = vmatmul.msk.bf16.vlgmr.msra.gmra.mxu0 %vm1031_vm1, %v1006_v10 }
  0x83   : > { %1244 = vmatpush.bf16.msrb.mxu0 %v1235_v24 }
  0x86   : > { %s1000_s2 = scalar_lea.vmem %s4916_s26, %s4919_s4 }
  0x87   : > { %1352 = vmatpush.bf16.msra.mxu0 %v1343_v46 }
  0xff   : > { %v1050_v30 = vpop.f32.mrf.mxu0 }
 0x100   : > { %v1051_v33 = vadd.f32 %v3669_v29, %v1050_v30 }
 0x101   : > { %v1113_v9 = vpop.f32.mrf.mxu2 }
 0x102   : > { %vm1055_vm4 = vcmp.gt.f32.partialorder %v1051_v33, 0.0  ;;  %v1058_v35 = vmul.f32 %v1057_v31, %v1051_v33 }
 0x104   : > { %v1060_v36 = vsel %vm1055_vm4, %v1051_v33, %v1058_v35  ;;  %vm2358_vm4 = vcmask 1043456  }
 0x105   : > { %1067 = vst.msk [vmem:[#allocation2 + $0x10] sm:$0xff] %vm1062_vm2, %v1060_v36 }
 0x107   : > { %v1052_v37 = vpop.f32.mrf.mxu0 }
 0x108   : > { %v1053_v38 = vadd.f32 %v3669_v29, %v1052_v37  ;;  %v3391_v29 = vld [vmem:[#allocation15] sm:$0xff] }
 0x109   : > { %v1115_v12 = vpop.f32.mrf.mxu2 }
 0x10a   : > { %vm1056_vm5 = vcmp.gt.f32.partialorder %v1053_v38, 0.0  ;;  %v1059_v39 = vmul.f32 %v1057_v31, %v1053_v38 }
 0x10c   : > { %v1061_v41 = vsel %vm1056_vm5, %v1053_v38, %v1059_v39  ;;  %v1073_v42 = vld [vmem:[#allocation2 + $0x10] sm:$0xff]  ;;  %vm2323_vm5 = vcmask 203776  }
 0x10d   : > { %1068 = vst.msk [vmem:[#allocation2 + $0x18] sm:$0xff] %vm1062_vm2, %v1061_v41  ;;  %v1074_v43 = vpack.c.bf16 %v1073_v42, %v1070_v15  ;;  %v1118_v48 = vld [vmem:[#allocation2 + $0xc] sm:$0xff] }
 0x10e   : > { %v1172_v49 = vld [vmem:[#allocation2 + $0xf] sm:$0xff]  ;;  %2324 = vst.msk [vmem:[#allocation5] sm:$0xff] %vm2323_vm5, %v4376_v11 }
 0x10f   : > { %3117 = vmatmul.msk.bf16.vlgmr.msra.gmra.mxu1 %vm1062_vm2, %v1074_v43  ;;  %v1145_v59 = vld [vmem:[#allocation2 + $0xe] sm:$0xff]  ;;  %2325 = vst.msk [vmem:[#allocation5 + $0x8] sm:$0xff] %vm2323_vm5, %v4376_v11 }
 0x110   : > { %1271 = vmatpush.bf16.msra.mxu1 %v1262_v44  ;;  %2326 = vst.msk [vmem:[#allocation5 + $0x20] sm:$0xff] %vm2323_vm5, %v4376_v11 }
 0x111   : > { %2327 = vst.msk [vmem:[#allocation5 + $0x28] sm:$0xff] %vm2323_vm5, %v4376_v11  ;;  %v3320_v11 = vld [vmem:[#allocation33 + $0x38] sm:$0xf] }
 0x114   : > { %v1119_v50 = vld [vmem:[#allocation2 + $0x14] sm:$0xff]  ;;  %v1281_v63 = vld [vmem:[#allocation2 + $0x1c] sm:$0xff] }
 0x115   : > { %v1173_v51 = vld [vmem:[#allocation2 + $0x17] sm:$0xff]  ;;  %v1120_v53 = vpack.c.bf16 %v1119_v50, %v1118_v48  ;;  %v1282_v3 = vpack.c.bf16 %v1281_v63, %v1119_v50  ;;  %v3671_v50 = vld [vmem:[#allocation14] ss:$0 sm:$0xff] }
 0x116   : > { %v1226_v52 = vld [vmem:[#allocation2 + $0x11] sm:$0xff]  ;;  %v1174_v54 = vpack.c.bf16 %v1173_v51, %v1172_v49  ;;  %v1227_v55 = vld [vmem:[#allocation2 + $0x19] sm:$0xff] }
 0x117   : > { %v1228_v57 = vpack.c.bf16 %v1227_v55, %v1226_v52  ;;  %3119 = vmatmul.msk.bf16.vlgmr.msra.gmra.mxu3 %vm1062_vm2, %v1120_v53  ;;  %v1146_v58 = vld [vmem:[#allocation2 + $0x16] sm:$0xff] }
 0x118   : > { %3121 = vmatmul.msk.bf16.vlgmr.msrb.gmra.mxu2 %vm1062_vm2, %v1174_v54  ;;  %1325 = vmatpush.bf16.msra.mxu3 %v1316_v56  ;;  %v1147_v60 = vpack.c.bf16 %v1146_v58, %v1145_v59  ;;  %v1200_v62 = vld [vmem:[#allocation2 + $0x18] sm:$0xff] }
 0x119   : > { %3123 = vmatmul.msk.bf16.vlgmr.msrb.gmra.mxu0 %vm1062_vm2, %v1228_v57  ;;  %v1201_v2 = vpack.c.bf16 %v1200_v62, %v1073_v42  ;;  %v1253_v4 = vld [vmem:[#allocation2 + $0x12] sm:$0xff]  ;;  %v1254_v5 = vld [vmem:[#allocation2 + $0x1a] sm:$0xff]  ;;  %v1309_v7 = vpack.c.bf16 %v1308_v0, %v1200_v62  ;;  %v1375_v57 = vstv %s3107_s5 }
 0x11a   : > { %v1255_v6 = vpack.c.bf16 %v1254_v5, %v1253_v4  ;;  %v3141_v4 = vld [vmem:[#allocation18 + $0x8] sm:$0xf]  ;;  %v3394_v5 = vld [vmem:[#allocation18 + $0x8] sm:$0x30] }
 0x11f   : > { %3120 = vmatmul.msk.bf16.vlgmr.msrb.gmra.mxu1 %vm1062_vm2, %v1147_v60 }
 0x120   : > { %1413 = vmatpush.bf16.msrb.mxu1 %v3392_v19 }
 0x124   : > { %1414 = vmatpush.bf16.msrb.mxu1 %v3391_v29  ;;  %v3171_v29 = vld [vmem:[#allocation18 + $0x30] sm:$0xf] }
 0x127   : > { %3122 = vmatmul.msk.bf16.vlgmr.msrb.gmra.mxu3 %vm1062_vm2, %v1201_v2  ;;  %v3393_v2 = vld [vmem:[#allocation18] sm:$0x30] }
 0x128   : > { %3125 = vmatmul.msk.bf16.vlgmr.msra.gmra.mxu2 %vm1062_vm2, %v1282_v3 }
 0x129   : > { %3127 = vmatmul.msk.bf16.vlgmr.msra.gmra.mxu0 %vm1062_vm2, %v1336_v1  ;;  %v3146_v1 = vld [vmem:[#allocation18] sm:$0xf] }
 0x12a   : > { %v3147_v3 = vor.u32 %v3393_v2, %v3146_v1 }
 0x12f   : > { %3124 = vmatmul.msk.bf16.vlgmr.msra.gmra.mxu1 %vm1062_vm2, %v1255_v6  ;;  %v1480_v6 = vsel %vm1453_vm10, %v3147_v3, 0 }
 0x130   : > { %1489 = vmatpush.bf16.msrb.mxu3 %v1480_v6 }
 0x137   : > { %3126 = vmatmul.msk.bf16.vlgmr.msra.gmra.mxu3 %vm1062_vm2, %v1309_v7  ;;  %v3142_v7 = vor.u32 %v3394_v5, %v3141_v4 }
 0x18c   : > { %v1093_v8 = vpop.f32.mrf.mxu1 }
 0x18d   : > { %v1114_v15 = vadd.f32 %v1113_v9, %v1093_v8  ;;  %v1435_v8 = vld [vmem:[#allocation3] sm:$0xff]  ;;  %v4752_v9 = vld [vmem:[#allocation3 + $0x8] sm:$0xff] }
 0x194   : > { %v1095_v10 = vpop.f32.mrf.mxu1 }
 0x195   : > { %v1116_v23 = vadd.f32 %v1115_v12, %v1095_v10  ;;  %v1455_v10 = vsel %vm1453_vm10, %v3142_v7, 0  ;;  %v1437_v12 = vpack.c.bf16 %v4752_v9, %v1435_v8 }
 0x196   : > { %v1246_v20 = vpop.f32.mrf.mxu0  ;;  %1464 = vmatpush.bf16.msrb.mxu2 %v1455_v10 }
 0x197   : > { %3148 = vmatmul.msk.bf16.vlgmr.msrb.gmra.mxu3 %vm1428_vm9, %v1437_v12 }
 0x19a   : > { %v1138_v13 = vpop.f32.mrf.mxu3 }
 0x19b   : > { %v1192_v16 = vpop.f32.mrf.mxu2  ;;  %v1143_v18 = vadd.f32 %v1138_v13, %v1114_v15  ;;  %v3151_v13 = vld [vmem:[#allocation18 + $0x10] sm:$0xf] }
 0x19c   : > { %v1165_v14 = vpop.f32.mrf.mxu1 }
 0x19d   : > { %v1170_v21 = vadd.f32 %v1165_v14, %v1143_v18  ;;  %v3395_v14 = vld [vmem:[#allocation18 + $0x10] sm:$0x30]  ;;  %v3166_v18 = vld [vmem:[#allocation18 + $0x28] sm:$0xf] }
 0x19e   : > { %v1248_v31 = vpop.f32.mrf.mxu0  ;;  %v3152_v15 = vor.u32 %v3395_v14, %v3151_v13  ;;  %v1728_v13 = vld [vmem:[#allocation3 + $0x20] sm:$0xff] }
 0x19f   : > { %v1197_v26 = vadd.f32 %v1192_v16, %v1170_v21  ;;  %v3161_v16 = vld [vmem:[#allocation18 + $0x20] sm:$0xf]  ;;  %v3398_v21 = vld [vmem:[#allocation18 + $0x28] sm:$0x30] }
 0x1a0   : > { %v1511_v19 = vsel %vm1453_vm10, %v3152_v15, 0 }
 0x1a1   : > { %1520 = vmatpush.bf16.msrb.mxu0 %v1511_v19  ;;  %v1761_v19 = vld [vmem:[#allocation3 + $0x28] sm:$0xff] }
 0x1a2   : > { %v1140_v17 = vpop.f32.mrf.mxu3 }
 0x1a3   : > { %v1144_v25 = vadd.f32 %v1140_v17, %v1116_v23  ;;  %v1194_v27 = vpop.f32.mrf.mxu2  ;;  %v3397_v17 = vld [vmem:[#allocation18 + $0x20] sm:$0x30]  ;;  %v3167_v23 = vor.u32 %v3398_v21, %v3166_v18 }
 0x1a4   : > { %v1167_v22 = vpop.f32.mrf.mxu1 }
 0x1a5   : > { %v1171_v30 = vadd.f32 %v1167_v22, %v1144_v25  ;;  %v3156_v22 = vld [vmem:[#allocation18 + $0x18] sm:$0xf] }
 0x1a6   : > { %v1354_v41 = vpop.f32.mrf.mxu0 }
 0x1a7   : > { %v1198_v35 = vadd.f32 %v1194_v27, %v1171_v30  ;;  %v1610_v27 = vsel %vm1453_vm10, %v3167_v23, 0  ;;  %v3399_v30 = vld [vmem:[#allocation18 + $0x30] sm:$0x30] }
 0x1a8   : > { %1619 = vmatpush.bf16.msra.mxu3 %v1610_v27 }
 0x1aa   : > { %v1219_v24 = vpop.f32.mrf.mxu3 }
 0x1ab   : > { %v1224_v28 = vadd.f32 %v1219_v24, %v1197_v26  ;;  %v1300_v38 = vpop.f32.mrf.mxu2  ;;  %v3396_v24 = vld [vmem:[#allocation18 + $0x18] sm:$0x30] }
 0x1ac   : > { %v1273_v33 = vpop.f32.mrf.mxu1  ;;  %v3157_v26 = vor.u32 %v3396_v24, %v3156_v22 }
 0x1ad   : > { %v1251_v32 = vadd.f32 %v1246_v20, %v1224_v28  ;;  %v3162_v20 = vor.u32 %v3397_v17, %v3161_v16 }
 0x1ae   : > { %v1356_v54 = vpop.f32.mrf.mxu0  ;;  %v1544_v28 = vsel %vm1453_vm10, %v3157_v26, 0 }
 0x1af   : > { %v1278_v36 = vadd.f32 %v1273_v33, %v1251_v32  ;;  %v1577_v25 = vsel %vm1453_vm10, %v3162_v20, 0  ;;  %1553 = vmatpush.bf16.msra.mxu1 %v1544_v28  ;;  %v3672_v33 = vld [vmem:[#allocation17] ss:$0 sm:$0xff]  ;;  %v1762_v20 = vpack.c.bf16 %v1761_v19, %v1728_v13  ;;  %v3407_v28 = vld [vmem:[#allocation23 + $0x18] sm:$0xff]  ;;  %v3215_v19 = vld [vmem:[#allocation26 + $0x8] sm:$0xf] }
 0x1b0   : > { %1586 = vmatpush.bf16.msra.mxu2 %v1577_v25 }
 0x1b1   : > { %v1305_v40 = vadd.f32 %v1300_v38, %v1278_v36  ;;  %v3186_v36 = vld [vmem:[#allocation18 + $0x48] sm:$0xf]  ;;  %v3402_v38 = vld [vmem:[#allocation18 + $0x48] sm:$0x30] }
 0x1b2   : > { %v1221_v34 = vpop.f32.mrf.mxu3 }
 0x1b3   : > { %v1225_v37 = vadd.f32 %v1221_v34, %v1198_v35  ;;  %v1302_v48 = vpop.f32.mrf.mxu2  ;;  %v1423_v35 = vstv %s3128_s25 }
 0x1b4   : > { %v1275_v44 = vpop.f32.mrf.mxu1 }
 0x1b5   : > { %v1252_v39 = vadd.f32 %v1248_v31, %v1225_v37  ;;  %v3172_v31 = vor.u32 %v3399_v30, %v3171_v29 }
 0x1b7   : > { %v1279_v45 = vadd.f32 %v1275_v44, %v1252_v39  ;;  %v1643_v32 = vsel %vm1453_vm10, %v3172_v31, 0  ;;  %v3176_v39 = vld [vmem:[#allocation18 + $0x38] sm:$0xf] }
 0x1b8   : > { %1652 = vmatpush.bf16.msra.mxu0 %v1643_v32  ;;  %v3406_v32 = vld [vmem:[#allocation23 + $0x10] sm:$0xff] }
 0x1b9   : > { %v1306_v51 = vadd.f32 %v1302_v48, %v1279_v45  ;;  %v3401_v48 = vld [vmem:[#allocation18 + $0x40] sm:$0x30] }
 0x1ba   : > { %v1327_v42 = vpop.f32.mrf.mxu3 }
 0x1bb   : > { %v1332_v43 = vadd.f32 %v1327_v42, %v1305_v40  ;;  %v3400_v40 = vld [vmem:[#allocation18 + $0x38] sm:$0x30] }
 0x1bc   : > { %v3177_v42 = vor.u32 %v3400_v40, %v3176_v39 }
 0x1bd   : > { %v1359_v46 = vadd.f32 %v1354_v41, %v1332_v43  ;;  %v3187_v41 = vor.u32 %v3402_v38, %v3186_v36  ;;  %v3405_v36 = vld [vmem:[#allocation23 + $0x8] sm:$0xff] }
 0x1be   : > { %v1676_v45 = vsel %vm1453_vm10, %v3177_v42, 0 }
 0x1bf   : > { %v1365_v49 = vmul.f32 %v3670_v47, %v1359_v46  ;;  %v1742_v44 = vsel %vm1453_vm10, %v3187_v41, 0  ;;  %v3404_v41 = vld [vmem:[#allocation23] sm:$0xff] }
 0x1c0   : > { %1751 = vmatpush.bf16.msrb.mxu3 %v1742_v44 }
 0x1c1   : > { %v1371_v55 = vadd.f32 %v3671_v50, %v1365_v49 }
 0x1c2   : > { %v1329_v52 = vpop.f32.mrf.mxu3 }
 0x1c3   : > { %v1333_v53 = vadd.f32 %v1329_v52, %v1306_v51  ;;  %v1376_v59 = vmul.f32 %v1375_v57, %v1371_v55  ;;  %vm1373_vm6 = vcmp.gt.f32.partialorder %v1371_v55, 0.0 }
 0x1c5   : > { %v1360_v56 = vadd.f32 %v1356_v54, %v1333_v53  ;;  %v1378_v62 = vsel %vm1373_vm6, %v1371_v55, %v1376_v59  ;;  %vm2359_vm6 = vcmask 1044480  }
 0x1c7   : > { %v1366_v58 = vmul.f32 %v3670_v47, %v1360_v56  ;;  %v3181_v47 = vld [vmem:[#allocation18 + $0x40] sm:$0xf] }
 0x1c8   : > { %v3182_v51 = vor.u32 %v3401_v48, %v3181_v47 }
 0x1c9   : > { %v1372_v60 = vadd.f32 %v3671_v50, %v1366_v58  ;;  %v3403_v58 = vld [vmem:[#allocation18 + $0x50] sm:$0x30] }
 0x1ca   : > { %v1709_v56 = vsel %vm1453_vm10, %v3182_v51, 0 }
 0x1cb   : > { %vm1374_vm7 = vcmp.gt.f32.partialorder %v1372_v60, 0.0  ;;  %v1377_v61 = vmul.f32 %v1375_v57, %v1372_v60  ;;  %v3191_v57 = vld [vmem:[#allocation18 + $0x50] sm:$0xf] }
 0x1cc   : > { %v3192_v59 = vor.u32 %v3403_v58, %v3191_v57 }
 0x1cd   : > { %v1379_v63 = vsel %vm1374_vm7, %v1372_v60, %v1377_v61 }
 0x1ce   : > { %v1382_v0 = vpack.c.bf16 %v1379_v63, %v1378_v62  ;;  %v1775_v4 = vsel %vm1453_vm10, %v3192_v59, 0  ;;  %v3673_v59 = vld [vmem:[#allocation20] ss:$0 sm:$0xff] }
 0x1d0   : > { %3138 = vmatmul.msk.bf16.vlgmr.msrb.gmra.mxu1 %vm1403_vm8, %v1382_v0 }
 0x1d1   : > { %1685 = vmatpush.bf16.msrb.mxu1 %v1676_v45 }
 0x21a   : > { %v1491_v21 = vpop.f32.mrf.mxu3 }
 0x222   : > { %v1493_v23 = vpop.f32.mrf.mxu3 }
 0x24d   : > { %v1416_v34 = vpop.f32.mrf.mxu1 }
 0x24e   : > { %v1417_v37 = vadd.f32 %v3672_v33, %v1416_v34 }
 0x250   : > { %vm1421_vm11 = vcmp.gt.f32.partialorder %v1417_v37, 0.0  ;;  %v1424_v43 = vmul.f32 %v1423_v35, %v1417_v37 }
 0x252   : > { %v1426_v46 = vsel %vm1421_vm11, %v1417_v37, %v1424_v43 }
 0x253   : > { %1433 = vst.msk [vmem:[#allocation3 + $0x10] sm:$0xff] %vm1428_vm9, %v1426_v46 }
 0x255   : > { %v1418_v49 = vpop.f32.mrf.mxu1 }
 0x256   : > { %v1419_v50 = vadd.f32 %v3672_v33, %v1418_v49 }
 0x258   : > { %vm1422_vm12 = vcmp.gt.f32.partialorder %v1419_v50, 0.0  ;;  %v1425_v52 = vmul.f32 %v1423_v35, %v1419_v50 }
 0x25a   : > { %v1427_v53 = vsel %vm1422_vm12, %v1419_v50, %v1425_v52  ;;  %v1440_v54 = vld [vmem:[#allocation3 + $0x10] sm:$0xff] }
 0x25b   : > { %1434 = vst.msk [vmem:[#allocation3 + $0x18] sm:$0xff] %vm1428_vm9, %v1427_v53  ;;  %v1441_v55 = vpack.c.bf16 %v1440_v54, %v4752_v9  ;;  %v1496_v60 = vld [vmem:[#allocation3 + $0xc] sm:$0xff] }
 0x25c   : > { %v1529_v61 = vld [vmem:[#allocation3 + $0xe] sm:$0xff] }
 0x25d   : > { %3143 = vmatmul.msk.bf16.vlgmr.msrb.gmra.mxu2 %vm1428_vm9, %v1441_v55  ;;  %v1562_v6 = vld [vmem:[#allocation3 + $0xf] sm:$0xff] }
 0x25e   : > { %1718 = vmatpush.bf16.msrb.mxu2 %v1709_v56 }
 0x262   : > { %v1497_v62 = vld [vmem:[#allocation3 + $0x14] sm:$0xff]  ;;  %v1695_v17 = vld [vmem:[#allocation3 + $0x1c] sm:$0xff] }
 0x263   : > { %v1530_v63 = vld [vmem:[#allocation3 + $0x16] sm:$0xff]  ;;  %v1498_v1 = vpack.c.bf16 %v1497_v62, %v1496_v60  ;;  %v1696_v18 = vpack.c.bf16 %v1695_v17, %v1497_v62  ;;  %v3408_v17 = vld [vmem:[#allocation26] sm:$0x30] }
 0x264   : > { %v1596_v0 = vld [vmem:[#allocation3 + $0x18] sm:$0xff]  ;;  %v1531_v2 = vpack.c.bf16 %v1530_v63, %v1529_v61 }
 0x265   : > { %v1597_v3 = vpack.c.bf16 %v1596_v0, %v1440_v54  ;;  %3153 = vmatmul.msk.bf16.vlgmr.msrb.gmra.mxu0 %vm1428_vm9, %v1498_v1  ;;  %v1563_v5 = vld [vmem:[#allocation3 + $0x17] sm:$0xff]  ;;  %v1729_v16 = vpack.c.bf16 %v1728_v13, %v1596_v0  ;;  %v3674_v0 = vld [vmem:[#allocation21] ss:$0 sm:$0xff] }
 0x266   : > { %3158 = vmatmul.msk.bf16.vlgmr.msra.gmra.mxu1 %vm1428_vm9, %v1531_v2  ;;  %1784 = vmatpush.bf16.msrb.mxu0 %v1775_v4  ;;  %v1564_v7 = vpack.c.bf16 %v1563_v5, %v1562_v6  ;;  %v1628_v8 = vld [vmem:[#allocation3 + $0x11] sm:$0xff]  ;;  %v1629_v9 = vld [vmem:[#allocation3 + $0x19] sm:$0xff] }
 0x267   : > { %3168 = vmatmul.msk.bf16.vlgmr.msra.gmra.mxu3 %vm1428_vm9, %v1597_v3  ;;  %v1661_v10 = vld [vmem:[#allocation3 + $0x12] sm:$0xff]  ;;  %v1662_v12 = vld [vmem:[#allocation3 + $0x1a] sm:$0xff]  ;;  %v1630_v14 = vpack.c.bf16 %v1629_v9, %v1628_v8  ;;  %1859 = vmatpush.bf16.msra.mxu1 %v3407_v28 }
 0x268   : > { %v1663_v15 = vpack.c.bf16 %v1662_v12, %v1661_v10  ;;  %v3410_v28 = vld [vmem:[#allocation26 + $0x10] sm:$0x30] }
 0x26b   : > { %1860 = vmatpush.bf16.msra.mxu1 %v3406_v32  ;;  %v3240_v32 = vld [vmem:[#allocation26 + $0x28] sm:$0xf] }
 0x26d   : > { %3163 = vmatmul.msk.bf16.vlgmr.msra.gmra.mxu2 %vm1428_vm9, %v1564_v7  ;;  %v1807_v7 = vstv %s3129_s22 }
 0x26f   : > { %1861 = vmatpush.bf16.msra.mxu1 %v3405_v36  ;;  %v3230_v36 = vld [vmem:[#allocation26 + $0x18] sm:$0xf] }
 0x273   : > { %1862 = vmatpush.bf16.msra.mxu1 %v3404_v41 }
 0x275   : > { %3173 = vmatmul.msk.bf16.vlgmr.msra.gmra.mxu0 %vm1428_vm9, %v1630_v14 }
 0x276   : > { %3178 = vmatmul.msk.bf16.vlgmr.msrb.gmra.mxu1 %vm1428_vm9, %v1663_v15 }
 0x277   : > { %3188 = vmatmul.msk.bf16.vlgmr.msrb.gmra.mxu3 %vm1428_vm9, %v1729_v16  ;;  %v3220_v16 = vld [vmem:[#allocation26] sm:$0xf] }
 0x27d   : > { %3183 = vmatmul.msk.bf16.vlgmr.msrb.gmra.mxu2 %vm1428_vm9, %v1696_v18  ;;  %v3221_v18 = vor.u32 %v3408_v17, %v3220_v16 }
 0x285   : > { %3193 = vmatmul.msk.bf16.vlgmr.msrb.gmra.mxu0 %vm1428_vm9, %v1762_v20  ;;  %v3409_v20 = vld [vmem:[#allocation26 + $0x8] sm:$0x30] }
 0x2e0   : > { %v1466_v22 = vpop.f32.mrf.mxu2 }
 0x2e1   : > { %v1492_v27 = vadd.f32 %v1491_v21, %v1466_v22  ;;  %v1926_v21 = vsel %vm1453_vm10, %v3221_v18, 0  ;;  %v3216_v22 = vor.u32 %v3409_v20, %v3215_v19 }
 0x2e2   : > { %v1522_v24 = vpop.f32.mrf.mxu0  ;;  %1935 = vmatpush.bf16.msra.mxu3 %v1926_v21 }
 0x2e3   : > { %v1555_v25 = vpop.f32.mrf.mxu1  ;;  %v1527_v31 = vadd.f32 %v1522_v24, %v1492_v27  ;;  %v4787_v24 = vld [vmem:[#allocation4 + $0x8] sm:$0xff] }
 0x2e4   : > { %v3225_v27 = vld [vmem:[#allocation26 + $0x10] sm:$0xf] }
 0x2e5   : > { %v1560_v34 = vadd.f32 %v1555_v25, %v1527_v31  ;;  %v3412_v31 = vld [vmem:[#allocation26 + $0x20] sm:$0x30] }
 0x2e8   : > { %v1468_v26 = vpop.f32.mrf.mxu2 }
 0x2e9   : > { %v1494_v35 = vadd.f32 %v1493_v23, %v1468_v26  ;;  %v1882_v23 = vld [vmem:[#allocation4] sm:$0xff]  ;;  %v1901_v26 = vsel %vm1453_vm10, %v3216_v22, 0 }
 0x2ea   : > { %v1524_v29 = vpop.f32.mrf.mxu0  ;;  %v1621_v30 = vpop.f32.mrf.mxu3  ;;  %v1884_v25 = vpack.c.bf16 %v4787_v24, %v1882_v23  ;;  %1910 = vmatpush.bf16.msra.mxu2 %v1901_v26 }
 0x2eb   : > { %v1557_v37 = vpop.f32.mrf.mxu1  ;;  %v1528_v40 = vadd.f32 %v1524_v29, %v1494_v35  ;;  %v3226_v29 = vor.u32 %v3410_v28, %v3225_v27  ;;  %v3413_v35 = vld [vmem:[#allocation26 + $0x28] sm:$0x30] }
 0x2ec   : > { %3222 = vmatmul.msk.bf16.vlgmr.msra.gmra.mxu3 %vm1428_vm9, %v1884_v25 }
 0x2ed   : > { %v1561_v45 = vadd.f32 %v1557_v37, %v1528_v40  ;;  %v3241_v37 = vor.u32 %v3413_v35, %v3240_v32  ;;  %v2207_v35 = vld [vmem:[#allocation4 + $0x28] sm:$0xff] }
 0x2ef   : > { %v2056_v41 = vsel %vm1453_vm10, %v3241_v37, 0 }
 0x2f0   : > { %v1588_v33 = vpop.f32.mrf.mxu2  ;;  %2065 = vmatpush.bf16.msrb.mxu3 %v2056_v41 }
 0x2f1   : > { %v1593_v39 = vadd.f32 %v1588_v33, %v1560_v34  ;;  %v1957_v33 = vsel %vm1453_vm10, %v3226_v29, 0  ;;  %v2174_v29 = vld [vmem:[#allocation4 + $0x20] sm:$0xff] }
 0x2f2   : > { %v1654_v38 = vpop.f32.mrf.mxu0  ;;  %v1623_v42 = vpop.f32.mrf.mxu3  ;;  %1966 = vmatpush.bf16.msra.mxu0 %v1957_v33 }
 0x2f3   : > { %v1626_v43 = vadd.f32 %v1621_v30, %v1593_v39  ;;  %v1687_v49 = vpop.f32.mrf.mxu1  ;;  %v3235_v30 = vld [vmem:[#allocation26 + $0x20] sm:$0xf] }
 0x2f4   : > { %v3236_v34 = vor.u32 %v3412_v31, %v3235_v30 }
 0x2f5   : > { %v1659_v47 = vadd.f32 %v1654_v38, %v1626_v43  ;;  %v3411_v38 = vld [vmem:[#allocation26 + $0x18] sm:$0x30]  ;;  %v3245_v43 = vld [vmem:[#allocation26 + $0x30] sm:$0xf] }
 0x2f6   : > { %v2023_v39 = vsel %vm1453_vm10, %v3236_v34, 0  ;;  %v3231_v40 = vor.u32 %v3411_v38, %v3230_v36  ;;  %v2208_v36 = vpack.c.bf16 %v2207_v35, %v2174_v29  ;;  %v3302_v35 = vld [vmem:[#allocation33 + $0x8] sm:$0xf] }
 0x2f7   : > { %v1692_v50 = vadd.f32 %v1687_v49, %v1659_v47  ;;  %2032 = vmatpush.bf16.msrb.mxu2 %v2023_v39  ;;  %v3675_v47 = vld [vmem:[#allocation24] ss:$0 sm:$0xff]  ;;  %v1871_v49 = vstv %s3194_s0 }
 0x2f8   : > { %v1590_v44 = vpop.f32.mrf.mxu2 }
 0x2f9   : > { %v1594_v48 = vadd.f32 %v1590_v44, %v1561_v45  ;;  %v3414_v44 = vld [vmem:[#allocation26 + $0x30] sm:$0x30] }
 0x2fa   : > { %v1656_v46 = vpop.f32.mrf.mxu0  ;;  %v1753_v52 = vpop.f32.mrf.mxu3  ;;  %v3246_v45 = vor.u32 %v3414_v44, %v3245_v43 }
 0x2fb   : > { %v1627_v51 = vadd.f32 %v1623_v42, %v1594_v48  ;;  %v1689_v60 = vpop.f32.mrf.mxu1  ;;  %v1990_v42 = vsel %vm1453_vm10, %v3231_v40, 0 }
 0x2fc   : > { %1999 = vmatpush.bf16.msrb.mxu1 %v1990_v42 }
 0x2fd   : > { %v1660_v56 = vadd.f32 %v1656_v46, %v1627_v51  ;;  %v2089_v46 = vsel %vm1453_vm10, %v3246_v45, 0  ;;  %v3422_v45 = vld [vmem:[#allocation30 + $0x18] sm:$0xff] }
 0x2fe   : > { %2098 = vmatpush.bf16.msrb.mxu0 %v2089_v46 }
 0x2ff   : > { %v1693_v61 = vadd.f32 %v1689_v60, %v1660_v56 }
 0x300   : > { %v1720_v53 = vpop.f32.mrf.mxu2 }
 0x301   : > { %v1725_v54 = vadd.f32 %v1720_v53, %v1692_v50  ;;  %v3260_v50 = vld [vmem:[#allocation26 + $0x48] sm:$0xf]  ;;  %v3250_v53 = vld [vmem:[#allocation26 + $0x38] sm:$0xf] }
 0x302   : > { %v1786_v55 = vpop.f32.mrf.mxu0  ;;  %v1755_v2 = vpop.f32.mrf.mxu3 }
 0x303   : > { %v1758_v57 = vadd.f32 %v1753_v52, %v1725_v54  ;;  %v3417_v52 = vld [vmem:[#allocation26 + $0x48] sm:$0x30]  ;;  %v3415_v54 = vld [vmem:[#allocation26 + $0x38] sm:$0x30] }
 0x304   : > { %v3251_v56 = vor.u32 %v3415_v54, %v3250_v53 }
 0x305   : > { %v1791_v58 = vadd.f32 %v1786_v55, %v1758_v57  ;;  %v3261_v55 = vor.u32 %v3417_v52, %v3260_v50 }
 0x307   : > { %v1797_v63 = vmul.f32 %v3673_v59, %v1791_v58  ;;  %v2188_v58 = vsel %vm1453_vm10, %v3261_v55, 0  ;;  %v3420_v55 = vld [vmem:[#allocation30 + $0x8] sm:$0xff] }
 0x308   : > { %v1722_v62 = vpop.f32.mrf.mxu2  ;;  %2197 = vmatpush.bf16.msra.mxu3 %v2188_v58 }
 0x309   : > { %v1726_v1 = vadd.f32 %v1722_v62, %v1693_v61  ;;  %v1803_v5 = vadd.f32 %v3674_v0, %v1797_v63  ;;  %v3255_v61 = vld [vmem:[#allocation26 + $0x40] sm:$0xf]  ;;  %v3416_v62 = vld [vmem:[#allocation26 + $0x40] sm:$0x30] }
 0x30a   : > { %v1788_v4 = vpop.f32.mrf.mxu0 }
 0x30b   : > { %v1759_v3 = vadd.f32 %v1755_v2, %v1726_v1  ;;  %v1808_v9 = vmul.f32 %v1807_v7, %v1803_v5  ;;  %vm1805_vm13 = vcmp.gt.f32.partialorder %v1803_v5, 0.0  ;;  %v3256_v1 = vor.u32 %v3416_v62, %v3255_v61 }
 0x30d   : > { %v1792_v6 = vadd.f32 %v1788_v4, %v1759_v3  ;;  %v4779_v13 = vsel %vm1805_vm13, %v1803_v5, %v1808_v9 }
 0x30f   : > { %v1798_v8 = vmul.f32 %v3673_v59, %v1792_v6  ;;  %v2122_v59 = vsel %vm1453_vm10, %v3251_v56, 0  ;;  %v2155_v6 = vsel %vm1453_vm10, %v3256_v1, 0 }
 0x311   : > { %v1804_v10 = vadd.f32 %v3674_v0, %v1798_v8  ;;  %v3418_v8 = vld [vmem:[#allocation26 + $0x50] sm:$0x30] }
 0x313   : > { %vm1806_vm14 = vcmp.gt.f32.partialorder %v1804_v10, 0.0  ;;  %v1809_v12 = vmul.f32 %v1807_v7, %v1804_v10  ;;  %v3265_v7 = vld [vmem:[#allocation26 + $0x50] sm:$0xf] }
 0x314   : > { %v3266_v9 = vor.u32 %v3418_v8, %v3265_v7 }
 0x315   : > { %v4781_v14 = vsel %vm1806_vm14, %v1804_v10, %v1809_v12 }
 0x316   : > { %v1814_v15 = vpack.c.bf16 %v4781_v14, %v4779_v13  ;;  %v2221_v21 = vsel %vm1453_vm10, %v3266_v9, 0 }
 0x318   : > { %3212 = vmatmul.msk.bf16.vlgmr.msra.gmra.mxu1 %vm1851_vm15, %v1814_v15 }
 0x319   : > { %2131 = vmatpush.bf16.msra.mxu1 %v2122_v59  ;;  %v3419_v59 = vld [vmem:[#allocation30] sm:$0xff] }
 0x36f   : > { %v1937_v37 = vpop.f32.mrf.mxu3 }
 0x377   : > { %v1939_v39 = vpop.f32.mrf.mxu3 }
 0x395   : > { %v1864_v48 = vpop.f32.mrf.mxu1 }
 0x396   : > { %v1865_v51 = vadd.f32 %v3675_v47, %v1864_v48  ;;  %v3421_v48 = vld [vmem:[#allocation30 + $0x10] sm:$0xff] }
 0x398   : > { %vm1869_vm0 = vcmp.gt.f32.partialorder %v1865_v51, 0.0  ;;  %v1872_v57 = vmul.f32 %v1871_v49, %v1865_v51 }
 0x39a   : > { %v1874_v60 = vsel %vm1869_vm0, %v1865_v51, %v1872_v57 }
 0x39b   : > { %1880 = vst.msk [vmem:[#allocation4 + $0x10] sm:$0xff] %vm1428_vm9, %v1874_v60 }
 0x39d   : > { %v1866_v63 = vpop.f32.mrf.mxu1 }
 0x39e   : > { %v1867_v0 = vadd.f32 %v3675_v47, %v1866_v63 }
 0x3a0   : > { %vm1870_vm1 = vcmp.gt.f32.partialorder %v1867_v0, 0.0  ;;  %v1873_v2 = vmul.f32 %v1871_v49, %v1867_v0 }
 0x3a2   : > { %v1875_v3 = vsel %vm1870_vm1, %v1867_v0, %v1873_v2  ;;  %v1887_v4 = vld [vmem:[#allocation4 + $0x10] sm:$0xff] }
 0x3a3   : > { %1881 = vst.msk [vmem:[#allocation4 + $0x18] sm:$0xff] %vm1428_vm9, %v1875_v3  ;;  %v1888_v5 = vpack.c.bf16 %v1887_v4, %v4787_v24  ;;  %v1942_v10 = vld [vmem:[#allocation4 + $0xc] sm:$0xff] }
 0x3a4   : > { %v1975_v12 = vld [vmem:[#allocation4 + $0xe] sm:$0xff] }
 0x3a5   : > { %3217 = vmatmul.msk.bf16.vlgmr.msra.gmra.mxu2 %vm1428_vm9, %v1888_v5  ;;  %v2008_v23 = vld [vmem:[#allocation4 + $0xf] sm:$0xff] }
 0x3a6   : > { %2164 = vmatpush.bf16.msra.mxu2 %v2155_v6 }
 0x3aa   : > { %v1943_v15 = vld [vmem:[#allocation4 + $0x14] sm:$0xff]  ;;  %v2141_v33 = vld [vmem:[#allocation4 + $0x1c] sm:$0xff] }
 0x3ab   : > { %v1976_v16 = vld [vmem:[#allocation4 + $0x16] sm:$0xff]  ;;  %v1944_v18 = vpack.c.bf16 %v1943_v15, %v1942_v10  ;;  %v2142_v34 = vpack.c.bf16 %v2141_v33, %v1943_v15 }
 0x3ac   : > { %v2042_v17 = vld [vmem:[#allocation4 + $0x18] sm:$0xff]  ;;  %v1977_v19 = vpack.c.bf16 %v1976_v16, %v1975_v12 }
 0x3ad   : > { %v2043_v20 = vpack.c.bf16 %v2042_v17, %v1887_v4  ;;  %3227 = vmatmul.msk.bf16.vlgmr.msra.gmra.mxu0 %vm1428_vm9, %v1944_v18  ;;  %v2009_v22 = vld [vmem:[#allocation4 + $0x17] sm:$0xff]  ;;  %v2175_v32 = vpack.c.bf16 %v2174_v29, %v2042_v17  ;;  %v3676_v17 = vld [vmem:[#allocation27] ss:$0 sm:$0xff] }
 0x3ae   : > { %3232 = vmatmul.msk.bf16.vlgmr.msrb.gmra.mxu1 %vm1428_vm9, %v1977_v19  ;;  %2230 = vmatpush.bf16.msra.mxu0 %v2221_v21  ;;  %v2010_v24 = vpack.c.bf16 %v2009_v22, %v2008_v23  ;;  %v2074_v25 = vld [vmem:[#allocation4 + $0x11] sm:$0xff]  ;;  %v2075_v26 = vld [vmem:[#allocation4 + $0x19] sm:$0xff]  ;;  %v3677_v22 = vld [vmem:[#allocation29] ss:$0 sm:$0xff] }
 0x3af   : > { %3242 = vmatmul.msk.bf16.vlgmr.msrb.gmra.mxu3 %vm1428_vm9, %v2043_v20  ;;  %v2107_v27 = vld [vmem:[#allocation4 + $0x12] sm:$0xff]  ;;  %v2108_v28 = vld [vmem:[#allocation4 + $0x1a] sm:$0xff]  ;;  %v2076_v30 = vpack.c.bf16 %v2075_v26, %v2074_v25  ;;  %2306 = vmatpush.bf16.msrb.mxu1 %v3422_v45 }
 0x3b0   : > { %v2109_v31 = vpack.c.bf16 %v2108_v28, %v2107_v27  ;;  %v2255_v28 = vstv %s3195_s3  ;;  %v2330_v45 = vld [vmem:[#allocation5] sm:$0xff] }
 0x3b3   : > { %2307 = vmatpush.bf16.msrb.mxu1 %v3421_v48 }
 0x3b5   : > { %3237 = vmatmul.msk.bf16.vlgmr.msrb.gmra.mxu2 %vm1428_vm9, %v2010_v24 }
 0x3b7   : > { %2308 = vmatpush.bf16.msrb.mxu1 %v3420_v55  ;;  %v3434_v55 = vld [vmem:[#allocation33 + $0x58] sm:$0x10] }
 0x3bb   : > { %2309 = vmatpush.bf16.msrb.mxu1 %v3419_v59 }
 0x3bd   : > { %3247 = vmatmul.msk.bf16.vlgmr.msrb.gmra.mxu0 %vm1428_vm9, %v2076_v30 }
 0x3be   : > { %3252 = vmatmul.msk.bf16.vlgmr.msra.gmra.mxu1 %vm1428_vm9, %v2109_v31 }
 0x3bf   : > { %3262 = vmatmul.msk.bf16.vlgmr.msra.gmra.mxu3 %vm1428_vm9, %v2175_v32 }
 0x3c5   : > { %3257 = vmatmul.msk.bf16.vlgmr.msra.gmra.mxu2 %vm1428_vm9, %v2142_v34 }
 0x3cd   : > { %3267 = vmatmul.msk.bf16.vlgmr.msra.gmra.mxu0 %vm1428_vm9, %v2208_v36  ;;  %v3424_v36 = vld [vmem:[#allocation33 + $0x8] sm:$0x10] }
 0x428   : > { %v1912_v38 = vpop.f32.mrf.mxu2 }
 0x429   : > { %v1938_v43 = vadd.f32 %v1937_v37, %v1912_v38  ;;  %v4377_v37 = vmov 65535  }
 0x42a   : > { %v1968_v40 = vpop.f32.mrf.mxu0  ;;  %v2360_v38 = vsel %vm2358_vm4, 4294967295, %v4377_v37 }
 0x42b   : > { %v2001_v41 = vpop.f32.mrf.mxu1  ;;  %v1973_v47 = vadd.f32 %v1968_v40, %v1938_v43  ;;  %v3426_v43 = vld [vmem:[#allocation33 + $0x18] sm:$0x10] }
 0x42d   : > { %v2006_v50 = vadd.f32 %v2001_v41, %v1973_v47  ;;  %v3423_v41 = vld [vmem:[#allocation33] sm:$0xff] }
 0x430   : > { %v1914_v42 = vpop.f32.mrf.mxu2 }
 0x431   : > { %v1940_v51 = vadd.f32 %v1939_v39, %v1914_v42  ;;  %v4819_v39 = vsel %vm2359_vm6, %v2360_v38, 0  ;;  %v3293_v42 = vld [vmem:[#allocation33 + $0x18] sm:$0xf]  ;;  %v3383_v38 = vld [vmem:[#allocation33 + $0xa8] sm:$0xf] }
 0x432   : > { %v1970_v44 = vpop.f32.mrf.mxu0  ;;  %v2067_v46 = vpop.f32.mrf.mxu3 }
 0x433   : > { %v2003_v52 = vpop.f32.mrf.mxu1  ;;  %v1974_v56 = vadd.f32 %v1970_v44, %v1940_v51  ;;  %v3294_v44 = vor.u32 %v3426_v43, %v3293_v42  ;;  %v3428_v51 = vld [vmem:[#allocation33 + $0x28] sm:$0x10] }
 0x435   : > { %v2007_v61 = vadd.f32 %v2003_v52, %v1974_v56  ;;  %v2363_v47 = vand.u32 %v3294_v44, %v4819_v39  ;;  %v3329_v56 = vld [vmem:[#allocation33 + $0x48] sm:$0xf] }
 0x437   : > { %2371 = vmatpush.bf16.msrb.mxu2 %v2363_v47 }
 0x438   : > { %v2034_v49 = vpop.f32.mrf.mxu2 }
 0x439   : > { %v2039_v54 = vadd.f32 %v2034_v49, %v2006_v50  ;;  %v3425_v49 = vld [vmem:[#allocation33 + $0x10] sm:$0xff]  ;;  %v3311_v50 = vld [vmem:[#allocation33 + $0x28] sm:$0xf] }
 0x43a   : > { %v2100_v53 = vpop.f32.mrf.mxu0  ;;  %v2069_v57 = vpop.f32.mrf.mxu3  ;;  %v3312_v52 = vor.u32 %v3428_v51, %v3311_v50 }
 0x43b   : > { %v2072_v58 = vadd.f32 %v2067_v46, %v2039_v54  ;;  %v2133_v1 = vpop.f32.mrf.mxu1  ;;  %v4828_v46 = vld [vmem:[#allocation5 + $0x8] sm:$0xff]  ;;  %2372 = vmatpush.bf16.msrb.mxu2 %v3425_v49  ;;  %v3338_v54 = vld [vmem:[#allocation33 + $0x58] sm:$0xf] }
 0x43c   : > { %v2332_v48 = vpack.c.bf16 %v4828_v46, %v2330_v45  ;;  %v3339_v59 = vor.u32 %v3434_v55, %v3338_v54 }
 0x43d   : > { %v2105_v63 = vadd.f32 %v2100_v53, %v2072_v58  ;;  %v3430_v53 = vld [vmem:[#allocation33 + $0x38] sm:$0x10] }
 0x43e   : > { %v3321_v58 = vor.u32 %v3430_v53, %v3320_v11 }
 0x43f   : > { %v2138_v2 = vadd.f32 %v2133_v1, %v2105_v63  ;;  %v2556_v63 = vand.u32 %v3339_v59, %v4819_v39  ;;  %v3427_v1 = vld [vmem:[#allocation33 + $0x20] sm:$0xff] }
 0x440   : > { %v2036_v60 = vpop.f32.mrf.mxu2 }
 0x441   : > { %v2040_v0 = vadd.f32 %v2036_v60, %v2007_v61  ;;  %v2433_v60 = vand.u32 %v3312_v52, %v4819_v39 }
 0x442   : > { %v2102_v62 = vpop.f32.mrf.mxu0  ;;  %v2199_v4 = vpop.f32.mrf.mxu3 }
 0x443   : > { %v2073_v3 = vadd.f32 %v2069_v57, %v2040_v0  ;;  %v2135_v12 = vpop.f32.mrf.mxu1  ;;  %v3432_v57 = vld [vmem:[#allocation33 + $0x48] sm:$0x10]  ;;  %2441 = vmatpush.bf16.msrb.mxu0 %v2433_v60 }
 0x444   : > { %v3330_v61 = vor.u32 %v3432_v57, %v3329_v56  ;;  %v2698_v57 = vld [vmem:[#allocation5 + $0x20] sm:$0xff] }
 0x445   : > { %v2106_v8 = vadd.f32 %v2102_v62, %v2073_v3  ;;  %v2474_v62 = vand.u32 %v3321_v58, %v4819_v39  ;;  %v3433_v3 = vld [vmem:[#allocation33 + $0x50] sm:$0xff] }
 0x446   : > { %v2515_v0 = vand.u32 %v3330_v61, %v4819_v39 }
 0x447   : > { %v2139_v15 = vadd.f32 %v2135_v12, %v2106_v8  ;;  %2482 = vmatpush.bf16.msra.mxu1 %v2474_v62  ;;  %2442 = vmatpush.bf16.msrb.mxu0 %v3427_v1  ;;  %v3438_v12 = vld [vmem:[#allocation33 + $0x78] sm:$0x10] }
 0x448   : > { %v2166_v5 = vpop.f32.mrf.mxu2  ;;  %2523 = vmatpush.bf16.msra.mxu2 %v2515_v0 }
 0x449   : > { %v2171_v6 = vadd.f32 %v2166_v5, %v2138_v2  ;;  %v3429_v2 = vld [vmem:[#allocation33 + $0x30] sm:$0xff]  ;;  %v3347_v5 = vld [vmem:[#allocation33 + $0x68] sm:$0xf] }
 0x44a   : > { %v2232_v7 = vpop.f32.mrf.mxu0  ;;  %v2201_v20 = vpop.f32.mrf.mxu3 }
 0x44b   : > { %v2204_v9 = vadd.f32 %v2199_v4, %v2171_v6  ;;  %2483 = vmatpush.bf16.msra.mxu1 %v3429_v2  ;;  %v3431_v4 = vld [vmem:[#allocation33 + $0x40] sm:$0xff]  ;;  %v3436_v6 = vld [vmem:[#allocation33 + $0x68] sm:$0x10] }
 0x44c   : > { %2524 = vmatpush.bf16.msra.mxu2 %v3431_v4 }
 0x44d   : > { %v2237_v10 = vadd.f32 %v2232_v7, %v2204_v9  ;;  %v3348_v7 = vor.u32 %v3436_v6, %v3347_v5  ;;  %v3678_v9 = vld [vmem:[#allocation32] ss:$0 sm:$0xff] }
 0x44f   : > { %v2239_v16 = vadd.f32 %v2237_v10, %v4779_v13  ;;  %v2597_v8 = vand.u32 %v3348_v7, %v4819_v39  ;;  %v3356_v10 = vld [vmem:[#allocation33 + $0x78] sm:$0xf] }
 0x450   : > { %v2168_v18 = vpop.f32.mrf.mxu2 }
 0x451   : > { %v2172_v19 = vadd.f32 %v2168_v18, %v2139_v15  ;;  %v2245_v21 = vmul.f32 %v3676_v17, %v2239_v16  ;;  %2605 = vmatpush.bf16.msra.mxu0 %v2597_v8  ;;  %v3374_v15 = vld [vmem:[#allocation33 + $0x98] sm:$0xf]  ;;  %v3357_v16 = vor.u32 %v3438_v12, %v3356_v10 }
 0x452   : > { %v2234_v24 = vpop.f32.mrf.mxu0 }
 0x453   : > { %v2205_v23 = vadd.f32 %v2201_v20, %v2172_v19  ;;  %v2251_v26 = vadd.f32 %v3677_v22, %v2245_v21  ;;  %v2318_v19 = vstv %s4837_s8  ;;  %v3435_v21 = vld [vmem:[#allocation33 + $0x60] sm:$0xff] }
 0x455   : > { %v2238_v25 = vadd.f32 %v2234_v24, %v2205_v23  ;;  %v2256_v30 = vmul.f32 %v2255_v28, %v2251_v26  ;;  %vm2253_vm2 = vcmp.gt.f32.partialorder %v2251_v26, 0.0  ;;  %v2638_v23 = vand.u32 %v3357_v16, %v4819_v39  ;;  %2606 = vmatpush.bf16.msra.mxu0 %v3435_v21 }
 0x457   : > { %v2240_v27 = vadd.f32 %v2238_v25, %v4781_v14  ;;  %v2258_v32 = vsel %vm2253_vm2, %v2251_v26, %v2256_v30  ;;  %v3303_v14 = vor.u32 %v3424_v36, %v3302_v35  ;;  %v3437_v26 = vld [vmem:[#allocation33 + $0x70] sm:$0xff]  ;;  %v3440_v30 = vld [vmem:[#allocation33 + $0x88] sm:$0x10] }
 0x459   : > { %v2246_v29 = vmul.f32 %v3676_v17, %v2240_v27  ;;  %v2394_v40 = vand.u32 %v3303_v14, %v4819_v39  ;;  %v3442_v17 = vld [vmem:[#allocation33 + $0x98] sm:$0x10]  ;;  %v3441_v27 = vld [vmem:[#allocation33 + $0x90] sm:$0xff]  ;;  %v3444_v14 = vld [vmem:[#allocation33 + $0xa8] sm:$0x10] }
 0x45a   : > { %v3375_v20 = vor.u32 %v3442_v17, %v3374_v15 }
 0x45b   : > { %v2252_v31 = vadd.f32 %v3677_v22, %v2246_v29  ;;  %2402 = vmatpush.bf16.msrb.mxu3 %v2394_v40  ;;  %v3365_v29 = vld [vmem:[#allocation33 + $0x88] sm:$0xf]  ;;  %v3439_v40 = vld [vmem:[#allocation33 + $0x80] sm:$0xff] }
 0x45c   : > { %v2720_v24 = vand.u32 %v3375_v20, %v4819_v39 }
 0x45d   : > { %vm2254_vm3 = vcmp.gt.f32.partialorder %v2252_v31, 0.0  ;;  %v2257_v13 = vmul.f32 %v2255_v28, %v2252_v31 }
 0x45f   : > { %v2259_v33 = vsel %vm2254_vm3, %v2252_v31, %v2257_v13  ;;  %2403 = vmatpush.bf16.msrb.mxu3 %v3423_v41  ;;  %v3384_v41 = vor.u32 %v3444_v14, %v3383_v38 }
 0x460   : > { %v2262_v34 = vpack.c.bf16 %v2259_v33, %v2258_v32  ;;  %v3366_v32 = vor.u32 %v3440_v30, %v3365_v29 }
 0x462   : > { %3286 = vmatmul.msk.bf16.vlgmr.msrb.gmra.mxu1 %vm1851_vm15, %v2262_v34  ;;  %3304 = vmatmul.msk.bf16.vlgmr.msrb.gmra.mxu3 %vm2323_vm5, %v2332_v48  ;;  %v2679_v36 = vand.u32 %v3366_v32, %v4819_v39  ;;  %v2761_v48 = vand.u32 %v3384_v41, %v4819_v39 }
 0x463   : > { %2564 = vmatpush.bf16.msra.mxu3 %v2556_v63  ;;  %2646 = vmatpush.bf16.msrb.mxu1 %v2638_v23  ;;  %v2739_v63 = vld [vmem:[#allocation5 + $0x28] sm:$0xff] }
 0x464   : > { %v2740_v0 = vpack.c.bf16 %v2739_v63, %v2698_v57 }
 0x467   : > { %2565 = vmatpush.bf16.msra.mxu3 %v3433_v3  ;;  %2647 = vmatpush.bf16.msrb.mxu1 %v3437_v26 }
 0x46b   : > { %2728 = vmatpush.bf16.msrb.mxu3 %v2720_v24 }
 0x46f   : > { %2729 = vmatpush.bf16.msrb.mxu3 %v3441_v27 }
 0x4df   : > { %v2311_v18 = vpop.f32.mrf.mxu1 }
 0x4e0   : > { %v2312_v22 = vadd.f32 %v3678_v9, %v2311_v18 }
 0x4e2   : > { %vm2316_vm7 = vcmp.gt.f32.partialorder %v2312_v22, 0.0  ;;  %v2319_v25 = vmul.f32 %v2318_v19, %v2312_v22 }
 0x4e4   : > { %v2321_v28 = vsel %vm2316_vm7, %v2312_v22, %v2319_v25 }
 0x4e5   : > { %2328 = vst.msk [vmem:[#allocation5 + $0x10] sm:$0xff] %vm2323_vm5, %v2321_v28  ;;  %v2405_v1 = vpop.f32.mrf.mxu3 }
 0x4e7   : > { %v2313_v31 = vpop.f32.mrf.mxu1 }
 0x4e8   : > { %v2314_v13 = vadd.f32 %v3678_v9, %v2313_v31 }
 0x4ea   : > { %vm2317_vm8 = vcmp.gt.f32.partialorder %v2314_v13, 0.0  ;;  %v2320_v33 = vmul.f32 %v2318_v19, %v2314_v13 }
 0x4ec   : > { %v2322_v34 = vsel %vm2317_vm8, %v2314_v13, %v2320_v33  ;;  %v2337_v35 = vld [vmem:[#allocation5 + $0x10] sm:$0xff] }
 0x4ed   : > { %2329 = vst.msk [vmem:[#allocation5 + $0x18] sm:$0xff] %vm2323_vm5, %v2322_v34  ;;  %v2338_v37 = vpack.c.bf16 %v2337_v35, %v4828_v46  ;;  %v2410_v42 = vld [vmem:[#allocation5 + $0xc] sm:$0xff]  ;;  %v3443_v46 = vld [vmem:[#allocation33 + $0xa0] sm:$0xff]  ;;  %v2407_v3 = vpop.f32.mrf.mxu3 }
 0x4ee   : > { %v2451_v43 = vld [vmem:[#allocation5 + $0xe] sm:$0xff] }
 0x4ef   : > { %3295 = vmatmul.msk.bf16.vlgmr.msrb.gmra.mxu2 %vm2323_vm5, %v2338_v37  ;;  %v2492_v52 = vld [vmem:[#allocation5 + $0xf] sm:$0xff] }
 0x4f0   : > { %2687 = vmatpush.bf16.msrb.mxu2 %v2679_v36  ;;  %v3679_v37 = vld [vmem:[#allocation35] ss:$0 sm:$0xff] }
 0x4f4   : > { %v2411_v44 = vld [vmem:[#allocation5 + $0x14] sm:$0xff]  ;;  %2688 = vmatpush.bf16.msrb.mxu2 %v3439_v40  ;;  %v2657_v61 = vld [vmem:[#allocation5 + $0x1c] sm:$0xff] }
 0x4f5   : > { %v2452_v45 = vld [vmem:[#allocation5 + $0x16] sm:$0xff]  ;;  %v2412_v49 = vpack.c.bf16 %v2411_v44, %v2410_v42  ;;  %v2658_v62 = vpack.c.bf16 %v2657_v61, %v2411_v44 }
 0x4f6   : > { %v2534_v47 = vld [vmem:[#allocation5 + $0x18] sm:$0xff]  ;;  %v2453_v50 = vpack.c.bf16 %v2452_v45, %v2451_v43  ;;  %v3680_v42 = vld [vmem:[#allocation36] ss:$0 sm:$0xff] }
 0x4f7   : > { %v2535_v51 = vpack.c.bf16 %v2534_v47, %v2337_v35  ;;  %3313 = vmatmul.msk.bf16.vlgmr.msrb.gmra.mxu0 %vm2323_vm5, %v2412_v49  ;;  %v2493_v11 = vld [vmem:[#allocation5 + $0x17] sm:$0xff]  ;;  %v2699_v60 = vpack.c.bf16 %v2698_v57, %v2534_v47 }
 0x4f8   : > { %3322 = vmatmul.msk.bf16.vlgmr.msra.gmra.mxu1 %vm2323_vm5, %v2453_v50  ;;  %2769 = vmatpush.bf16.msrb.mxu0 %v2761_v48  ;;  %v2494_v53 = vpack.c.bf16 %v2493_v11, %v2492_v52  ;;  %v2574_v54 = vld [vmem:[#allocation5 + $0x11] sm:$0xff]  ;;  %v2575_v55 = vld [vmem:[#allocation5 + $0x19] sm:$0xff]  ;;  %v2793_v50 = vstv %s3269_s28 }
 0x4f9   : > { %3340 = vmatmul.msk.bf16.vlgmr.msra.gmra.mxu3 %vm2323_vm5, %v2535_v51  ;;  %v2615_v39 = vld [vmem:[#allocation5 + $0x12] sm:$0xff]  ;;  %v2616_v56 = vld [vmem:[#allocation5 + $0x1a] sm:$0xff]  ;;  %v2576_v58 = vpack.c.bf16 %v2575_v55, %v2574_v54 }
 0x4fa   : > { %v2617_v59 = vpack.c.bf16 %v2616_v56, %v2615_v39 }
 0x4fc   : > { %2770 = vmatpush.bf16.msrb.mxu0 %v3443_v46 }
 0x4ff   : > { %3331 = vmatmul.msk.bf16.vlgmr.msra.gmra.mxu2 %vm2323_vm5, %v2494_v53 }
 0x507   : > { %3349 = vmatmul.msk.bf16.vlgmr.msra.gmra.mxu0 %vm2323_vm5, %v2576_v58 }
 0x508   : > { %3358 = vmatmul.msk.bf16.vlgmr.msrb.gmra.mxu1 %vm2323_vm5, %v2617_v59 }
 0x509   : > { %3376 = vmatmul.msk.bf16.vlgmr.msrb.gmra.mxu3 %vm2323_vm5, %v2699_v60 }
 0x50f   : > { %3367 = vmatmul.msk.bf16.vlgmr.msrb.gmra.mxu2 %vm2323_vm5, %v2658_v62 }
 0x517   : > { %3385 = vmatmul.msk.bf16.vlgmr.msrb.gmra.mxu0 %vm2323_vm5, %v2740_v0 }
 0x572   : > { %v2374_v2 = vpop.f32.mrf.mxu2 }
 0x573   : > { %v2406_v7 = vadd.f32 %v2405_v1, %v2374_v2 }
 0x574   : > { %v2444_v4 = vpop.f32.mrf.mxu0 }
 0x575   : > { %v2485_v5 = vpop.f32.mrf.mxu1  ;;  %v2449_v10 = vadd.f32 %v2444_v4, %v2406_v7 }
 0x577   : > { %v2490_v15 = vadd.f32 %v2485_v5, %v2449_v10 }
 0x57a   : > { %v2376_v6 = vpop.f32.mrf.mxu2 }
 0x57b   : > { %v2408_v16 = vadd.f32 %v2407_v3, %v2376_v6 }
 0x57c   : > { %v2446_v8 = vpop.f32.mrf.mxu0  ;;  %v2567_v9 = vpop.f32.mrf.mxu3 }
 0x57d   : > { %v2487_v17 = vpop.f32.mrf.mxu1  ;;  %v2450_v20 = vadd.f32 %v2446_v8, %v2408_v16 }
 0x57f   : > { %v2491_v24 = vadd.f32 %v2487_v17, %v2450_v20 }
 0x582   : > { %v2526_v12 = vpop.f32.mrf.mxu2 }
 0x583   : > { %v2531_v19 = vadd.f32 %v2526_v12, %v2490_v15 }
 0x584   : > { %v2608_v18 = vpop.f32.mrf.mxu0  ;;  %v2569_v21 = vpop.f32.mrf.mxu3 }
 0x585   : > { %v2572_v22 = vadd.f32 %v2567_v9, %v2531_v19  ;;  %v2649_v28 = vpop.f32.mrf.mxu1 }
 0x587   : > { %v2613_v26 = vadd.f32 %v2608_v18, %v2572_v22 }
 0x589   : > { %v2654_v29 = vadd.f32 %v2649_v28, %v2613_v26 }
 0x58a   : > { %v2528_v23 = vpop.f32.mrf.mxu2 }
 0x58b   : > { %v2532_v27 = vadd.f32 %v2528_v23, %v2491_v24 }
 0x58c   : > { %v2610_v25 = vpop.f32.mrf.mxu0  ;;  %v2731_v31 = vpop.f32.mrf.mxu3 }
 0x58d   : > { %v2573_v30 = vadd.f32 %v2569_v21, %v2532_v27  ;;  %v2651_v38 = vpop.f32.mrf.mxu1 }
 0x58f   : > { %v2614_v34 = vadd.f32 %v2610_v25, %v2573_v30 }
 0x591   : > { %v2655_v14 = vadd.f32 %v2651_v38, %v2614_v34 }
 0x592   : > { %v2690_v13 = vpop.f32.mrf.mxu2 }
 0x593   : > { %v2695_v32 = vadd.f32 %v2690_v13, %v2654_v29 }
 0x594   : > { %v2772_v33 = vpop.f32.mrf.mxu0  ;;  %v2733_v44 = vpop.f32.mrf.mxu3 }
 0x595   : > { %v2736_v35 = vadd.f32 %v2731_v31, %v2695_v32 }
 0x597   : > { %v2777_v36 = vadd.f32 %v2772_v33, %v2736_v35 }
 0x599   : > { %v2783_v41 = vmul.f32 %v3679_v37, %v2777_v36 }
 0x59a   : > { %v2692_v40 = vpop.f32.mrf.mxu2 }
 0x59b   : > { %v2696_v43 = vadd.f32 %v2692_v40, %v2655_v14  ;;  %v2789_v48 = vadd.f32 %v3680_v42, %v2783_v41 }
 0x59c   : > { %v2774_v47 = vpop.f32.mrf.mxu0 }
 0x59d   : > { %v2737_v45 = vadd.f32 %v2733_v44, %v2696_v43  ;;  %v2794_v46 = vmul.f32 %v2793_v50, %v2789_v48  ;;  %vm2791_vm9 = vcmp.gt.f32.partialorder %v2789_v48, 0.0 }
 0x59f   : > { %v2778_v49 = vadd.f32 %v2774_v47, %v2737_v45  ;;  %v2796_v53 = vsel %vm2791_vm9, %v2789_v48, %v2794_v46 }
 0x5a1   : > { %v2784_v51 = vmul.f32 %v3679_v37, %v2778_v49 }
 0x5a3   : > { %v2790_v11 = vadd.f32 %v3680_v42, %v2784_v51 }
 0x5a5   : > { %vm2792_vm10 = vcmp.gt.f32.partialorder %v2790_v11, 0.0  ;;  %v2795_v52 = vmul.f32 %v2793_v50, %v2790_v11 }
 0x5a7   : > { %v2797_v54 = vsel %vm2792_vm10, %v2790_v11, %v2795_v52 }
 0x5a8   : > { %v2798_v55 = vmax.f32 %v2796_v53, %v2797_v54 }
 0x5aa   : > { %v2799_v39 = vrot.slane %v2798_v55, 4 }
 0x5ac   : > { %v2800_v56 = vmax.f32 %v2798_v55, %v2799_v39 }
 0x5ae   : > { %v2801_v57 = vrot.slane %v2800_v56, 2 }
 0x5b0   : > { %v2802_v58 = vmax.f32 %v2800_v56, %v2801_v57 }
 0x5b2   : > { %v2803_v59 = vrot.slane %v2802_v58, 1 }
 0x5b4   : > { %v2804_v60 = vmax.f32 %v2802_v58, %v2803_v59 }
 0x5b6   : > { %2805 = vst [vmem:[%s1000_s2] sm:$0x1] %v2804_v60 }
 0x5b7 PF: > { %s4917_s30 = sld [smem:[#allocation51_spill]] }
 0x5bd   : > { %s44_s3 = sadd.s32 1, %s4917_s30  }
 0x5be   : > { %p41_p7 = scmp.ge.s32.totalorder %s44_s3, 4  }
 0x5c0   :  { %43 = sbr.rel (!%p41_p7) target bundleno = 22 (0x16), region = 264 }
 0x5c5   :  { %2823 = vsyncpa [#allocation7], 1 }
 0x5c6   :  { %2825 = vsyncpa [#allocation7 + $0x1], 1 }
 0x5c7   :  { %2826 = vsyncpa [#allocation10], 1 }
 0x5c8   :  { %2827 = vsyncpa [#allocation13], 1 }
 0x5c9   :  { %2828 = vsyncpa [#allocation16], 1 }
 0x5ca   :  { %2829 = vsyncpa [#allocation19], 1 }
 0x5cb   :  { %2830 = vsyncpa [#allocation22], 1 }
 0x5cc   :  { %2831 = vsyncpa [#allocation25], 1 }
 0x5cd   :  { %2832 = vsyncpa [#allocation28], 1 }
 0x5ce   :  { %2833 = vsyncpa [#allocation31], 1 }
 0x5cf   :  { %2834 = vsyncpa [#allocation34], 1 }
 0x5d0   :  { %2835 = vsyncpa [#allocation37], 1 }
 0x5d1   :  { %2836 = vsyncpa [#allocation8], 1 }
 0x5d2   :  { %2838 = vsyncpa [#allocation8 + $0x1], 1 }

</bundles_post_ra>
